<compile_context>
chip_gen: v7x
topology: tpu7x:2x2x1
jax: 0.10.0
libtpu: 0.0.40
codegen_flags: <defaults>
</compile_context>

<pallas_src>
import functools

import jax
import jax.numpy as jnp
from jax.experimental import pallas as pl
from jax.experimental.pallas import tpu as pltpu


MAX_ROW_TILE = 256          # conservative for v7x (64 MiB VMEM) at real X-UMX sizes
VMEM_LIMIT = 64 * 1024 * 1024


def _round_up(x, m):
    return ((x + m - 1) // m) * m


def _row_tile(n):
    return min(MAX_ROW_TILE, _round_up(n, 8))


def _pad_rows(x, tile):
    n = x.shape[0]
    n_pad = _round_up(n, tile)
    if n_pad != n:
        pad = [(0, n_pad - n)] + [(0, 0)] * (x.ndim - 1)
        x = jnp.pad(x, pad)
    return x, n_pad


def _cparams():
    return pltpu.CompilerParams(dimension_semantics=("parallel",),
                                vmem_limit_bytes=VMEM_LIMIT)


# ----------------------------------------------------------------------------
# Kernel 1: fused affine1
#   y = 0.25 * sum_g tanh(x @ W1f[:, g*Hc:(g+1)*Hc] + b1f[g*Hc:(g+1)*Hc])
# (input (mean,scale), group conv, BN all pre-folded into W1f / b1f)
# ----------------------------------------------------------------------------
def affine1_kernel(x_ref, w_ref, b_ref, out_ref, *, hc):
    x = x_ref[...].astype(jnp.bfloat16)
    h = jnp.dot(x, w_ref[...], preferred_element_type=jnp.float32) + b_ref[...]
    h = jnp.tanh(h)
    out_ref[...] = 0.25 * (h[:, 0 * hc:1 * hc] + h[:, 1 * hc:2 * hc]
                           + h[:, 2 * hc:3 * hc] + h[:, 3 * hc:4 * hc])


def affine1_call(x, w1f, b1f, hc):
    n, feat = x.shape
    tile = _row_tile(n)
    x_p, n_pad = _pad_rows(x, tile)
    out = pl.pallas_call(
        functools.partial(affine1_kernel, hc=hc),
        out_shape=jax.ShapeDtypeStruct((n_pad, hc), jnp.float32),
        grid=(n_pad // tile,),
        in_specs=[pl.BlockSpec((tile, feat), lambda i: (i, 0)),
                  pl.BlockSpec((feat, 4 * hc), lambda i: (0, 0)),
                  pl.BlockSpec((1, 4 * hc), lambda i: (0, 0))],
        out_specs=pl.BlockSpec((tile, hc), lambda i: (i, 0)),
        compiler_params=_cparams(),
        cost_estimate=pl.CostEstimate(
            flops=2 * n_pad * feat * 4 * hc,
            transcendentals=n_pad * 4 * hc,
            bytes_accessed=4 * n_pad * (feat + hc) + 2 * feat * 4 * hc),
    )(x_p, w1f, b1f)
    return out[:n]


# ----------------------------------------------------------------------------
# Kernel 2: grouped dense layer  y = [x_0 @ W_0 | ... | x_{G-1} @ W_{G-1}] + b
#   (G=1 -> ordinary dense).  Used once per LSTM layer for the fused
#   8-direction input projection: dense for layer 0 (shared cross_1 input),
#   grouped over the 4 sources for layers > 0 (no block-diagonal waste).
# ----------------------------------------------------------------------------
def grouped_linear_kernel(x_ref, w_ref, b_ref, out_ref, *, groups, gin):
    x = x_ref[...].astype(jnp.bfloat16)
    ys = [jnp.dot(x[:, g * gin:(g + 1) * gin], w_ref[g],
                  preferred_element_type=jnp.float32)
          for g in range(groups)]
    y = ys[0] if groups == 1 else jnp.concatenate(ys, axis=-1)
    out_ref[...] = y + b_ref[...]


def grouped_linear_call(x, w, b):
    n, in_dim = x.shape
    groups, gin, gout = w.shape
    out_dim = groups * gout
    tile = _row_tile(n)
    x_p, n_pad = _pad_rows(x, tile)
    out = pl.pallas_call(
        functools.partial(grouped_linear_kernel, groups=groups, gin=gin),
        out_shape=jax.ShapeDtypeStruct((n_pad, out_dim), jnp.float32),
        grid=(n_pad // tile,),
        in_specs=[pl.BlockSpec((tile, in_dim), lambda i: (i, 0)),
                  pl.BlockSpec((groups, gin, gout), lambda i: (0, 0, 0)),
                  pl.BlockSpec((1, out_dim), lambda i: (0, 0))],
        out_specs=pl.BlockSpec((tile, out_dim), lambda i: (i, 0)),
        compiler_params=_cparams(),
        cost_estimate=pl.CostEstimate(
            flops=2 * n_pad * groups * gin * gout,
            transcendentals=0,
            bytes_accessed=4 * n_pad * (in_dim + out_dim) + 2 * groups * gin * gout),
    )(x_p, w, b)
    return out[:n]


# ----------------------------------------------------------------------------
# Kernel 3: fused 8-direction LSTM recurrence for one layer.
#   state h,c: (8, B, Hd); W_hh is per-direction (8, Hd, 4*Hd) so each step is
#   a single batched (8 x (B,Hd)@(Hd,4*Hd)) MXU matmul -- no block-diagonal
#   zero-multiply waste.  Gate columns per direction are [i | f | g | o].
#   Time is chunked: grid over chunks ("arbitrary"), unrolled fori inside;
#   the (h, c) carry lives in VMEM scratch across chunks.
# ----------------------------------------------------------------------------
def lstm_rec_kernel(xp_ref, whh_ref, hout_ref, h_sc, c_sc, *, chunk, hd):
    @pl.when(pl.program_id(0) == 0)
    def _():
        h_sc[...] = jnp.zeros_like(h_sc)
        c_sc[...] = jnp.zeros_like(c_sc)

    whh = whh_ref[...]                                   # (8, Hd, 4*Hd) bf16, resident

    def step(t, carry):
        h, c = carry                                     # (8, B, Hd) f32
        gates = xp_ref[t] + jnp.einsum(
            "dbh,dhg->dbg", h.astype(jnp.bfloat16), whh,
            preferred_element_type=jnp.float32)          # (8, B, 4*Hd)
        i = jax.nn.sigmoid(gates[..., 0 * hd:1 * hd])
        f = jax.nn.sigmoid(gates[..., 1 * hd:2 * hd])
        g = jnp.tanh(gates[..., 2 * hd:3 * hd])
        o = jax.nn.sigmoid(gates[..., 3 * hd:4 * hd])
        c = f * c + i * g
        h = o * jnp.tanh(c)
        hout_ref[t] = h
        return (h, c)

    h, c = jax.lax.fori_loop(0, chunk, step, (h_sc[...], c_sc[...]), unroll=True)
    h_sc[...] = h
    c_sc[...] = c


def lstm_layer_call(xp, whh_b, hd):
    # xp: (F, 8, B, 4*Hd) f32, already time-flipped for reverse directions.
    f_len, ndir, b, g4 = xp.shape
    chunk = min(16, f_len)
    f_pad = _round_up(f_len, chunk)
    if f_pad != f_len:
        xp = jnp.pad(xp, ((0, f_pad - f_len), (0, 0), (0, 0), (0, 0)))
    # TODO(synk): fuse the per-layer input projection into this kernel (load a
    # forward and a reverse z chunk per grid step) to avoid the xp HBM
    # round-trip, and split the 8 directions over a leading "parallel" axis so
    # both v7x TensorCores take half the recurrence.
    out = pl.pallas_call(
        functools.partial(lstm_rec_kernel, chunk=chunk, hd=hd),
        out_shape=jax.ShapeDtypeStruct((f_pad, ndir, b, hd), jnp.float32),
        grid=(f_pad // chunk,),
        in_specs=[pl.BlockSpec((chunk, ndir, b, g4), lambda i: (i, 0, 0, 0)),
                  pl.BlockSpec((ndir, hd, g4), lambda i: (0, 0, 0))],
        out_specs=pl.BlockSpec((chunk, ndir, b, hd), lambda i: (i, 0, 0, 0)),
        scratch_shapes=[pltpu.VMEM((ndir, b, hd), jnp.float32),
                        pltpu.VMEM((ndir, b, hd), jnp.float32)],
        compiler_params=pltpu.CompilerParams(
            dimension_semantics=("arbitrary",), vmem_limit_bytes=VMEM_LIMIT),
        cost_estimate=pl.CostEstimate(
            flops=2 * f_pad * ndir * b * hd * 4 * hd,
            transcendentals=f_pad * ndir * b * 5 * hd,
            bytes_accessed=4 * f_pad * ndir * b * 5 * hd + 2 * ndir * hd * 4 * hd),
    )(xp, whh_b)
    return out[:f_len]


# ----------------------------------------------------------------------------
# Kernel 4: fused affine2
#   h1  = relu(z @ W2af + b2af)                 (BN folded into W2af)
#   y_g = relu(h1[:, g*Hc:(g+1)*Hc] @ W2bf[g] + b2bf[g])
#         (BN, output_scale, output_means folded into W2bf/b2bf)
#   out = [y_0 | y_1 | y_2 | y_3]   (lane-dense (N, 4*C*bins) slab)
# ----------------------------------------------------------------------------
def affine2_kernel(z_ref, w2a_ref, b2a_ref, w2b_ref, b2b_ref, out_ref, *, hc):
    z = z_ref[...].astype(jnp.bfloat16)
    h1 = jnp.dot(z, w2a_ref[...], preferred_element_type=jnp.float32) + b2a_ref[...]
    h1 = jnp.maximum(h1, 0.0).astype(jnp.bfloat16)
    ys = []
    for g in range(4):  # static unroll over source groups
        y = jnp.dot(h1[:, g * hc:(g + 1) * hc], w2b_ref[g],
                    preferred_element_type=jnp.float32)
        y = y + b2b_ref[g][None, :]
        ys.append(jnp.maximum(y, 0.0))
    out_ref[...] = jnp.concatenate(ys, axis=-1)


def affine2_call(z, w2af, b2af, w2bf, b2bf, hc):
    n, in_dim = z.shape
    fout = w2bf.shape[2]
    tile = _row_tile(n)
    z_p, n_pad = _pad_rows(z, tile)
    out = pl.pallas_call(
        functools.partial(affine2_kernel, hc=hc),
        out_shape=jax.ShapeDtypeStruct((n_pad, 4 * fout), jnp.float32),
        grid=(n_pad // tile,),
        in_specs=[pl.BlockSpec((tile, in_dim), lambda i: (i, 0)),
                  pl.BlockSpec((in_dim, 4 * hc), lambda i: (0, 0)),
                  pl.BlockSpec((1, 4 * hc), lambda i: (0, 0)),
                  pl.BlockSpec((4, hc, fout), lambda i: (0, 0, 0)),
                  pl.BlockSpec((4, fout), lambda i: (0, 0))],
        out_specs=pl.BlockSpec((tile, 4 * fout), lambda i: (i, 0)),
        compiler_params=_cparams(),
        cost_estimate=pl.CostEstimate(
            flops=2 * n_pad * (in_dim * 4 * hc + 4 * hc * fout),
            transcendentals=0,
            bytes_accessed=4 * n_pad * (in_dim + 4 * fout)
            + 2 * (in_dim * 4 * hc + 4 * hc * fout)),
    )(z_p, w2af, b2af, w2bf, b2bf)
    return out[:n]


# ----------------------------------------------------------------------------
# Parameter construction (deterministic, synthetic), generated in PyTorch-like
# layouts and then folded/fused into the kernel-friendly layouts.
# ----------------------------------------------------------------------------
def make_params(key, *, C, bins, max_bins, Hc, Hd, nb_layers):
    ks = iter(jax.random.split(key, 256))

    def nrm(shape, scale=0.2):
        return scale * jax.random.normal(next(ks), shape, jnp.float32)

    def bn_fold(n):
        gamma = 1.0 + 0.1 * jax.random.normal(next(ks), (n,), jnp.float32)
        beta = 0.1 * jax.random.normal(next(ks), (n,), jnp.float32)
        rmean = 0.1 * jax.random.normal(next(ks), (n,), jnp.float32)
        rvar = 1.0 + 0.5 * jax.random.uniform(next(ks), (n,), jnp.float32)
        scale = gamma * jax.lax.rsqrt(rvar + 1e-5)
        shift = beta - rmean * scale
        return scale, shift

    fin = C * max_bins
    fout = C * bins
    p = {}

    # input / output standardization (per group, per bin; broadcast over C)
    input_means = nrm((4, max_bins), 0.1)
    input_scale = 1.0 + nrm((4, max_bins), 0.1)
    output_means = nrm((4, bins), 0.1)
    output_scale = 1.0 + nrm((4, bins), 0.1)
    im_feat = jnp.tile(input_means[:, None, :], (1, C, 1)).reshape(4, fin)
    isc_feat = jnp.tile(input_scale[:, None, :], (1, C, 1)).reshape(4, fin)
    omn_feat = jnp.tile(output_means[:, None, :], (1, C, 1)).reshape(4, fout)
    osc_feat = jnp.tile(output_scale[:, None, :], (1, C, 1)).reshape(4, fout)

    # ---- affine1: Conv1d(4*fin -> 4*Hc, k=1, groups=4, bias=False) + BN + tanh,
    # with the (spec + im)*isc prelude; folded into one dense (fin -> 4*Hc) affine.
    w1 = nrm((4 * Hc, fin))
    bn1_sc, bn1_sh = bn_fold(4 * Hc)
    w1f = jnp.zeros((fin, 4 * Hc), jnp.float32)
    b1f = jnp.zeros((4 * Hc,), jnp.float32)
    for g in range(4):
        wg_t = w1[g * Hc:(g + 1) * Hc, :].T                       # (fin, Hc)
        sg = bn1_sc[g * Hc:(g + 1) * Hc]
        hg = bn1_sh[g * Hc:(g + 1) * Hc]
        w_fold = (isc_feat[g][:, None] * wg_t) * sg[None, :]
        b_fold = ((im_feat[g] * isc_feat[g]) @ wg_t) * sg + hg
        w1f = w1f.at[:, g * Hc:(g + 1) * Hc].set(w_fold)
        b1f = b1f.at[g * Hc:(g + 1) * Hc].set(b_fold)
    p["w1f"] = w1f.astype(jnp.bfloat16)
    p["b1f"] = b1f.reshape(1, 4 * Hc)

    # ---- 4 bidirectional LSTMs (nb_layers layers, hidden=Hd, input=Hc at every
    # layer), fused per layer into one 8-direction recurrence.
    #   W_ih fused: dense (1, Hc, 32*Hd) for layer 0 (shared input); grouped
    #               (4, Hc, 8*Hd) per source for layers > 0.
    #   W_hh fused: per-direction (8, Hd, 4*Hd).
    #   Gate columns per direction: [i | f | g | o]; global dir-major layout
    #   (col = D*4*Hd + gate*Hd + k) for the projection output / bias.
    p["lstm"] = []
    for layer in range(nb_layers):
        groups = 1 if layer == 0 else 4
        dpg = 8 // groups                                 # directions per group
        wih_g = jnp.zeros((groups, Hc, dpg, 4, Hd), jnp.float32)
        whh_b = jnp.zeros((8, Hd, 4 * Hd), jnp.float32)
        bias = jnp.zeros((8, 4, Hd), jnp.float32)
        for src in range(4):
            for d in range(2):                            # d=0 forward, d=1 reverse
                D = 2 * src + d
                wih = nrm((4 * Hd, Hc), 0.25)             # PyTorch (4*Hd, in), rows [i;f;g;o]
                whh = nrm((4 * Hd, Hd), 0.25)
                b = nrm((4 * Hd,), 0.1) + nrm((4 * Hd,), 0.1)   # b_ih + b_hh
                wih_t = wih.T.reshape(Hc, 4, Hd)
                if layer == 0:
                    wih_g = wih_g.at[0, :, D, :, :].set(wih_t)
                else:
                    wih_g = wih_g.at[src, :, d, :, :].set(wih_t)
                whh_b = whh_b.at[D].set(whh.T)            # (Hd, 4*Hd), cols [i|f|g|o]
                bias = bias.at[D].set(b.reshape(4, Hd))
        p["lstm"].append((
            wih_g.reshape(groups, Hc, dpg * 4 * Hd).astype(jnp.bfloat16),
            bias.reshape(1, 32 * Hd),
            whh_b.astype(jnp.bfloat16),
        ))

    # ---- affine2: Conv1d(2Hc->4Hc,bias=False)+BN+ReLU,
    #               Conv1d(4Hc->4*fout,groups=4,bias=False)+BN,
    #               then *output_scale + output_means, ReLU.
    w2a = nrm((4 * Hc, 2 * Hc))
    s2a, h2a = bn_fold(4 * Hc)
    p["w2af"] = (w2a.T * s2a[None, :]).astype(jnp.bfloat16)       # (2Hc, 4Hc)
    p["b2af"] = h2a.reshape(1, 4 * Hc)

    w2b = nrm((4 * fout, Hc))
    s2b, h2b = bn_fold(4 * fout)
    w2bf = jnp.zeros((4, Hc, fout), jnp.float32)
    b2bf = jnp.zeros((4, fout), jnp.float32)
    for g in range(4):
        wg_t = w2b[g * fout:(g + 1) * fout, :].T                  # (Hc, fout)
        sg = s2b[g * fout:(g + 1) * fout]
        hg = h2b[g * fout:(g + 1) * fout]
        w2bf = w2bf.at[g].set(wg_t * (sg * osc_feat[g])[None, :])
        b2bf = b2bf.at[g].set(hg * osc_feat[g] + omn_feat[g])
    p["w2bf"] = w2bf.astype(jnp.bfloat16)
    p["b2bf"] = b2bf
    return p


# ----------------------------------------------------------------------------
# Forward pass glue
# ----------------------------------------------------------------------------
def x_umx_forward(spec, params, *, max_bins, nb_layers):
    """spec: (B, C, bins, frames) float32  ->  mask: (B, 4, C, bins, frames)."""
    B, C, bins, frames = spec.shape
    Hc = params["b2af"].shape[1] // 4
    Hd = Hc // 2

    # crop bins; rows are (frame, batch) time-major, features are (channel, bin)
    spec_c = spec[:, :, :max_bins, :]
    x = jnp.transpose(spec_c, (3, 0, 1, 2)).reshape(frames * B, C * max_bins)

    cross1 = affine1_call(x, params["w1f"], params["b1f"], Hc)     # (F*B, Hc)

    # TODO(synk): LSTM inter-layer dropout (p=0.4) only applies in training mode;
    # this implements the eval-mode forward (dropout is a no-op).
    rev_mask = jnp.array([False, True] * 4)      # odd direction index = reverse
    z = cross1                                   # layer-0 input rows (F*B, Hc)
    H = None
    for layer in range(nb_layers):
        wih_g, bias, whh_b = params["lstm"][layer]
        xp = grouped_linear_call(z, wih_g, bias)                   # (F*B, 32*Hd) dir-major
        xp = xp.reshape(frames, B, 8, 4 * Hd)
        xp = jnp.where(rev_mask[None, None, :, None],
                       jnp.flip(xp, axis=0), xp)                   # flip reverse dirs
        xp = jnp.transpose(xp, (0, 2, 1, 3))                       # (F, 8, B, 4*Hd)
        H = lstm_layer_call(xp, whh_b, Hd)                         # (F, 8, B, Hd)
        H = jnp.where(rev_mask[None, :, None, None],
                      jnp.flip(H, axis=0), H)                      # un-flip outputs
        H = jnp.transpose(H, (0, 2, 1, 3))                         # (F, B, 8, Hd)
        z = H.reshape(frames * B, 8 * Hd)        # == (F*B, 4*Hc): next layer input

    # per-source bidirectional outputs and their average
    avg = jnp.mean(H.reshape(frames, B, 4, Hc), axis=2)            # (F, B, Hc)
    cross1_tb = cross1.reshape(frames, B, Hc)
    z2 = jnp.concatenate([cross1_tb, avg], axis=-1).reshape(frames * B, 2 * Hc)

    mask_rows = affine2_call(z2, params["w2af"], params["b2af"],
                             params["w2bf"], params["b2bf"], Hc)   # (F*B, 4*C*bins)

    # (F, B, 4, C, bins) -> (B, 4, C, bins, F)
    mask = mask_rows.reshape(frames, B, 4, C, bins).transpose(1, 2, 3, 4, 0)
    return mask


if __name__ == "__main__":
    # Small config consistent with X_UMX: n_fft=62 -> nb_output_bins=32,
    # max_bins=16, hidden_channels=32, nb_channels=2, nb_layers=2, frames=8.
    B, C, n_fft, max_bins, Hc, nb_layers, frames = 2, 2, 62, 16, 32, 2, 8
    bins = n_fft // 2 + 1
    Hd = Hc // 2

    key = jax.random.PRNGKey(0)
    k_params, k_spec = jax.random.split(key)
    params = make_params(k_params, C=C, bins=bins, max_bins=max_bins,
                         Hc=Hc, Hd=Hd, nb_layers=nb_layers)

    spec = jax.random.uniform(k_spec, (B, C, bins, frames), jnp.float32)

    fwd = jax.jit(lambda s, p: x_umx_forward(s, p, max_bins=max_bins,
                                             nb_layers=nb_layers))
    mask = jax.block_until_ready(fwd(spec, params))

    assert mask.shape == (B, 4, C, bins, frames), mask.shape
    assert bool(jnp.all(jnp.isfinite(mask)))
    assert bool(jnp.all(mask >= 0.0))  # final relu
    print("KERNEL_OK")
</pallas_src>

<mosaic_0001>
module attributes {stable_mosaic.version = 11 : i64} {
  func.func @affine1_kernel(%arg0: i32, %arg1: memref<16x32xf32, #tpu.memory_space<vmem>>, %arg2: memref<32x128xbf16, #tpu.memory_space<vmem>>, %arg3: memref<1x128xf32, #tpu.memory_space<vmem>>, %arg4: memref<16x32xf32, #tpu.memory_space<vmem>>) attributes {dimension_semantics = [#tpu.dimension_semantics<parallel>], iteration_bounds = array<i64: 1>, scalar_prefetch = 0 : i64, scratch_operands = 0 : i64, tpu.core_type = #tpu.core_type<tc>, window_params = [{transform_indices = @transform_0, window_bounds = array<i64: 16, 32>}, {pipeline_mode = #tpu.pipeline_mode<synchronous>, transform_indices = @transform_1, window_bounds = array<i64: 32, 128>}, {pipeline_mode = #tpu.pipeline_mode<synchronous>, transform_indices = @transform_2, window_bounds = array<i64: 1, 128>}, {transform_indices = @transform_3, window_bounds = array<i64: 16, 32>}]} {
    %c0 = arith.constant 0 : index
    %c0_0 = arith.constant 0 : index
    %0 = vector.load %arg1[%c0, %c0_0] : memref<16x32xf32, #tpu.memory_space<vmem>>, vector<16x32xf32>
    %1 = arith.truncf %0 : vector<16x32xf32> to vector<16x32xbf16>
    %c0_1 = arith.constant 0 : index
    %c0_2 = arith.constant 0 : index
    %2 = vector.load %arg2[%c0_1, %c0_2] : memref<32x128xbf16, #tpu.memory_space<vmem>>, vector<32x128xbf16>
    %cst = arith.constant dense<0.000000e+00> : vector<16x128xf32>
    %3 = tpu.matmul %1, %2, %cst {dimension_numbers = #tpu.dot_dimension_numbers<[1], [0], [0], [1], [0, 0, 1, 1], [], []>} : vector<16x32xbf16>, vector<32x128xbf16>, vector<16x128xf32> -> vector<16x128xf32>
    %c0_3 = arith.constant 0 : index
    %c0_4 = arith.constant 0 : index
    %4 = vector.load %arg3[%c0_3, %c0_4] : memref<1x128xf32, #tpu.memory_space<vmem>>, vector<1x128xf32>
    %5 = vector.broadcast %4 : vector<1x128xf32> to vector<16x128xf32>
    %6 = arith.addf %3, %5 : vector<16x128xf32>
    %7 = math.tanh %6 : vector<16x128xf32>
    %8 = vector.extract_strided_slice %7 {offsets = [0, 0], sizes = [16, 32], strides = [1, 1]} : vector<16x128xf32> to vector<16x32xf32>
    %9 = vector.extract_strided_slice %7 {offsets = [0, 32], sizes = [16, 32], strides = [1, 1]} : vector<16x128xf32> to vector<16x32xf32>
    %10 = arith.addf %8, %9 : vector<16x32xf32>
    %11 = vector.extract_strided_slice %7 {offsets = [0, 64], sizes = [16, 32], strides = [1, 1]} : vector<16x128xf32> to vector<16x32xf32>
    %12 = arith.addf %10, %11 : vector<16x32xf32>
    %13 = vector.extract_strided_slice %7 {offsets = [0, 96], sizes = [16, 32], strides = [1, 1]} : vector<16x128xf32> to vector<16x32xf32>
    %14 = arith.addf %12, %13 : vector<16x32xf32>
    %cst_5 = arith.constant 2.500000e-01 : f32
    %15 = vector.broadcast %cst_5 : f32 to vector<16x32xf32>
    %16 = arith.mulf %15, %14 : vector<16x32xf32>
    %c0_6 = arith.constant 0 : index
    %c0_7 = arith.constant 0 : index
    %17 = vector.load %arg4[%c0_6, %c0_7] : memref<16x32xf32, #tpu.memory_space<vmem>>, vector<16x32xf32>
    tpu.vector_store %arg4[%c0_6, %c0_7], %16 {strides = array<i32>} : memref<16x32xf32, #tpu.memory_space<vmem>>, vector<16x32xf32>,
    return
  }
  func.func @transform_0(%arg0: i32) -> (i32, i32) {
    %c0_i32 = arith.constant 0 : i32
    %c0_i32_0 = arith.constant 0 : i32
    return %arg0, %c0_i32 : i32, i32
  }
  func.func @transform_1(%arg0: i32) -> (i32, i32) {
    %c0_i32 = arith.constant 0 : i32
    %c0_i32_0 = arith.constant 0 : i32
    %c0_i32_1 = arith.constant 0 : i32
    return %c0_i32, %c0_i32_0 : i32, i32
  }
  func.func @transform_2(%arg0: i32) -> (i32, i32) {
    %c0_i32 = arith.constant 0 : i32
    %c0_i32_0 = arith.constant 0 : i32
    %c0_i32_1 = arith.constant 0 : i32
    return %c0_i32, %c0_i32_0 : i32, i32
  }
  func.func @transform_3(%arg0: i32) -> (i32, i32) {
    %c0_i32 = arith.constant 0 : i32
    %c0_i32_0 = arith.constant 0 : i32
    return %arg0, %c0_i32 : i32, i32
  }
}

module attributes {stable_mosaic.version = 11 : i64} {
  func.func @grouped_linear_kernel(%arg0: i32, %arg1: memref<16x32xf32, #tpu.memory_space<vmem>>, %arg2: memref<1x32x512xbf16, #tpu.memory_space<vmem>>, %arg3: memref<1x512xf32, #tpu.memory_space<vmem>>, %arg4: memref<16x512xf32, #tpu.memory_space<vmem>>) attributes {dimension_semantics = [#tpu.dimension_semantics<parallel>], iteration_bounds = array<i64: 1>, scalar_prefetch = 0 : i64, scratch_operands = 0 : i64, tpu.core_type = #tpu.core_type<tc>, window_params = [{transform_indices = @transform_0, window_bounds = array<i64: 16, 32>}, {pipeline_mode = #tpu.pipeline_mode<synchronous>, transform_indices = @transform_1, window_bounds = array<i64: 1, 32, 512>}, {pipeline_mode = #tpu.pipeline_mode<synchronous>, transform_indices = @transform_2, window_bounds = array<i64: 1, 512>}, {transform_indices = @transform_3, window_bounds = array<i64: 16, 512>}]} {
    %c0 = arith.constant 0 : index
    %c0_0 = arith.constant 0 : index
    %0 = vector.load %arg1[%c0, %c0_0] : memref<16x32xf32, #tpu.memory_space<vmem>>, vector<16x32xf32>
    %1 = arith.truncf %0 : vector<16x32xf32> to vector<16x32xbf16>
    %c0_1 = arith.constant 0 : index
    %c0_2 = arith.constant 0 : index
    %c0_3 = arith.constant 0 : index
    %2 = vector.load %arg2[%c0_1, %c0_2, %c0_3] : memref<1x32x512xbf16, #tpu.memory_space<vmem>>, vector<1x32x512xbf16>
    %3 = vector.shape_cast %2 : vector<1x32x512xbf16> to vector<32x512xbf16>
    %cst = arith.constant dense<0.000000e+00> : vector<16x512xf32>
    %4 = tpu.matmul %1, %3, %cst {dimension_numbers = #tpu.dot_dimension_numbers<[1], [0], [0], [1], [0, 0, 1, 1], [], []>} : vector<16x32xbf16>, vector<32x512xbf16>, vector<16x512xf32> -> vector<16x512xf32>
    %c0_4 = arith.constant 0 : index
    %c0_5 = arith.constant 0 : index
    %5 = vector.load %arg3[%c0_4, %c0_5] : memref<1x512xf32, #tpu.memory_space<vmem>>, vector<1x512xf32>
    %6 = vector.broadcast %5 : vector<1x512xf32> to vector<16x512xf32>
    %7 = arith.addf %4, %6 : vector<16x512xf32>
    %c0_6 = arith.constant 0 : index
    %c0_7 = arith.constant 0 : index
    %8 = vector.load %arg4[%c0_6, %c0_7] : memref<16x512xf32, #tpu.memory_space<vmem>>, vector<16x512xf32>
    tpu.vector_store %arg4[%c0_6, %c0_7], %7 {strides = array<i32>} : memref<16x512xf32, #tpu.memory_space<vmem>>, vector<16x512xf32>,
    return
  }
  func.func @transform_0(%arg0: i32) -> (i32, i32) {
    %c0_i32 = arith.constant 0 : i32
    %c0_i32_0 = arith.constant 0 : i32
    return %arg0, %c0_i32 : i32, i32
  }
  func.func @transform_1(%arg0: i32) -> (i32, i32, i32) {
    %c0_i32 = arith.constant 0 : i32
    %c0_i32_0 = arith.constant 0 : i32
    %c0_i32_1 = arith.constant 0 : i32
    %c0_i32_2 = arith.constant 0 : i32
    return %c0_i32, %c0_i32_0, %c0_i32_1 : i32, i32, i32
  }
  func.func @transform_2(%arg0: i32) -> (i32, i32) {
    %c0_i32 = arith.constant 0 : i32
    %c0_i32_0 = arith.constant 0 : i32
    %c0_i32_1 = arith.constant 0 : i32
    return %c0_i32, %c0_i32_0 : i32, i32
  }
  func.func @transform_3(%arg0: i32) -> (i32, i32) {
    %c0_i32 = arith.constant 0 : i32
    %c0_i32_0 = arith.constant 0 : i32
    return %arg0, %c0_i32 : i32, i32
  }
}

module attributes {stable_mosaic.version = 11 : i64} {
  func.func @lstm_rec_kernel(%arg0: i32, %arg1: memref<8x8x2x64xf32, #tpu.memory_space<vmem>>, %arg2: memref<8x16x64xbf16, #tpu.memory_space<vmem>>, %arg3: memref<8x8x2x16xf32, #tpu.memory_space<vmem>>, %arg4: memref<8x2x16xf32, #tpu.memory_space<vmem>>, %arg5: memref<8x2x16xf32, #tpu.memory_space<vmem>>) attributes {dimension_semantics = [#tpu.dimension_semantics<arbitrary>], iteration_bounds = array<i64: 1>, scalar_prefetch = 0 : i64, scratch_operands = 2 : i64, tpu.core_type = #tpu.core_type<tc>, window_params = [{transform_indices = @transform_0, window_bounds = array<i64: 8, 8, 2, 64>}, {pipeline_mode = #tpu.pipeline_mode<synchronous>, transform_indices = @transform_1, window_bounds = array<i64: 8, 16, 64>}, {transform_indices = @transform_2, window_bounds = array<i64: 8, 8, 2, 16>}]} {
    %c0_i32 = arith.constant 0 : i32
    %0 = arith.cmpi eq, %arg0, %c0_i32 : i32
    %1 = arith.extui %0 : i1 to i32
    %c0_i32_0 = arith.constant 0 : i32
    %2 = arith.cmpi ne, %1, %c0_i32_0 : i32
    scf.if %2 {
      %cst_95 = arith.constant 0.000000e+00 : f32
      %288 = vector.broadcast %cst_95 : f32 to vector<8x2x16xf32>
      %c0_96 = arith.constant 0 : index
      %c0_97 = arith.constant 0 : index
      %c0_98 = arith.constant 0 : index
      %289 = vector.load %arg4[%c0_96, %c0_97, %c0_98] : memref<8x2x16xf32, #tpu.memory_space<vmem>>, vector<8x2x16xf32>
      tpu.vector_store %arg4[%c0_96, %c0_97, %c0_98], %288 {strides = array<i32>} : memref<8x2x16xf32, #tpu.memory_space<vmem>>, vector<8x2x16xf32>,
      %cst_99 = arith.constant 0.000000e+00 : f32
      %290 = vector.broadcast %cst_99 : f32 to vector<8x2x16xf32>
      %c0_100 = arith.constant 0 : index
      %c0_101 = arith.constant 0 : index
      %c0_102 = arith.constant 0 : index
      %291 = vector.load %arg5[%c0_100, %c0_101, %c0_102] : memref<8x2x16xf32, #tpu.memory_space<vmem>>, vector<8x2x16xf32>
      tpu.vector_store %arg5[%c0_100, %c0_101, %c0_102], %290 {strides = array<i32>} : memref<8x2x16xf32, #tpu.memory_space<vmem>>, vector<8x2x16xf32>,
    } else {
    }
    %c0 = arith.constant 0 : index
    %c0_1 = arith.constant 0 : index
    %c0_2 = arith.constant 0 : index
    %3 = vector.load %arg2[%c0, %c0_1, %c0_2] : memref<8x16x64xbf16, #tpu.memory_space<vmem>>, vector<8x16x64xbf16>
    %c0_3 = arith.constant 0 : index
    %c0_4 = arith.constant 0 : index
    %c0_5 = arith.constant 0 : index
    %4 = vector.load %arg4[%c0_3, %c0_4, %c0_5] : memref<8x2x16xf32, #tpu.memory_space<vmem>>, vector<8x2x16xf32>
    %c0_6 = arith.constant 0 : index
    %c0_7 = arith.constant 0 : index
    %c0_8 = arith.constant 0 : index
    %5 = vector.load %arg5[%c0_6, %c0_7, %c0_8] : memref<8x2x16xf32, #tpu.memory_space<vmem>>, vector<8x2x16xf32>
    %c0_i32_9 = arith.constant 0 : i32
    %6 = arith.index_cast %c0_i32_9 : i32 to index
    %c0_10 = arith.constant 0 : index
    %c0_11 = arith.constant 0 : index
    %c0_12 = arith.constant 0 : index
    %7 = vector.load %arg1[%6, %c0_10, %c0_11, %c0_12] : memref<8x8x2x64xf32, #tpu.memory_space<vmem>>, vector<1x8x2x64xf32>
    %8 = vector.shape_cast %7 : vector<1x8x2x64xf32> to vector<8x2x64xf32>
    %9 = arith.truncf %4 : vector<8x2x16xf32> to vector<8x2x16xbf16>
    "tpu.trace_start"() <{level = 10 : i32, message = "dbh,dhg->dbg"}> : () -> ()
    %cst = arith.constant dense<0.000000e+00> : vector<8x2x64xf32>
    %10 = tpu.matmul %9, %3, %cst {dimension_numbers = #tpu.dot_dimension_numbers<[2], [1], [1], [2], [0, 0, 0, 1, 1, 2], [0], [0]>} : vector<8x2x16xbf16>, vector<8x16x64xbf16>, vector<8x2x64xf32> -> vector<8x2x64xf32>
    "tpu.trace_stop"() : () -> ()
    %11 = arith.addf %8, %10 : vector<8x2x64xf32>
    %12 = vector.extract_strided_slice %11 {offsets = [0, 0, 0], sizes = [8, 2, 16], strides = [1, 1, 1]} : vector<8x2x64xf32> to vector<8x2x16xf32>
    %13 = arith.negf %12 : vector<8x2x16xf32>
    %14 = math.exp %13 : vector<8x2x16xf32>
    %cst_13 = arith.constant 1.000000e+00 : f32
    %15 = vector.broadcast %cst_13 : f32 to vector<8x2x16xf32>
    %16 = arith.addf %15, %14 : vector<8x2x16xf32>
    %17 = arith.divf %15, %16 : vector<8x2x16xf32>
    %18 = vector.extract_strided_slice %11 {offsets = [0, 0, 16], sizes = [8, 2, 16], strides = [1, 1, 1]} : vector<8x2x64xf32> to vector<8x2x16xf32>
    %19 = arith.negf %18 : vector<8x2x16xf32>
    %20 = math.exp %19 : vector<8x2x16xf32>
    %cst_14 = arith.constant 1.000000e+00 : f32
    %21 = vector.broadcast %cst_14 : f32 to vector<8x2x16xf32>
    %22 = arith.addf %21, %20 : vector<8x2x16xf32>
    %23 = arith.divf %21, %22 : vector<8x2x16xf32>
    %24 = vector.extract_strided_slice %11 {offsets = [0, 0, 32], sizes = [8, 2, 16], strides = [1, 1, 1]} : vector<8x2x64xf32> to vector<8x2x16xf32>
    %25 = math.tanh %24 : vector<8x2x16xf32>
    %26 = vector.extract_strided_slice %11 {offsets = [0, 0, 48], sizes = [8, 2, 16], strides = [1, 1, 1]} : vector<8x2x64xf32> to vector<8x2x16xf32>
    %27 = arith.negf %26 : vector<8x2x16xf32>
    %28 = math.exp %27 : vector<8x2x16xf32>
    %cst_15 = arith.constant 1.000000e+00 : f32
    %29 = vector.broadcast %cst_15 : f32 to vector<8x2x16xf32>
    %30 = arith.addf %29, %28 : vector<8x2x16xf32>
    %31 = arith.divf %29, %30 : vector<8x2x16xf32>
    %32 = arith.mulf %23, %5 : vector<8x2x16xf32>
    %33 = arith.mulf %17, %25 : vector<8x2x16xf32>
    %34 = arith.addf %32, %33 : vector<8x2x16xf32>
    %35 = math.tanh %34 : vector<8x2x16xf32>
    %36 = arith.mulf %31, %35 : vector<8x2x16xf32>
    %37 = arith.index_cast %c0_i32_9 : i32 to index
    %c0_16 = arith.constant 0 : index
    %c0_17 = arith.constant 0 : index
    %c0_18 = arith.constant 0 : index
    %38 = vector.load %arg3[%37, %c0_16, %c0_17, %c0_18] : memref<8x8x2x16xf32, #tpu.memory_space<vmem>>, vector<1x8x2x16xf32>
    %39 = vector.shape_cast %38 : vector<1x8x2x16xf32> to vector<8x2x16xf32>
    %40 = vector.shape_cast %36 : vector<8x2x16xf32> to vector<1x8x2x16xf32>
    tpu.vector_store %arg3[%37, %c0_16, %c0_17, %c0_18], %40 {strides = array<i32>} : memref<8x8x2x16xf32, #tpu.memory_space<vmem>>, vector<1x8x2x16xf32>,
    %c1_i32 = arith.constant 1 : i32
    %41 = arith.index_cast %c1_i32 : i32 to index
    %c0_19 = arith.constant 0 : index
    %c0_20 = arith.constant 0 : index
    %c0_21 = arith.constant 0 : index
    %42 = vector.load %arg1[%41, %c0_19, %c0_20, %c0_21] : memref<8x8x2x64xf32, #tpu.memory_space<vmem>>, vector<1x8x2x64xf32>
    %43 = vector.shape_cast %42 : vector<1x8x2x64xf32> to vector<8x2x64xf32>
    %44 = arith.truncf %36 : vector<8x2x16xf32> to vector<8x2x16xbf16>
    "tpu.trace_start"() <{level = 10 : i32, message = "dbh,dhg->dbg"}> : () -> ()
    %cst_22 = arith.constant dense<0.000000e+00> : vector<8x2x64xf32>
    %45 = tpu.matmul %44, %3, %cst_22 {dimension_numbers = #tpu.dot_dimension_numbers<[2], [1], [1], [2], [0, 0, 0, 1, 1, 2], [0], [0]>} : vector<8x2x16xbf16>, vector<8x16x64xbf16>, vector<8x2x64xf32> -> vector<8x2x64xf32>
    "tpu.trace_stop"() : () -> ()
    %46 = arith.addf %43, %45 : vector<8x2x64xf32>
    %47 = vector.extract_strided_slice %46 {offsets = [0, 0, 0], sizes = [8, 2, 16], strides = [1, 1, 1]} : vector<8x2x64xf32> to vector<8x2x16xf32>
    %48 = arith.negf %47 : vector<8x2x16xf32>
    %49 = math.exp %48 : vector<8x2x16xf32>
    %cst_23 = arith.constant 1.000000e+00 : f32
    %50 = vector.broadcast %cst_23 : f32 to vector<8x2x16xf32>
    %51 = arith.addf %50, %49 : vector<8x2x16xf32>
    %52 = arith.divf %50, %51 : vector<8x2x16xf32>
    %53 = vector.extract_strided_slice %46 {offsets = [0, 0, 16], sizes = [8, 2, 16], strides = [1, 1, 1]} : vector<8x2x64xf32> to vector<8x2x16xf32>
    %54 = arith.negf %53 : vector<8x2x16xf32>
    %55 = math.exp %54 : vector<8x2x16xf32>
    %cst_24 = arith.constant 1.000000e+00 : f32
    %56 = vector.broadcast %cst_24 : f32 to vector<8x2x16xf32>
    %57 = arith.addf %56, %55 : vector<8x2x16xf32>
    %58 = arith.divf %56, %57 : vector<8x2x16xf32>
    %59 = vector.extract_strided_slice %46 {offsets = [0, 0, 32], sizes = [8, 2, 16], strides = [1, 1, 1]} : vector<8x2x64xf32> to vector<8x2x16xf32>
    %60 = math.tanh %59 : vector<8x2x16xf32>
    %61 = vector.extract_strided_slice %46 {offsets = [0, 0, 48], sizes = [8, 2, 16], strides = [1, 1, 1]} : vector<8x2x64xf32> to vector<8x2x16xf32>
    %62 = arith.negf %61 : vector<8x2x16xf32>
    %63 = math.exp %62 : vector<8x2x16xf32>
    %cst_25 = arith.constant 1.000000e+00 : f32
    %64 = vector.broadcast %cst_25 : f32 to vector<8x2x16xf32>
    %65 = arith.addf %64, %63 : vector<8x2x16xf32>
    %66 = arith.divf %64, %65 : vector<8x2x16xf32>
    %67 = arith.mulf %58, %34 : vector<8x2x16xf32>
    %68 = arith.mulf %52, %60 : vector<8x2x16xf32>
    %69 = arith.addf %67, %68 : vector<8x2x16xf32>
    %70 = math.tanh %69 : vector<8x2x16xf32>
    %71 = arith.mulf %66, %70 : vector<8x2x16xf32>
    %72 = arith.index_cast %c1_i32 : i32 to index
    %c0_26 = arith.constant 0 : index
    %c0_27 = arith.constant 0 : index
    %c0_28 = arith.constant 0 : index
    %73 = vector.load %arg3[%72, %c0_26, %c0_27, %c0_28] : memref<8x8x2x16xf32, #tpu.memory_space<vmem>>, vector<1x8x2x16xf32>
    %74 = vector.shape_cast %73 : vector<1x8x2x16xf32> to vector<8x2x16xf32>
    %75 = vector.shape_cast %71 : vector<8x2x16xf32> to vector<1x8x2x16xf32>
    tpu.vector_store %arg3[%72, %c0_26, %c0_27, %c0_28], %75 {strides = array<i32>} : memref<8x8x2x16xf32, #tpu.memory_space<vmem>>, vector<1x8x2x16xf32>,
    %c2_i32 = arith.constant 2 : i32
    %76 = arith.index_cast %c2_i32 : i32 to index
    %c0_29 = arith.constant 0 : index
    %c0_30 = arith.constant 0 : index
    %c0_31 = arith.constant 0 : index
    %77 = vector.load %arg1[%76, %c0_29, %c0_30, %c0_31] : memref<8x8x2x64xf32, #tpu.memory_space<vmem>>, vector<1x8x2x64xf32>
    %78 = vector.shape_cast %77 : vector<1x8x2x64xf32> to vector<8x2x64xf32>
    %79 = arith.truncf %71 : vector<8x2x16xf32> to vector<8x2x16xbf16>
    "tpu.trace_start"() <{level = 10 : i32, message = "dbh,dhg->dbg"}> : () -> ()
    %cst_32 = arith.constant dense<0.000000e+00> : vector<8x2x64xf32>
    %80 = tpu.matmul %79, %3, %cst_32 {dimension_numbers = #tpu.dot_dimension_numbers<[2], [1], [1], [2], [0, 0, 0, 1, 1, 2], [0], [0]>} : vector<8x2x16xbf16>, vector<8x16x64xbf16>, vector<8x2x64xf32> -> vector<8x2x64xf32>
    "tpu.trace_stop"() : () -> ()
    %81 = arith.addf %78, %80 : vector<8x2x64xf32>
    %82 = vector.extract_strided_slice %81 {offsets = [0, 0, 0], sizes = [8, 2, 16], strides = [1, 1, 1]} : vector<8x2x64xf32> to vector<8x2x16xf32>
    %83 = arith.negf %82 : vector<8x2x16xf32>
    %84 = math.exp %83 : vector<8x2x16xf32>
    %cst_33 = arith.constant 1.000000e+00 : f32
    %85 = vector.broadcast %cst_33 : f32 to vector<8x2x16xf32>
    %86 = arith.addf %85, %84 : vector<8x2x16xf32>
    %87 = arith.divf %85, %86 : vector<8x2x16xf32>
    %88 = vector.extract_strided_slice %81 {offsets = [0, 0, 16], sizes = [8, 2, 16], strides = [1, 1, 1]} : vector<8x2x64xf32> to vector<8x2x16xf32>
    %89 = arith.negf %88 : vector<8x2x16xf32>
    %90 = math.exp %89 : vector<8x2x16xf32>
    %cst_34 = arith.constant 1.000000e+00 : f32
    %91 = vector.broadcast %cst_34 : f32 to vector<8x2x16xf32>
    %92 = arith.addf %91, %90 : vector<8x2x16xf32>
    %93 = arith.divf %91, %92 : vector<8x2x16xf32>
    %94 = vector.extract_strided_slice %81 {offsets = [0, 0, 32], sizes = [8, 2, 16], strides = [1, 1, 1]} : vector<8x2x64xf32> to vector<8x2x16xf32>
    %95 = math.tanh %94 : vector<8x2x16xf32>
    %96 = vector.extract_strided_slice %81 {offsets = [0, 0, 48], sizes = [8, 2, 16], strides = [1, 1, 1]} : vector<8x2x64xf32> to vector<8x2x16xf32>
    %97 = arith.negf %96 : vector<8x2x16xf32>
    %98 = math.exp %97 : vector<8x2x16xf32>
    %cst_35 = arith.constant 1.000000e+00 : f32
    %99 = vector.broadcast %cst_35 : f32 to vector<8x2x16xf32>
    %100 = arith.addf %99, %98 : vector<8x2x16xf32>
    %101 = arith.divf %99, %100 : vector<8x2x16xf32>
    %102 = arith.mulf %93, %69 : vector<8x2x16xf32>
    %103 = arith.mulf %87, %95 : vector<8x2x16xf32>
    %104 = arith.addf %102, %103 : vector<8x2x16xf32>
    %105 = math.tanh %104 : vector<8x2x16xf32>
    %106 = arith.mulf %101, %105 : vector<8x2x16xf32>
    %107 = arith.index_cast %c2_i32 : i32 to index
    %c0_36 = arith.constant 0 : index
    %c0_37 = arith.constant 0 : index
    %c0_38 = arith.constant 0 : index
    %108 = vector.load %arg3[%107, %c0_36, %c0_37, %c0_38] : memref<8x8x2x16xf32, #tpu.memory_space<vmem>>, vector<1x8x2x16xf32>
    %109 = vector.shape_cast %108 : vector<1x8x2x16xf32> to vector<8x2x16xf32>
    %110 = vector.shape_cast %106 : vector<8x2x16xf32> to vector<1x8x2x16xf32>
    tpu.vector_store %arg3[%107, %c0_36, %c0_37, %c0_38], %110 {strides = array<i32>} : memref<8x8x2x16xf32, #tpu.memory_space<vmem>>, vector<1x8x2x16xf32>,
    %c3_i32 = arith.constant 3 : i32
    %111 = arith.index_cast %c3_i32 : i32 to index
    %c0_39 = arith.constant 0 : index
    %c0_40 = arith.constant 0 : index
    %c0_41 = arith.constant 0 : index
    %112 = vector.load %arg1[%111, %c0_39, %c0_40, %c0_41] : memref<8x8x2x64xf32, #tpu.memory_space<vmem>>, vector<1x8x2x64xf32>
    %113 = vector.shape_cast %112 : vector<1x8x2x64xf32> to vector<8x2x64xf32>
    %114 = arith.truncf %106 : vector<8x2x16xf32> to vector<8x2x16xbf16>
    "tpu.trace_start"() <{level = 10 : i32, message = "dbh,dhg->dbg"}> : () -> ()
    %cst_42 = arith.constant dense<0.000000e+00> : vector<8x2x64xf32>
    %115 = tpu.matmul %114, %3, %cst_42 {dimension_numbers = #tpu.dot_dimension_numbers<[2], [1], [1], [2], [0, 0, 0, 1, 1, 2], [0], [0]>} : vector<8x2x16xbf16>, vector<8x16x64xbf16>, vector<8x2x64xf32> -> vector<8x2x64xf32>
    "tpu.trace_stop"() : () -> ()
    %116 = arith.addf %113, %115 : vector<8x2x64xf32>
    %117 = vector.extract_strided_slice %116 {offsets = [0, 0, 0], sizes = [8, 2, 16], strides = [1, 1, 1]} : vector<8x2x64xf32> to vector<8x2x16xf32>
    %118 = arith.negf %117 : vector<8x2x16xf32>
    %119 = math.exp %118 : vector<8x2x16xf32>
    %cst_43 = arith.constant 1.000000e+00 : f32
    %120 = vector.broadcast %cst_43 : f32 to vector<8x2x16xf32>
    %121 = arith.addf %120, %119 : vector<8x2x16xf32>
    %122 = arith.divf %120, %121 : vector<8x2x16xf32>
    %123 = vector.extract_strided_slice %116 {offsets = [0, 0, 16], sizes = [8, 2, 16], strides = [1, 1, 1]} : vector<8x2x64xf32> to vector<8x2x16xf32>
    %124 = arith.negf %123 : vector<8x2x16xf32>
    %125 = math.exp %124 : vector<8x2x16xf32>
    %cst_44 = arith.constant 1.000000e+00 : f32
    %126 = vector.broadcast %cst_44 : f32 to vector<8x2x16xf32>
    %127 = arith.addf %126, %125 : vector<8x2x16xf32>
    %128 = arith.divf %126, %127 : vector<8x2x16xf32>
    %129 = vector.extract_strided_slice %116 {offsets = [0, 0, 32], sizes = [8, 2, 16], strides = [1, 1, 1]} : vector<8x2x64xf32> to vector<8x2x16xf32>
    %130 = math.tanh %129 : vector<8x2x16xf32>
    %131 = vector.extract_strided_slice %116 {offsets = [0, 0, 48], sizes = [8, 2, 16], strides = [1, 1, 1]} : vector<8x2x64xf32> to vector<8x2x16xf32>
    %132 = arith.negf %131 : vector<8x2x16xf32>
    %133 = math.exp %132 : vector<8x2x16xf32>
    %cst_45 = arith.constant 1.000000e+00 : f32
    %134 = vector.broadcast %cst_45 : f32 to vector<8x2x16xf32>
    %135 = arith.addf %134, %133 : vector<8x2x16xf32>
    %136 = arith.divf %134, %135 : vector<8x2x16xf32>
    %137 = arith.mulf %128, %104 : vector<8x2x16xf32>
    %138 = arith.mulf %122, %130 : vector<8x2x16xf32>
    %139 = arith.addf %137, %138 : vector<8x2x16xf32>
    %140 = math.tanh %139 : vector<8x2x16xf32>
    %141 = arith.mulf %136, %140 : vector<8x2x16xf32>
    %142 = arith.index_cast %c3_i32 : i32 to index
    %c0_46 = arith.constant 0 : index
    %c0_47 = arith.constant 0 : index
    %c0_48 = arith.constant 0 : index
    %143 = vector.load %arg3[%142, %c0_46, %c0_47, %c0_48] : memref<8x8x2x16xf32, #tpu.memory_space<vmem>>, vector<1x8x2x16xf32>
    %144 = vector.shape_cast %143 : vector<1x8x2x16xf32> to vector<8x2x16xf32>
    %145 = vector.shape_cast %141 : vector<8x2x16xf32> to vector<1x8x2x16xf32>
    tpu.vector_store %arg3[%142, %c0_46, %c0_47, %c0_48], %145 {strides = array<i32>} : memref<8x8x2x16xf32, #tpu.memory_space<vmem>>, vector<1x8x2x16xf32>,
    %c4_i32 = arith.constant 4 : i32
    %146 = arith.index_cast %c4_i32 : i32 to index
    %c0_49 = arith.constant 0 : index
    %c0_50 = arith.constant 0 : index
    %c0_51 = arith.constant 0 : index
    %147 = vector.load %arg1[%146, %c0_49, %c0_50, %c0_51] : memref<8x8x2x64xf32, #tpu.memory_space<vmem>>, vector<1x8x2x64xf32>
    %148 = vector.shape_cast %147 : vector<1x8x2x64xf32> to vector<8x2x64xf32>
    %149 = arith.truncf %141 : vector<8x2x16xf32> to vector<8x2x16xbf16>
    "tpu.trace_start"() <{level = 10 : i32, message = "dbh,dhg->dbg"}> : () -> ()
    %cst_52 = arith.constant dense<0.000000e+00> : vector<8x2x64xf32>
    %150 = tpu.matmul %149, %3, %cst_52 {dimension_numbers = #tpu.dot_dimension_numbers<[2], [1], [1], [2], [0, 0, 0, 1, 1, 2], [0], [0]>} : vector<8x2x16xbf16>, vector<8x16x64xbf16>, vector<8x2x64xf32> -> vector<8x2x64xf32>
    "tpu.trace_stop"() : () -> ()
    %151 = arith.addf %148, %150 : vector<8x2x64xf32>
    %152 = vector.extract_strided_slice %151 {offsets = [0, 0, 0], sizes = [8, 2, 16], strides = [1, 1, 1]} : vector<8x2x64xf32> to vector<8x2x16xf32>
    %153 = arith.negf %152 : vector<8x2x16xf32>
    %154 = math.exp %153 : vector<8x2x16xf32>
    %cst_53 = arith.constant 1.000000e+00 : f32
    %155 = vector.broadcast %cst_53 : f32 to vector<8x2x16xf32>
    %156 = arith.addf %155, %154 : vector<8x2x16xf32>
    %157 = arith.divf %155, %156 : vector<8x2x16xf32>
    %158 = vector.extract_strided_slice %151 {offsets = [0, 0, 16], sizes = [8, 2, 16], strides = [1, 1, 1]} : vector<8x2x64xf32> to vector<8x2x16xf32>
    %159 = arith.negf %158 : vector<8x2x16xf32>
    %160 = math.exp %159 : vector<8x2x16xf32>
    %cst_54 = arith.constant 1.000000e+00 : f32
    %161 = vector.broadcast %cst_54 : f32 to vector<8x2x16xf32>
    %162 = arith.addf %161, %160 : vector<8x2x16xf32>
    %163 = arith.divf %161, %162 : vector<8x2x16xf32>
    %164 = vector.extract_strided_slice %151 {offsets = [0, 0, 32], sizes = [8, 2, 16], strides = [1, 1, 1]} : vector<8x2x64xf32> to vector<8x2x16xf32>
    %165 = math.tanh %164 : vector<8x2x16xf32>
    %166 = vector.extract_strided_slice %151 {offsets = [0, 0, 48], sizes = [8, 2, 16], strides = [1, 1, 1]} : vector<8x2x64xf32> to vector<8x2x16xf32>
    %167 = arith.negf %166 : vector<8x2x16xf32>
    %168 = math.exp %167 : vector<8x2x16xf32>
    %cst_55 = arith.constant 1.000000e+00 : f32
    %169 = vector.broadcast %cst_55 : f32 to vector<8x2x16xf32>
    %170 = arith.addf %169, %168 : vector<8x2x16xf32>
    %171 = arith.divf %169, %170 : vector<8x2x16xf32>
    %172 = arith.mulf %163, %139 : vector<8x2x16xf32>
    %173 = arith.mulf %157, %165 : vector<8x2x16xf32>
    %174 = arith.addf %172, %173 : vector<8x2x16xf32>
    %175 = math.tanh %174 : vector<8x2x16xf32>
    %176 = arith.mulf %171, %175 : vector<8x2x16xf32>
    %177 = arith.index_cast %c4_i32 : i32 to index
    %c0_56 = arith.constant 0 : index
    %c0_57 = arith.constant 0 : index
    %c0_58 = arith.constant 0 : index
    %178 = vector.load %arg3[%177, %c0_56, %c0_57, %c0_58] : memref<8x8x2x16xf32, #tpu.memory_space<vmem>>, vector<1x8x2x16xf32>
    %179 = vector.shape_cast %178 : vector<1x8x2x16xf32> to vector<8x2x16xf32>
    %180 = vector.shape_cast %176 : vector<8x2x16xf32> to vector<1x8x2x16xf32>
    tpu.vector_store %arg3[%177, %c0_56, %c0_57, %c0_58], %180 {strides = array<i32>} : memref<8x8x2x16xf32, #tpu.memory_space<vmem>>, vector<1x8x2x16xf32>,
    %c5_i32 = arith.constant 5 : i32
    %181 = arith.index_cast %c5_i32 : i32 to index
    %c0_59 = arith.constant 0 : index
    %c0_60 = arith.constant 0 : index
    %c0_61 = arith.constant 0 : index
    %182 = vector.load %arg1[%181, %c0_59, %c0_60, %c0_61] : memref<8x8x2x64xf32, #tpu.memory_space<vmem>>, vector<1x8x2x64xf32>
    %183 = vector.shape_cast %182 : vector<1x8x2x64xf32> to vector<8x2x64xf32>
    %184 = arith.truncf %176 : vector<8x2x16xf32> to vector<8x2x16xbf16>
    "tpu.trace_start"() <{level = 10 : i32, message = "dbh,dhg->dbg"}> : () -> ()
    %cst_62 = arith.constant dense<0.000000e+00> : vector<8x2x64xf32>
    %185 = tpu.matmul %184, %3, %cst_62 {dimension_numbers = #tpu.dot_dimension_numbers<[2], [1], [1], [2], [0, 0, 0, 1, 1, 2], [0], [0]>} : vector<8x2x16xbf16>, vector<8x16x64xbf16>, vector<8x2x64xf32> -> vector<8x2x64xf32>
    "tpu.trace_stop"() : () -> ()
    %186 = arith.addf %183, %185 : vector<8x2x64xf32>
    %187 = vector.extract_strided_slice %186 {offsets = [0, 0, 0], sizes = [8, 2, 16], strides = [1, 1, 1]} : vector<8x2x64xf32> to vector<8x2x16xf32>
    %188 = arith.negf %187 : vector<8x2x16xf32>
    %189 = math.exp %188 : vector<8x2x16xf32>
    %cst_63 = arith.constant 1.000000e+00 : f32
    %190 = vector.broadcast %cst_63 : f32 to vector<8x2x16xf32>
    %191 = arith.addf %190, %189 : vector<8x2x16xf32>
    %192 = arith.divf %190, %191 : vector<8x2x16xf32>
    %193 = vector.extract_strided_slice %186 {offsets = [0, 0, 16], sizes = [8, 2, 16], strides = [1, 1, 1]} : vector<8x2x64xf32> to vector<8x2x16xf32>
    %194 = arith.negf %193 : vector<8x2x16xf32>
    %195 = math.exp %194 : vector<8x2x16xf32>
    %cst_64 = arith.constant 1.000000e+00 : f32
    %196 = vector.broadcast %cst_64 : f32 to vector<8x2x16xf32>
    %197 = arith.addf %196, %195 : vector<8x2x16xf32>
    %198 = arith.divf %196, %197 : vector<8x2x16xf32>
    %199 = vector.extract_strided_slice %186 {offsets = [0, 0, 32], sizes = [8, 2, 16], strides = [1, 1, 1]} : vector<8x2x64xf32> to vector<8x2x16xf32>
    %200 = math.tanh %199 : vector<8x2x16xf32>
    %201 = vector.extract_strided_slice %186 {offsets = [0, 0, 48], sizes = [8, 2, 16], strides = [1, 1, 1]} : vector<8x2x64xf32> to vector<8x2x16xf32>
    %202 = arith.negf %201 : vector<8x2x16xf32>
    %203 = math.exp %202 : vector<8x2x16xf32>
    %cst_65 = arith.constant 1.000000e+00 : f32
    %204 = vector.broadcast %cst_65 : f32 to vector<8x2x16xf32>
    %205 = arith.addf %204, %203 : vector<8x2x16xf32>
    %206 = arith.divf %204, %205 : vector<8x2x16xf32>
    %207 = arith.mulf %198, %174 : vector<8x2x16xf32>
    %208 = arith.mulf %192, %200 : vector<8x2x16xf32>
    %209 = arith.addf %207, %208 : vector<8x2x16xf32>
    %210 = math.tanh %209 : vector<8x2x16xf32>
    %211 = arith.mulf %206, %210 : vector<8x2x16xf32>
    %212 = arith.index_cast %c5_i32 : i32 to index
    %c0_66 = arith.constant 0 : index
    %c0_67 = arith.constant 0 : index
    %c0_68 = arith.constant 0 : index
    %213 = vector.load %arg3[%212, %c0_66, %c0_67, %c0_68] : memref<8x8x2x16xf32, #tpu.memory_space<vmem>>, vector<1x8x2x16xf32>
    %214 = vector.shape_cast %213 : vector<1x8x2x16xf32> to vector<8x2x16xf32>
    %215 = vector.shape_cast %211 : vector<8x2x16xf32> to vector<1x8x2x16xf32>
    tpu.vector_store %arg3[%212, %c0_66, %c0_67, %c0_68], %215 {strides = array<i32>} : memref<8x8x2x16xf32, #tpu.memory_space<vmem>>, vector<1x8x2x16xf32>,
    %c6_i32 = arith.constant 6 : i32
    %216 = arith.index_cast %c6_i32 : i32 to index
    %c0_69 = arith.constant 0 : index
    %c0_70 = arith.constant 0 : index
    %c0_71 = arith.constant 0 : index
    %217 = vector.load %arg1[%216, %c0_69, %c0_70, %c0_71] : memref<8x8x2x64xf32, #tpu.memory_space<vmem>>, vector<1x8x2x64xf32>
    %218 = vector.shape_cast %217 : vector<1x8x2x64xf32> to vector<8x2x64xf32>
    %219 = arith.truncf %211 : vector<8x2x16xf32> to vector<8x2x16xbf16>
    "tpu.trace_start"() <{level = 10 : i32, message = "dbh,dhg->dbg"}> : () -> ()
    %cst_72 = arith.constant dense<0.000000e+00> : vector<8x2x64xf32>
    %220 = tpu.matmul %219, %3, %cst_72 {dimension_numbers = #tpu.dot_dimension_numbers<[2], [1], [1], [2], [0, 0, 0, 1, 1, 2], [0], [0]>} : vector<8x2x16xbf16>, vector<8x16x64xbf16>, vector<8x2x64xf32> -> vector<8x2x64xf32>
    "tpu.trace_stop"() : () -> ()
    %221 = arith.addf %218, %220 : vector<8x2x64xf32>
    %222 = vector.extract_strided_slice %221 {offsets = [0, 0, 0], sizes = [8, 2, 16], strides = [1, 1, 1]} : vector<8x2x64xf32> to vector<8x2x16xf32>
    %223 = arith.negf %222 : vector<8x2x16xf32>
    %224 = math.exp %223 : vector<8x2x16xf32>
    %cst_73 = arith.constant 1.000000e+00 : f32
    %225 = vector.broadcast %cst_73 : f32 to vector<8x2x16xf32>
    %226 = arith.addf %225, %224 : vector<8x2x16xf32>
    %227 = arith.divf %225, %226 : vector<8x2x16xf32>
    %228 = vector.extract_strided_slice %221 {offsets = [0, 0, 16], sizes = [8, 2, 16], strides = [1, 1, 1]} : vector<8x2x64xf32> to vector<8x2x16xf32>
    %229 = arith.negf %228 : vector<8x2x16xf32>
    %230 = math.exp %229 : vector<8x2x16xf32>
    %cst_74 = arith.constant 1.000000e+00 : f32
    %231 = vector.broadcast %cst_74 : f32 to vector<8x2x16xf32>
    %232 = arith.addf %231, %230 : vector<8x2x16xf32>
    %233 = arith.divf %231, %232 : vector<8x2x16xf32>
    %234 = vector.extract_strided_slice %221 {offsets = [0, 0, 32], sizes = [8, 2, 16], strides = [1, 1, 1]} : vector<8x2x64xf32> to vector<8x2x16xf32>
    %235 = math.tanh %234 : vector<8x2x16xf32>
    %236 = vector.extract_strided_slice %221 {offsets = [0, 0, 48], sizes = [8, 2, 16], strides = [1, 1, 1]} : vector<8x2x64xf32> to vector<8x2x16xf32>
    %237 = arith.negf %236 : vector<8x2x16xf32>
    %238 = math.exp %237 : vector<8x2x16xf32>
    %cst_75 = arith.constant 1.000000e+00 : f32
    %239 = vector.broadcast %cst_75 : f32 to vector<8x2x16xf32>
    %240 = arith.addf %239, %238 : vector<8x2x16xf32>
    %241 = arith.divf %239, %240 : vector<8x2x16xf32>
    %242 = arith.mulf %233, %209 : vector<8x2x16xf32>
    %243 = arith.mulf %227, %235 : vector<8x2x16xf32>
    %244 = arith.addf %242, %243 : vector<8x2x16xf32>
    %245 = math.tanh %244 : vector<8x2x16xf32>
    %246 = arith.mulf %241, %245 : vector<8x2x16xf32>
    %247 = arith.index_cast %c6_i32 : i32 to index
    %c0_76 = arith.constant 0 : index
    %c0_77 = arith.constant 0 : index
    %c0_78 = arith.constant 0 : index
    %248 = vector.load %arg3[%247, %c0_76, %c0_77, %c0_78] : memref<8x8x2x16xf32, #tpu.memory_space<vmem>>, vector<1x8x2x16xf32>
    %249 = vector.shape_cast %248 : vector<1x8x2x16xf32> to vector<8x2x16xf32>
    %250 = vector.shape_cast %246 : vector<8x2x16xf32> to vector<1x8x2x16xf32>
    tpu.vector_store %arg3[%247, %c0_76, %c0_77, %c0_78], %250 {strides = array<i32>} : memref<8x8x2x16xf32, #tpu.memory_space<vmem>>, vector<1x8x2x16xf32>,
    %c7_i32 = arith.constant 7 : i32
    %251 = arith.index_cast %c7_i32 : i32 to index
    %c0_79 = arith.constant 0 : index
    %c0_80 = arith.constant 0 : index
    %c0_81 = arith.constant 0 : index
    %252 = vector.load %arg1[%251, %c0_79, %c0_80, %c0_81] : memref<8x8x2x64xf32, #tpu.memory_space<vmem>>, vector<1x8x2x64xf32>
    %253 = vector.shape_cast %252 : vector<1x8x2x64xf32> to vector<8x2x64xf32>
    %254 = arith.truncf %246 : vector<8x2x16xf32> to vector<8x2x16xbf16>
    "tpu.trace_start"() <{level = 10 : i32, message = "dbh,dhg->dbg"}> : () -> ()
    %cst_82 = arith.constant dense<0.000000e+00> : vector<8x2x64xf32>
    %255 = tpu.matmul %254, %3, %cst_82 {dimension_numbers = #tpu.dot_dimension_numbers<[2], [1], [1], [2], [0, 0, 0, 1, 1, 2], [0], [0]>} : vector<8x2x16xbf16>, vector<8x16x64xbf16>, vector<8x2x64xf32> -> vector<8x2x64xf32>
    "tpu.trace_stop"() : () -> ()
    %256 = arith.addf %253, %255 : vector<8x2x64xf32>
    %257 = vector.extract_strided_slice %256 {offsets = [0, 0, 0], sizes = [8, 2, 16], strides = [1, 1, 1]} : vector<8x2x64xf32> to vector<8x2x16xf32>
    %258 = arith.negf %257 : vector<8x2x16xf32>
    %259 = math.exp %258 : vector<8x2x16xf32>
    %cst_83 = arith.constant 1.000000e+00 : f32
    %260 = vector.broadcast %cst_83 : f32 to vector<8x2x16xf32>
    %261 = arith.addf %260, %259 : vector<8x2x16xf32>
    %262 = arith.divf %260, %261 : vector<8x2x16xf32>
    %263 = vector.extract_strided_slice %256 {offsets = [0, 0, 16], sizes = [8, 2, 16], strides = [1, 1, 1]} : vector<8x2x64xf32> to vector<8x2x16xf32>
    %264 = arith.negf %263 : vector<8x2x16xf32>
    %265 = math.exp %264 : vector<8x2x16xf32>
    %cst_84 = arith.constant 1.000000e+00 : f32
    %266 = vector.broadcast %cst_84 : f32 to vector<8x2x16xf32>
    %267 = arith.addf %266, %265 : vector<8x2x16xf32>
    %268 = arith.divf %266, %267 : vector<8x2x16xf32>
    %269 = vector.extract_strided_slice %256 {offsets = [0, 0, 32], sizes = [8, 2, 16], strides = [1, 1, 1]} : vector<8x2x64xf32> to vector<8x2x16xf32>
    %270 = math.tanh %269 : vector<8x2x16xf32>
    %271 = vector.extract_strided_slice %256 {offsets = [0, 0, 48], sizes = [8, 2, 16], strides = [1, 1, 1]} : vector<8x2x64xf32> to vector<8x2x16xf32>
    %272 = arith.negf %271 : vector<8x2x16xf32>
    %273 = math.exp %272 : vector<8x2x16xf32>
    %cst_85 = arith.constant 1.000000e+00 : f32
    %274 = vector.broadcast %cst_85 : f32 to vector<8x2x16xf32>
    %275 = arith.addf %274, %273 : vector<8x2x16xf32>
    %276 = arith.divf %274, %275 : vector<8x2x16xf32>
    %277 = arith.mulf %268, %244 : vector<8x2x16xf32>
    %278 = arith.mulf %262, %270 : vector<8x2x16xf32>
    %279 = arith.addf %277, %278 : vector<8x2x16xf32>
    %280 = math.tanh %279 : vector<8x2x16xf32>
    %281 = arith.mulf %276, %280 : vector<8x2x16xf32>
    %282 = arith.index_cast %c7_i32 : i32 to index
    %c0_86 = arith.constant 0 : index
    %c0_87 = arith.constant 0 : index
    %c0_88 = arith.constant 0 : index
    %283 = vector.load %arg3[%282, %c0_86, %c0_87, %c0_88] : memref<8x8x2x16xf32, #tpu.memory_space<vmem>>, vector<1x8x2x16xf32>
    %284 = vector.shape_cast %283 : vector<1x8x2x16xf32> to vector<8x2x16xf32>
    %285 = vector.shape_cast %281 : vector<8x2x16xf32> to vector<1x8x2x16xf32>
    tpu.vector_store %arg3[%282, %c0_86, %c0_87, %c0_88], %285 {strides = array<i32>} : memref<8x8x2x16xf32, #tpu.memory_space<vmem>>, vector<1x8x2x16xf32>,
    %c8_i32 = arith.constant 8 : i32
    %c0_89 = arith.constant 0 : index
    %c0_90 = arith.constant 0 : index
    %c0_91 = arith.constant 0 : index
    %286 = vector.load %arg4[%c0_89, %c0_90, %c0_91] : memref<8x2x16xf32, #tpu.memory_space<vmem>>, vector<8x2x16xf32>
    tpu.vector_store %arg4[%c0_89, %c0_90, %c0_91], %281 {strides = array<i32>} : memref<8x2x16xf32, #tpu.memory_space<vmem>>, vector<8x2x16xf32>,
    %c0_92 = arith.constant 0 : index
    %c0_93 = arith.constant 0 : index
    %c0_94 = arith.constant 0 : index
    %287 = vector.load %arg5[%c0_92, %c0_93, %c0_94] : memref<8x2x16xf32, #tpu.memory_space<vmem>>, vector<8x2x16xf32>
    tpu.vector_store %arg5[%c0_92, %c0_93, %c0_94], %279 {strides = array<i32>} : memref<8x2x16xf32, #tpu.memory_space<vmem>>, vector<8x2x16xf32>,
    return
  }
  func.func @transform_0(%arg0: i32) -> (i32, i32, i32, i32) {
    %c0_i32 = arith.constant 0 : i32
    %c0_i32_0 = arith.constant 0 : i32
    %c0_i32_1 = arith.constant 0 : i32
    %c0_i32_2 = arith.constant 0 : i32
    return %arg0, %c0_i32, %c0_i32_0, %c0_i32_1 : i32, i32, i32, i32
  }
  func.func @transform_1(%arg0: i32) -> (i32, i32, i32) {
    %c0_i32 = arith.constant 0 : i32
    %c0_i32_0 = arith.constant 0 : i32
    %c0_i32_1 = arith.constant 0 : i32
    %c0_i32_2 = arith.constant 0 : i32
    return %c0_i32, %c0_i32_0, %c0_i32_1 : i32, i32, i32
  }
  func.func @transform_2(%arg0: i32) -> (i32, i32, i32, i32) {
    %c0_i32 = arith.constant 0 : i32
    %c0_i32_0 = arith.constant 0 : i32
    %c0_i32_1 = arith.constant 0 : i32
    %c0_i32_2 = arith.constant 0 : i32
    return %arg0, %c0_i32, %c0_i32_0, %c0_i32_1 : i32, i32, i32, i32
  }
}

module attributes {stable_mosaic.version = 11 : i64} {
  func.func @grouped_linear_kernel(%arg0: i32, %arg1: memref<16x128xf32, #tpu.memory_space<vmem>>, %arg2: memref<4x32x128xbf16, #tpu.memory_space<vmem>>, %arg3: memref<1x512xf32, #tpu.memory_space<vmem>>, %arg4: memref<16x512xf32, #tpu.memory_space<vmem>>) attributes {dimension_semantics = [#tpu.dimension_semantics<parallel>], iteration_bounds = array<i64: 1>, scalar_prefetch = 0 : i64, scratch_operands = 0 : i64, tpu.core_type = #tpu.core_type<tc>, window_params = [{transform_indices = @transform_0, window_bounds = array<i64: 16, 128>}, {pipeline_mode = #tpu.pipeline_mode<synchronous>, transform_indices = @transform_1, window_bounds = array<i64: 4, 32, 128>}, {pipeline_mode = #tpu.pipeline_mode<synchronous>, transform_indices = @transform_2, window_bounds = array<i64: 1, 512>}, {transform_indices = @transform_3, window_bounds = array<i64: 16, 512>}]} {
    %c0 = arith.constant 0 : index
    %c0_0 = arith.constant 0 : index
    %0 = vector.load %arg1[%c0, %c0_0] : memref<16x128xf32, #tpu.memory_space<vmem>>, vector<16x128xf32>
    %1 = arith.truncf %0 : vector<16x128xf32> to vector<16x128xbf16>
    %2 = vector.extract_strided_slice %1 {offsets = [0, 0], sizes = [16, 32], strides = [1, 1]} : vector<16x128xbf16> to vector<16x32xbf16>
    %c0_1 = arith.constant 0 : index
    %c0_2 = arith.constant 0 : index
    %c0_3 = arith.constant 0 : index
    %3 = vector.load %arg2[%c0_1, %c0_2, %c0_3] : memref<4x32x128xbf16, #tpu.memory_space<vmem>>, vector<1x32x128xbf16>
    %4 = vector.shape_cast %3 : vector<1x32x128xbf16> to vector<32x128xbf16>
    %cst = arith.constant dense<0.000000e+00> : vector<16x128xf32>
    %5 = tpu.matmul %2, %4, %cst {dimension_numbers = #tpu.dot_dimension_numbers<[1], [0], [0], [1], [0, 0, 1, 1], [], []>} : vector<16x32xbf16>, vector<32x128xbf16>, vector<16x128xf32> -> vector<16x128xf32>
    %6 = vector.extract_strided_slice %1 {offsets = [0, 32], sizes = [16, 32], strides = [1, 1]} : vector<16x128xbf16> to vector<16x32xbf16>
    %c1 = arith.constant 1 : index
    %c0_4 = arith.constant 0 : index
    %c0_5 = arith.constant 0 : index
    %7 = vector.load %arg2[%c1, %c0_4, %c0_5] : memref<4x32x128xbf16, #tpu.memory_space<vmem>>, vector<1x32x128xbf16>
    %8 = vector.shape_cast %7 : vector<1x32x128xbf16> to vector<32x128xbf16>
    %cst_6 = arith.constant dense<0.000000e+00> : vector<16x128xf32>
    %9 = tpu.matmul %6, %8, %cst_6 {dimension_numbers = #tpu.dot_dimension_numbers<[1], [0], [0], [1], [0, 0, 1, 1], [], []>} : vector<16x32xbf16>, vector<32x128xbf16>, vector<16x128xf32> -> vector<16x128xf32>
    %10 = vector.extract_strided_slice %1 {offsets = [0, 64], sizes = [16, 32], strides = [1, 1]} : vector<16x128xbf16> to vector<16x32xbf16>
    %c2 = arith.constant 2 : index
    %c0_7 = arith.constant 0 : index
    %c0_8 = arith.constant 0 : index
    %11 = vector.load %arg2[%c2, %c0_7, %c0_8] : memref<4x32x128xbf16, #tpu.memory_space<vmem>>, vector<1x32x128xbf16>
    %12 = vector.shape_cast %11 : vector<1x32x128xbf16> to vector<32x128xbf16>
    %cst_9 = arith.constant dense<0.000000e+00> : vector<16x128xf32>
    %13 = tpu.matmul %10, %12, %cst_9 {dimension_numbers = #tpu.dot_dimension_numbers<[1], [0], [0], [1], [0, 0, 1, 1], [], []>} : vector<16x32xbf16>, vector<32x128xbf16>, vector<16x128xf32> -> vector<16x128xf32>
    %14 = vector.extract_strided_slice %1 {offsets = [0, 96], sizes = [16, 32], strides = [1, 1]} : vector<16x128xbf16> to vector<16x32xbf16>
    %c3 = arith.constant 3 : index
    %c0_10 = arith.constant 0 : index
    %c0_11 = arith.constant 0 : index
    %15 = vector.load %arg2[%c3, %c0_10, %c0_11] : memref<4x32x128xbf16, #tpu.memory_space<vmem>>, vector<1x32x128xbf16>
    %16 = vector.shape_cast %15 : vector<1x32x128xbf16> to vector<32x128xbf16>
    %cst_12 = arith.constant dense<0.000000e+00> : vector<16x128xf32>
    %17 = tpu.matmul %14, %16, %cst_12 {dimension_numbers = #tpu.dot_dimension_numbers<[1], [0], [0], [1], [0, 0, 1, 1], [], []>} : vector<16x32xbf16>, vector<32x128xbf16>, vector<16x128xf32> -> vector<16x128xf32>
    %18 = tpu.concatenate %5, %9, %13, %17 in 1 : vector<16x128xf32>, vector<16x128xf32>, vector<16x128xf32>, vector<16x128xf32> -> vector<16x512xf32>
    %c0_13 = arith.constant 0 : index
    %c0_14 = arith.constant 0 : index
    %19 = vector.load %arg3[%c0_13, %c0_14] : memref<1x512xf32, #tpu.memory_space<vmem>>, vector<1x512xf32>
    %20 = vector.broadcast %19 : vector<1x512xf32> to vector<16x512xf32>
    %21 = arith.addf %18, %20 : vector<16x512xf32>
    %c0_15 = arith.constant 0 : index
    %c0_16 = arith.constant 0 : index
    %22 = vector.load %arg4[%c0_15, %c0_16] : memref<16x512xf32, #tpu.memory_space<vmem>>, vector<16x512xf32>
    tpu.vector_store %arg4[%c0_15, %c0_16], %21 {strides = array<i32>} : memref<16x512xf32, #tpu.memory_space<vmem>>, vector<16x512xf32>,
    return
  }
  func.func @transform_0(%arg0: i32) -> (i32, i32) {
    %c0_i32 = arith.constant 0 : i32
    %c0_i32_0 = arith.constant 0 : i32
    return %arg0, %c0_i32 : i32, i32
  }
  func.func @transform_1(%arg0: i32) -> (i32, i32, i32) {
    %c0_i32 = arith.constant 0 : i32
    %c0_i32_0 = arith.constant 0 : i32
    %c0_i32_1 = arith.constant 0 : i32
    %c0_i32_2 = arith.constant 0 : i32
    return %c0_i32, %c0_i32_0, %c0_i32_1 : i32, i32, i32
  }
  func.func @transform_2(%arg0: i32) -> (i32, i32) {
    %c0_i32 = arith.constant 0 : i32
    %c0_i32_0 = arith.constant 0 : i32
    %c0_i32_1 = arith.constant 0 : i32
    return %c0_i32, %c0_i32_0 : i32, i32
  }
  func.func @transform_3(%arg0: i32) -> (i32, i32) {
    %c0_i32 = arith.constant 0 : i32
    %c0_i32_0 = arith.constant 0 : i32
    return %arg0, %c0_i32 : i32, i32
  }
}

module attributes {stable_mosaic.version = 11 : i64} {
  func.func @affine2_kernel(%arg0: i32, %arg1: memref<16x64xf32, #tpu.memory_space<vmem>>, %arg2: memref<64x128xbf16, #tpu.memory_space<vmem>>, %arg3: memref<1x128xf32, #tpu.memory_space<vmem>>, %arg4: memref<4x32x64xbf16, #tpu.memory_space<vmem>>, %arg5: memref<4x64xf32, #tpu.memory_space<vmem>>, %arg6: memref<16x256xf32, #tpu.memory_space<vmem>>) attributes {dimension_semantics = [#tpu.dimension_semantics<parallel>], iteration_bounds = array<i64: 1>, scalar_prefetch = 0 : i64, scratch_operands = 0 : i64, tpu.core_type = #tpu.core_type<tc>, window_params = [{transform_indices = @transform_0, window_bounds = array<i64: 16, 64>}, {pipeline_mode = #tpu.pipeline_mode<synchronous>, transform_indices = @transform_1, window_bounds = array<i64: 64, 128>}, {pipeline_mode = #tpu.pipeline_mode<synchronous>, transform_indices = @transform_2, window_bounds = array<i64: 1, 128>}, {pipeline_mode = #tpu.pipeline_mode<synchronous>, transform_indices = @transform_3, window_bounds = array<i64: 4, 32, 64>}, {pipeline_mode = #tpu.pipeline_mode<synchronous>, transform_indices = @transform_4, window_bounds = array<i64: 4, 64>}, {transform_indices = @transform_5, window_bounds = array<i64: 16, 256>}]} {
    %c0 = arith.constant 0 : index
    %c0_0 = arith.constant 0 : index
    %0 = vector.load %arg1[%c0, %c0_0] : memref<16x64xf32, #tpu.memory_space<vmem>>, vector<16x64xf32>
    %1 = arith.truncf %0 : vector<16x64xf32> to vector<16x64xbf16>
    %c0_1 = arith.constant 0 : index
    %c0_2 = arith.constant 0 : index
    %2 = vector.load %arg2[%c0_1, %c0_2] : memref<64x128xbf16, #tpu.memory_space<vmem>>, vector<64x128xbf16>
    %cst = arith.constant dense<0.000000e+00> : vector<16x128xf32>
    %3 = tpu.matmul %1, %2, %cst {dimension_numbers = #tpu.dot_dimension_numbers<[1], [0], [0], [1], [0, 0, 1, 1], [], []>} : vector<16x64xbf16>, vector<64x128xbf16>, vector<16x128xf32> -> vector<16x128xf32>
    %c0_3 = arith.constant 0 : index
    %c0_4 = arith.constant 0 : index
    %4 = vector.load %arg3[%c0_3, %c0_4] : memref<1x128xf32, #tpu.memory_space<vmem>>, vector<1x128xf32>
    %5 = vector.broadcast %4 : vector<1x128xf32> to vector<16x128xf32>
    %6 = arith.addf %3, %5 : vector<16x128xf32>
    %cst_5 = arith.constant 0.000000e+00 : f32
    %7 = vector.broadcast %cst_5 : f32 to vector<16x128xf32>
    %8 = arith.maximumf %6, %7 : vector<16x128xf32>
    %9 = arith.truncf %8 : vector<16x128xf32> to vector<16x128xbf16>
    %10 = vector.extract_strided_slice %9 {offsets = [0, 0], sizes = [16, 32], strides = [1, 1]} : vector<16x128xbf16> to vector<16x32xbf16>
    %c0_6 = arith.constant 0 : index
    %c0_7 = arith.constant 0 : index
    %c0_8 = arith.constant 0 : index
    %11 = vector.load %arg4[%c0_6, %c0_7, %c0_8] : memref<4x32x64xbf16, #tpu.memory_space<vmem>>, vector<1x32x64xbf16>
    %12 = vector.shape_cast %11 : vector<1x32x64xbf16> to vector<32x64xbf16>
    %cst_9 = arith.constant dense<0.000000e+00> : vector<16x64xf32>
    %13 = tpu.matmul %10, %12, %cst_9 {dimension_numbers = #tpu.dot_dimension_numbers<[1], [0], [0], [1], [0, 0, 1, 1], [], []>} : vector<16x32xbf16>, vector<32x64xbf16>, vector<16x64xf32> -> vector<16x64xf32>
    %c0_10 = arith.constant 0 : index
    %c0_11 = arith.constant 0 : index
    %14 = vector.load %arg5[%c0_10, %c0_11] : memref<4x64xf32, #tpu.memory_space<vmem>>, vector<1x64xf32>
    %15 = vector.shape_cast %14 : vector<1x64xf32> to vector<64xf32>
    %16 = vector.shape_cast %15 : vector<64xf32> to vector<1x64xf32>
    %17 = vector.broadcast %16 : vector<1x64xf32> to vector<16x64xf32>
    %18 = arith.addf %13, %17 : vector<16x64xf32>
    %cst_12 = arith.constant 0.000000e+00 : f32
    %19 = vector.broadcast %cst_12 : f32 to vector<16x64xf32>
    %20 = arith.maximumf %18, %19 : vector<16x64xf32>
    %21 = vector.extract_strided_slice %9 {offsets = [0, 32], sizes = [16, 32], strides = [1, 1]} : vector<16x128xbf16> to vector<16x32xbf16>
    %c1 = arith.constant 1 : index
    %c0_13 = arith.constant 0 : index
    %c0_14 = arith.constant 0 : index
    %22 = vector.load %arg4[%c1, %c0_13, %c0_14] : memref<4x32x64xbf16, #tpu.memory_space<vmem>>, vector<1x32x64xbf16>
    %23 = vector.shape_cast %22 : vector<1x32x64xbf16> to vector<32x64xbf16>
    %cst_15 = arith.constant dense<0.000000e+00> : vector<16x64xf32>
    %24 = tpu.matmul %21, %23, %cst_15 {dimension_numbers = #tpu.dot_dimension_numbers<[1], [0], [0], [1], [0, 0, 1, 1], [], []>} : vector<16x32xbf16>, vector<32x64xbf16>, vector<16x64xf32> -> vector<16x64xf32>
    %c1_16 = arith.constant 1 : index
    %c0_17 = arith.constant 0 : index
    %25 = vector.load %arg5[%c1_16, %c0_17] : memref<4x64xf32, #tpu.memory_space<vmem>>, vector<1x64xf32>
    %26 = vector.shape_cast %25 : vector<1x64xf32> to vector<64xf32>
    %27 = vector.shape_cast %26 : vector<64xf32> to vector<1x64xf32>
    %28 = vector.broadcast %27 : vector<1x64xf32> to vector<16x64xf32>
    %29 = arith.addf %24, %28 : vector<16x64xf32>
    %cst_18 = arith.constant 0.000000e+00 : f32
    %30 = vector.broadcast %cst_18 : f32 to vector<16x64xf32>
    %31 = arith.maximumf %29, %30 : vector<16x64xf32>
    %32 = vector.extract_strided_slice %9 {offsets = [0, 64], sizes = [16, 32], strides = [1, 1]} : vector<16x128xbf16> to vector<16x32xbf16>
    %c2 = arith.constant 2 : index
    %c0_19 = arith.constant 0 : index
    %c0_20 = arith.constant 0 : index
    %33 = vector.load %arg4[%c2, %c0_19, %c0_20] : memref<4x32x64xbf16, #tpu.memory_space<vmem>>, vector<1x32x64xbf16>
    %34 = vector.shape_cast %33 : vector<1x32x64xbf16> to vector<32x64xbf16>
    %cst_21 = arith.constant dense<0.000000e+00> : vector<16x64xf32>
    %35 = tpu.matmul %32, %34, %cst_21 {dimension_numbers = #tpu.dot_dimension_numbers<[1], [0], [0], [1], [0, 0, 1, 1], [], []>} : vector<16x32xbf16>, vector<32x64xbf16>, vector<16x64xf32> -> vector<16x64xf32>
    %c2_22 = arith.constant 2 : index
    %c0_23 = arith.constant 0 : index
    %36 = vector.load %arg5[%c2_22, %c0_23] : memref<4x64xf32, #tpu.memory_space<vmem>>, vector<1x64xf32>
    %37 = vector.shape_cast %36 : vector<1x64xf32> to vector<64xf32>
    %38 = vector.shape_cast %37 : vector<64xf32> to vector<1x64xf32>
    %39 = vector.broadcast %38 : vector<1x64xf32> to vector<16x64xf32>
    %40 = arith.addf %35, %39 : vector<16x64xf32>
    %cst_24 = arith.constant 0.000000e+00 : f32
    %41 = vector.broadcast %cst_24 : f32 to vector<16x64xf32>
    %42 = arith.maximumf %40, %41 : vector<16x64xf32>
    %43 = vector.extract_strided_slice %9 {offsets = [0, 96], sizes = [16, 32], strides = [1, 1]} : vector<16x128xbf16> to vector<16x32xbf16>
    %c3 = arith.constant 3 : index
    %c0_25 = arith.constant 0 : index
    %c0_26 = arith.constant 0 : index
    %44 = vector.load %arg4[%c3, %c0_25, %c0_26] : memref<4x32x64xbf16, #tpu.memory_space<vmem>>, vector<1x32x64xbf16>
    %45 = vector.shape_cast %44 : vector<1x32x64xbf16> to vector<32x64xbf16>
    %cst_27 = arith.constant dense<0.000000e+00> : vector<16x64xf32>
    %46 = tpu.matmul %43, %45, %cst_27 {dimension_numbers = #tpu.dot_dimension_numbers<[1], [0], [0], [1], [0, 0, 1, 1], [], []>} : vector<16x32xbf16>, vector<32x64xbf16>, vector<16x64xf32> -> vector<16x64xf32>
    %c3_28 = arith.constant 3 : index
    %c0_29 = arith.constant 0 : index
    %47 = vector.load %arg5[%c3_28, %c0_29] : memref<4x64xf32, #tpu.memory_space<vmem>>, vector<1x64xf32>
    %48 = vector.shape_cast %47 : vector<1x64xf32> to vector<64xf32>
    %49 = vector.shape_cast %48 : vector<64xf32> to vector<1x64xf32>
    %50 = vector.broadcast %49 : vector<1x64xf32> to vector<16x64xf32>
    %51 = arith.addf %46, %50 : vector<16x64xf32>
    %cst_30 = arith.constant 0.000000e+00 : f32
    %52 = vector.broadcast %cst_30 : f32 to vector<16x64xf32>
    %53 = arith.maximumf %51, %52 : vector<16x64xf32>
    %54 = tpu.concatenate %20, %31, %42, %53 in 1 : vector<16x64xf32>, vector<16x64xf32>, vector<16x64xf32>, vector<16x64xf32> -> vector<16x256xf32>
    %c0_31 = arith.constant 0 : index
    %c0_32 = arith.constant 0 : index
    %55 = vector.load %arg6[%c0_31, %c0_32] : memref<16x256xf32, #tpu.memory_space<vmem>>, vector<16x256xf32>
    tpu.vector_store %arg6[%c0_31, %c0_32], %54 {strides = array<i32>} : memref<16x256xf32, #tpu.memory_space<vmem>>, vector<16x256xf32>,
    return
  }
  func.func @transform_0(%arg0: i32) -> (i32, i32) {
    %c0_i32 = arith.constant 0 : i32
    %c0_i32_0 = arith.constant 0 : i32
    return %arg0, %c0_i32 : i32, i32
  }
  func.func @transform_1(%arg0: i32) -> (i32, i32) {
    %c0_i32 = arith.constant 0 : i32
    %c0_i32_0 = arith.constant 0 : i32
    %c0_i32_1 = arith.constant 0 : i32
    return %c0_i32, %c0_i32_0 : i32, i32
  }
  func.func @transform_2(%arg0: i32) -> (i32, i32) {
    %c0_i32 = arith.constant 0 : i32
    %c0_i32_0 = arith.constant 0 : i32
    %c0_i32_1 = arith.constant 0 : i32
    return %c0_i32, %c0_i32_0 : i32, i32
  }
  func.func @transform_3(%arg0: i32) -> (i32, i32, i32) {
    %c0_i32 = arith.constant 0 : i32
    %c0_i32_0 = arith.constant 0 : i32
    %c0_i32_1 = arith.constant 0 : i32
    %c0_i32_2 = arith.constant 0 : i32
    return %c0_i32, %c0_i32_0, %c0_i32_1 : i32, i32, i32
  }
  func.func @transform_4(%arg0: i32) -> (i32, i32) {
    %c0_i32 = arith.constant 0 : i32
    %c0_i32_0 = arith.constant 0 : i32
    %c0_i32_1 = arith.constant 0 : i32
    return %c0_i32, %c0_i32_0 : i32, i32
  }
  func.func @transform_5(%arg0: i32) -> (i32, i32) {
    %c0_i32 = arith.constant 0 : i32
    %c0_i32_0 = arith.constant 0 : i32
    return %arg0, %c0_i32 : i32, i32
  }
}

</mosaic_0001>

<bundles_post_ra>
// kernel: _lambda_.7
= control target key start
LH: loop header
LB: loop body
LE: loop exit
PB: predicated region body
PF: predicated region fallthrough
CT: control target
= control target key end

     0   :  { %8 = vsyncpa [#allocation3], 0  ;;  %s450_s0 = inlined_call_operand.hbm [shape: f32[16,32], index: 0, kind: input, shape index: {}]   ;;  %s451_s1 = inlined_call_operand.hbm [shape: bf16[1,32,512], index: 1, kind: input, shape index: {}]   ;;  %s452_s2 = inlined_call_operand.hbm [shape: f32[1,512], index: 2, kind: input, shape index: {}]   ;;  %s453_s3 = inlined_call_operand.hbm [shape: f32[16,512], index: 3, kind: output, shape index: {}]  }
   0x1   :  { %9 = vsyncpa [#allocation6], 0 }
   0x2   :  { %10 = vsyncpa [#allocation4], 0  ;;  %s371_s12 = smov [#allocation5]   ;;  %s277_s16 = scalar_lea.hbm %s451_s1, 1024 }
   0x3   :  { %s28_s13 = sshll.u32 %s371_s12, 4  ;;  %p278_p0 = scmp.ne.s32.totalorder %s451_s1, %s277_s16  ;;  %s29_s13 = int_to_ptr.vmem [resolvable:$true] %s28_s13 }
   0x4   :  { %p281_p1 = scmp.lt.u32.totalorder %s277_s16, %s451_s1 }
   0x6   :  { %p283_p2 = pnand %p281_p1, %p278_p0 }
   0x8   :  { %286 = shalt.err (!%p283_p2)
}
   0x9   :  { %s287_s21 = scalar_lea.vmem %s29_s13, 1024  ;;  %p292_p4 = scmp.lt.s32.totalorder %s29_s13, %s29_s13 }
   0xa   :  { %p288_p3 = scmp.ne.s32.totalorder %s29_s13, %s287_s21  ;;  %p293_p5 = scmp.lt.s32.totalorder %s287_s21, %s287_s21 }
   0xc   :  { %p294_p6 = por %p293_p5, %p292_p4 }
   0xe   :  { %p295_p7 = pnand %p294_p6, %p288_p3 }
  0x10   :  { %298 = shalt.err (!%p295_p7)
}
  0x11   :  { %s372_s22 = smov 256   ;;  %s373_s23 = smov 16  }
  0x12   :  { %34 = dma.hbm_to_vmem [thread:$0]  %s451_s1, 1024, %s29_s13, [#allocation6], %s372_s22, %s372_s22, %s373_s23  }
  0x13   :  { %s374_s26 = smov [#allocation2]   ;;  %s299_s30 = scalar_lea.hbm %s450_s0, 256 }
  0x14   :  { %s16_s27 = sshll.u32 %s374_s26, 4  ;;  %p300_p8 = scmp.ne.s32.totalorder %s450_s0, %s299_s30  ;;  %s17_s27 = int_to_ptr.vmem [resolvable:$true] %s16_s27 }
  0x15   :  { %p303_p9 = scmp.lt.u32.totalorder %s299_s30, %s450_s0 }
  0x17   :  { %p305_p10 = pnand %p303_p9, %p300_p8 }
  0x19   :  { %308 = shalt.err (!%p305_p10)
}
  0x1a   :  { %s309_s8 = scalar_lea.vmem %s17_s27, 256  ;;  %p314_p12 = scmp.lt.s32.totalorder %s17_s27, %s17_s27 }
  0x1b   :  { %p310_p11 = scmp.ne.s32.totalorder %s17_s27, %s309_s8  ;;  %p315_p13 = scmp.lt.s32.totalorder %s309_s8, %s309_s8 }
  0x1d   :  { %p316_p0 = por %p315_p13, %p314_p12 }
  0x1f   :  { %p317_p1 = pnand %p316_p0, %p310_p11 }
  0x21   :  { %320 = shalt.err (!%p317_p1)
}
  0x22   :  { %s375_s1 = smov 128   ;;  %s376_s9 = smov 8  }
  0x23   :  { %22 = dma.hbm_to_vmem [thread:$0]  %s450_s0, 256, %s17_s27, [#allocation3], %s375_s1, %s375_s1, %s376_s9  }
  0x24   :  { %s377_s12 = smov [#allocation7]   ;;  %s321_s16 = scalar_lea.hbm %s452_s2, 64 }
  0x25   :  { %s41_s13 = sshll.u32 %s377_s12, 4  ;;  %p322_p2 = scmp.ne.s32.totalorder %s452_s2, %s321_s16  ;;  %s42_s13 = int_to_ptr.vmem [resolvable:$true] %s41_s13 }
  0x26   :  { %p325_p3 = scmp.lt.u32.totalorder %s321_s16, %s452_s2 }
  0x28   :  { %p327_p4 = pnand %p325_p3, %p322_p2 }
  0x2a   :  { %330 = shalt.err (!%p327_p4)
}
  0x2b   :  { %s331_s21 = scalar_lea.vmem %s42_s13, 64  ;;  %p336_p6 = scmp.lt.s32.totalorder %s42_s13, %s42_s13 }
  0x2c   :  { %p332_p5 = scmp.ne.s32.totalorder %s42_s13, %s331_s21  ;;  %p337_p7 = scmp.lt.s32.totalorder %s331_s21, %s331_s21 }
  0x2e   :  { %p338_p8 = por %p337_p7, %p336_p6 }
  0x30   :  { %p339_p9 = pnand %p338_p8, %p332_p5 }
  0x32   :  { %342 = shalt.err (!%p339_p9)
}
  0x33   :  { %44 = dma.hbm_to_vmem [thread:$0]  %s452_s2, 64, %s42_s13, [#allocation6]  }
  0x34   :  { %365 = dma.done.wait [#allocation3], 256  }
  0x35   :  { %366 = vsyncadd [#allocation3], 4294967040 }
  0x36   :  { %367 = dma.done.wait [#allocation6], 1088  }
  0x37   :  { %368 = vsyncadd [#allocation6], 4294966208  ;;  %v378_v0 = vmov 0   ;;  %v265_v1 = vld [vmem:[#allocation5 + $0x4] ss:$16 sps:$4 sm:$0xff]   ;;  %v56_v10 = vld [vmem:[#allocation2 + $0x8] sm:$0xff]  ;;  %v68_v12 = vlaneseq }
  0x38   :  { %164 = vmatprep.mubr.bf16.mxu0 %v378_v0  ;;  %207 = vmatprep.mubr.bf16.mxu1 %v378_v0  ;;  %v267_v2 = vld [vmem:[#allocation5 + $0xc] ss:$16 sps:$4 sm:$0xff]   ;;  %v269_v3 = vld [vmem:[#allocation5] ss:$16 sps:$4 sm:$0xff]   ;;  %v270_v4 = vld [vmem:[#allocation5 + $0x8] ss:$16 sps:$4 sm:$0xff]  }
  0x39   :  { %132 = vmatprep.subr.bf16.mxu0 %v265_v1  ;;  %175 = vmatprep.subr.bf16.mxu1 %v267_v2  ;;  %v271_v5 = vld [vmem:[#allocation5 + $0x24] ss:$16 sps:$4 sm:$0xff]   ;;  %v273_v6 = vld [vmem:[#allocation5 + $0x2c] ss:$16 sps:$4 sm:$0xff]   ;;  %v275_v7 = vld [vmem:[#allocation5 + $0x20] ss:$16 sps:$4 sm:$0xff]  }
  0x3a   :  { %133 = vmatpush1.bf16.msra.mxu0 %v269_v3  ;;  %176 = vmatpush1.bf16.msra.mxu1 %v270_v4  ;;  %v276_v8 = vld [vmem:[#allocation5 + $0x28] ss:$16 sps:$4 sm:$0xff]   ;;  %v55_v9 = vld [vmem:[#allocation2] sm:$0xff]  ;;  %vm128_vm0 = vcmask 261120   ;;  %v69_v13 = vshrl.u32 %v68_v12, 7  ;;  %s379_s2 = smov [#allocation8]  }
  0x3b   :  { %134 = vmatprep.subr.bf16.mxu0 %v271_v5  ;;  %177 = vmatprep.subr.bf16.mxu1 %v273_v6  ;;  %v57_v11 = vpack.c.bf16 %v56_v10, %v55_v9  ;;  %v66_v16 = vld [vmem:[#allocation7] sm:$0xf]  ;;  %s231_s23 = sshll.u32 %s379_s2, 4  ;;  %s232_s23 = int_to_ptr.vmem [resolvable:$true] %s231_s23 }
  0x3c   :  { %v70_v14 = vsub.s32 0, %v69_v13  ;;  %v78_v15 = vsub.s32 2, %v69_v13  ;;  %v74_v17 = vsub.s32 1, %v69_v13  ;;  %v82_v18 = vsub.s32 3, %v69_v13  ;;  %s343_s24 = scalar_lea.vmem %s232_s23, 1024  ;;  %p348_p11 = scmp.lt.s32.totalorder %s232_s23, %s232_s23 }
  0x3d   :  { %p344_p10 = scmp.ne.s32.totalorder %s232_s23, %s343_s24  ;;  %p349_p12 = scmp.lt.s32.totalorder %s343_s24, %s343_s24 }
  0x3e   :  { %135 = vmatpush1.bf16.msra.mxu0 %v275_v7  ;;  %178 = vmatpush1.bf16.msra.mxu1 %v276_v8  ;;  %v71_v19 = vrot.slane %v66_v16, %v70_v14  ;;  %v79_v20 = vrot.slane %v66_v16, %v78_v15  ;;  %v75_v21 = vrot.slane %v66_v16, %v74_v17 }
  0x3f   :  { %v83_v22 = vrot.slane %v66_v16, %v82_v18  ;;  %p350_p13 = por %p349_p12, %p348_p11 }
  0x41   :  { %252 = vmatmul.mubr.msk.bf16.vlgmr.msra.gmra.mrb[0].mxu0 %vm128_vm0, %v57_v11  ;;  %253 = vmatmul.mubr.msk.bf16.vlgmr.msra.gmra.mrb[0].mxu1 %vm128_vm0, %v57_v11  ;;  %p351_p0 = pnand %p350_p13, %p344_p10 }
 0x114   :  { %v166_v23 = vpop.f32.mrb[0].mxu0  ;;  %v209_v24 = vpop.f32.mrb[0].mxu1 }
 0x115   :  { %v167_v25 = vadd.f32 %v166_v23, %v71_v19  ;;  %v210_v26 = vadd.f32 %v209_v24, %v79_v20  ;;  %v168_v27 = vpop.f32.mrb[1].mxu0  ;;  %v211_v28 = vpop.f32.mrb[1].mxu1 }
 0x116   :  { %v169_v29 = vadd.f32 %v168_v27, %v75_v21  ;;  %v212_v30 = vadd.f32 %v211_v28, %v83_v22  ;;  %v170_v31 = vpop.f32.mrb[2].mxu0  ;;  %v213_v32 = vpop.f32.mrb[2].mxu1 }
 0x117   :  { %218 = vst [vmem:[#allocation8] sm:$0xff] %v167_v25  ;;  %220 = vst [vmem:[#allocation8 + $0x10] sm:$0xff] %v210_v26  ;;  %v171_v33 = vadd.f32 %v170_v31, %v71_v19  ;;  %v214_v34 = vadd.f32 %v213_v32, %v79_v20  ;;  %v172_v35 = vpop.f32.mrb[3].mxu0  ;;  %v215_v36 = vpop.f32.mrb[3].mxu1 }
 0x118   :  { %219 = vst [vmem:[#allocation8 + $0x8] sm:$0xff] %v169_v29  ;;  %221 = vst [vmem:[#allocation8 + $0x18] sm:$0xff] %v212_v30  ;;  %v173_v37 = vadd.f32 %v172_v35, %v75_v21  ;;  %v216_v38 = vadd.f32 %v215_v36, %v83_v22 }
 0x119   :  { %222 = vst [vmem:[#allocation8 + $0x20] sm:$0xff] %v171_v33  ;;  %224 = vst [vmem:[#allocation8 + $0x30] sm:$0xff] %v214_v34 }
 0x11a   :  { %223 = vst [vmem:[#allocation8 + $0x28] sm:$0xff] %v173_v37  ;;  %225 = vst [vmem:[#allocation8 + $0x38] sm:$0xff] %v216_v38 }
 0x11b   :  { %354 = shalt.err (!%p351_p0)
}
 0x11c   :  { %s355_s27 = scalar_lea.hbm %s453_s3, 1024 }
 0x11d   :  { %p356_p1 = scmp.ne.s32.totalorder %s453_s3, %s355_s27  ;;  %p359_p2 = scmp.lt.u32.totalorder %s355_s27, %s453_s3 }
 0x11f   :  { %p361_p3 = pnand %p359_p2, %p356_p1 }
 0x121   :  { %364 = shalt.err (!%p361_p3)
}
 0x122   :  { %s380_s5 = smov 512   ;;  %s381_s6 = smov 32  }
 0x123   :  { %237 = dma.vmem_to_hbm [thread:$0]  %s232_s23, 1024, %s453_s3, [#allocation4], %s380_s5, %s380_s5, %s381_s6  }
 0x124   :  { %369 = dma.done.wait [#allocation4], 1024  }
 0x125   :  { %370 = vsyncadd [#allocation4], 4294966272 }
 0x126   :  { %241 = vsyncpa [#allocation3], 1 }
 0x127   :  { %242 = vsyncpa [#allocation6], 1 }
 0x128   :  { %243 = vsyncpa [#allocation4], 1 }

// kernel: _lambda_.6
= control target key start
LH: loop header
LB: loop body
LE: loop exit
PB: predicated region body
PF: predicated region fallthrough
CT: control target
= control target key end

     0   :  { %8 = vsyncpa [#allocation3], 0  ;;  %s396_s0 = inlined_call_operand.hbm [shape: f32[16,32], index: 0, kind: input, shape index: {}]   ;;  %s397_s1 = inlined_call_operand.hbm [shape: bf16[32,128], index: 1, kind: input, shape index: {}]   ;;  %s398_s2 = inlined_call_operand.hbm [shape: f32[1,128], index: 2, kind: input, shape index: {}]   ;;  %s399_s3 = inlined_call_operand.hbm [shape: f32[16,32], index: 3, kind: output, shape index: {}]  }
   0x1   :  { %9 = vsyncpa [#allocation6], 0 }
   0x2   :  { %10 = vsyncpa [#allocation4], 0  ;;  %s303_s12 = smov [#allocation5]   ;;  %s209_s16 = scalar_lea.hbm %s397_s1, 256 }
   0x3   :  { %s28_s13 = sshll.u32 %s303_s12, 4  ;;  %p210_p0 = scmp.ne.s32.totalorder %s397_s1, %s209_s16  ;;  %s29_s13 = int_to_ptr.vmem [resolvable:$true] %s28_s13 }
   0x4   :  { %p213_p1 = scmp.lt.u32.totalorder %s209_s16, %s397_s1 }
   0x6   :  { %p215_p2 = pnand %p213_p1, %p210_p0 }
   0x8   :  { %218 = shalt.err (!%p215_p2)
}
   0x9   :  { %s219_s21 = scalar_lea.vmem %s29_s13, 256  ;;  %p224_p4 = scmp.lt.s32.totalorder %s29_s13, %s29_s13 }
   0xa   :  { %p220_p3 = scmp.ne.s32.totalorder %s29_s13, %s219_s21  ;;  %p225_p5 = scmp.lt.s32.totalorder %s219_s21, %s219_s21 }
   0xc   :  { %p226_p6 = por %p225_p5, %p224_p4 }
   0xe   :  { %p227_p7 = pnand %p226_p6, %p220_p3 }
  0x10   :  { %230 = shalt.err (!%p227_p7)
}
  0x11   :  { %s304_s22 = smov 64   ;;  %s305_s23 = smov 4  }
  0x12   :  { %34 = dma.hbm_to_vmem [thread:$0]  %s397_s1, 256, %s29_s13, [#allocation6], %s304_s22, %s304_s22, %s305_s23  }
  0x13   :  { %s306_s26 = smov [#allocation2]   ;;  %s231_s30 = scalar_lea.hbm %s396_s0, 256 }
  0x14   :  { %s16_s27 = sshll.u32 %s306_s26, 4  ;;  %p232_p8 = scmp.ne.s32.totalorder %s396_s0, %s231_s30  ;;  %s17_s27 = int_to_ptr.vmem [resolvable:$true] %s16_s27 }
  0x15   :  { %p235_p9 = scmp.lt.u32.totalorder %s231_s30, %s396_s0 }
  0x17   :  { %p237_p10 = pnand %p235_p9, %p232_p8 }
  0x19   :  { %240 = shalt.err (!%p237_p10)
}
  0x1a   :  { %s241_s8 = scalar_lea.vmem %s17_s27, 256  ;;  %p246_p12 = scmp.lt.s32.totalorder %s17_s27, %s17_s27 }
  0x1b   :  { %p242_p11 = scmp.ne.s32.totalorder %s17_s27, %s241_s8  ;;  %p247_p13 = scmp.lt.s32.totalorder %s241_s8, %s241_s8 }
  0x1d   :  { %p248_p0 = por %p247_p13, %p246_p12 }
  0x1f   :  { %p249_p1 = pnand %p248_p0, %p242_p11 }
  0x21   :  { %252 = shalt.err (!%p249_p1)
}
  0x22   :  { %s307_s1 = smov 128   ;;  %s308_s9 = smov 8  }
  0x23   :  { %22 = dma.hbm_to_vmem [thread:$0]  %s396_s0, 256, %s17_s27, [#allocation3], %s307_s1, %s307_s1, %s308_s9  }
  0x24   :  { %s309_s12 = smov [#allocation7]   ;;  %s253_s16 = scalar_lea.hbm %s398_s2, 16 }
  0x25   :  { %s41_s13 = sshll.u32 %s309_s12, 4  ;;  %p254_p2 = scmp.ne.s32.totalorder %s398_s2, %s253_s16  ;;  %s42_s13 = int_to_ptr.vmem [resolvable:$true] %s41_s13 }
  0x26   :  { %p257_p3 = scmp.lt.u32.totalorder %s253_s16, %s398_s2 }
  0x28   :  { %p259_p4 = pnand %p257_p3, %p254_p2 }
  0x2a   :  { %262 = shalt.err (!%p259_p4)
}
  0x2b   :  { %s263_s21 = scalar_lea.vmem %s42_s13, 16  ;;  %s267_s0 = scalar_lea.vmem %s42_s13, 32 }
  0x2c   :  { %p264_p5 = scmp.ne.s32.totalorder %s42_s13, %s263_s21  ;;  %p268_p6 = scmp.lt.s32.totalorder %s42_s13, %s42_s13 }
  0x2d   :  { %p269_p7 = scmp.lt.s32.totalorder %s267_s0, %s263_s21 }
  0x2f   :  { %p270_p8 = por %p269_p7, %p268_p6 }
  0x31   :  { %p271_p9 = pnand %p270_p8, %p264_p5 }
  0x33   :  { %274 = shalt.err (!%p271_p9)
}
  0x34   :  { %44 = dma.hbm_to_vmem [thread:$0]  %s398_s2, 16, %s42_s13, [#allocation6]  }
  0x35   :  { %297 = dma.done.wait [#allocation3], 256  }
  0x36   :  { %298 = vsyncadd [#allocation3], 4294967040 }
  0x37   :  { %299 = dma.done.wait [#allocation6], 272  }
  0x38   :  { %300 = vsyncadd [#allocation6], 4294967024  ;;  %v310_v0 = vmov 0.0   ;;  %vm311_vm0 = vmmov 0   ;;  %v203_v1 = vld [vmem:[#allocation5] sm:$0xff]   ;;  %v204_v2 = vld [vmem:[#allocation5 + $0x8] sm:$0xff]  }
  0x39   :  { %183 = vmatprep.subr.bf16.mxu0 %v310_v0  ;;  %187 = vmatprep.mubr.msk.bf16.mxu0 %vm311_vm0, %v310_v0  ;;  %v55_v3 = vld [vmem:[#allocation2] sm:$0xff]  ;;  %v56_v4 = vld [vmem:[#allocation2 + $0x8] sm:$0xff]  ;;  %vm81_vm1 = vcmask 261120   ;;  %s312_s2 = smov 96   ;;  %s313_s25 = smov 32  }
  0x3a   :  { %184 = vmatpush3.bf16.msra.mxu0 %v203_v1  ;;  %v57_v5 = vpack.c.bf16 %v56_v4, %v55_v3  ;;  %v176_v6 = vld [vmem:[#allocation7] ss:$0 sm:$0xff]  ;;  %s314_s26 = smov [#allocation8]  }
  0x3b   :  { %185 = vmatprep.subr.bf16.mxu0 %v310_v0  ;;  %s163_s27 = sshll.u32 %s314_s26, 4  ;;  %s164_s27 = int_to_ptr.vmem [resolvable:$true] %s163_s27 }
  0x3c   :  { %p280_p11 = scmp.lt.s32.totalorder %s164_s27, %s164_s27 }
  0x3e   :  { %186 = vmatpush3.bf16.msra.mxu0 %v204_v2 }
  0x41   :  { %188 = vmatmul.mubr.msk.bf16.vlgmr.msra.gmra.mrb[0].mxu0 %vm81_vm1, %v57_v5 }
 0x114   :  { %v119_v7 = vpop.f32.mrb[0].mxu0 }
 0x115   :  { %v120_v8 = vadd.f32 %v176_v6, %v119_v7  ;;  %v189_v9 = vpop.f32.mrb[1].mxu0 }
 0x116   :  { %v122_v10 = vpop.f32.mrb[2].mxu0 }
 0x117   :  { %205 = vtanh.f32 %v120_v8  ;;  %v123_v11 = vadd.f32 %v176_v6, %v122_v10  ;;  %v190_v12 = vpop.f32.mrb[3].mxu0 }
 0x119   :  { %207 = vtanh.f32 %v123_v11 }
 0x121   :  { %v206_v13 = vpop.eup %205 }
 0x122   :  { %138 = vrot.lane.b32.xlu1 %v206_v13, %s304_s22  ;;  %130 = vrot.lane.b32.xlu0 %v206_v13, %s312_s2 }
 0x123   :  { %v208_v14 = vpop.eup %207 }
 0x126   :  { %140 = vrot.lane.b32.xlu1 %v208_v14, %s304_s22  ;;  %132 = vrot.lane.b32.xlu0 %v208_v14, %s312_s2  ;;  %s275_s22 = scalar_lea.vmem %s164_s27, 256 }
 0x127   :  { %p276_p10 = scmp.ne.s32.totalorder %s164_s27, %s275_s22  ;;  %p281_p12 = scmp.lt.s32.totalorder %s275_s22, %s275_s22 }
 0x129   :  { %p282_p13 = por %p281_p12, %p280_p11 }
 0x12a   :  { %148 = vrot.lane.b32.xlu1 %v208_v14, %s313_s25  ;;  %146 = vrot.lane.b32.xlu0 %v206_v13, %s313_s25 }
 0x12b   :  { %p283_p0 = pnand %p282_p13, %p276_p10 }
 0x194   :  { %v139_v15 = vpop.permute.xlu1 %138  ;;  %v131_v16 = vpop.permute.xlu0 %130 }
 0x195   :  { %v136_v17 = vadd.f32 %v206_v13, %v131_v16 }
 0x197   :  { %v144_v22 = vadd.f32 %v139_v15, %v136_v17 }
 0x198   :  { %v141_v18 = vpop.permute.xlu1 %140  ;;  %v133_v19 = vpop.permute.xlu0 %132 }
 0x199   :  { %v137_v20 = vadd.f32 %v208_v14, %v133_v19 }
 0x19b   :  { %v145_v21 = vadd.f32 %v141_v18, %v137_v20 }
 0x19c   :  { %v149_v23 = vpop.permute.xlu1 %148  ;;  %v147_v24 = vpop.permute.xlu0 %146 }
 0x19d   :  { %v153_v25 = vadd.f32 %v149_v23, %v145_v21  ;;  %v152_v26 = vadd.f32 %v147_v24, %v144_v22 }
 0x19f   :  { %v155_v27 = vmul.f32 0.25, %v153_v25  ;;  %v154_v28 = vmul.f32 0.25, %v152_v26 }
 0x1a1   :  { %157 = vst.msk [vmem:[#allocation8 + $0x8] sm:$0xff] %vm81_vm1, %v155_v27  ;;  %156 = vst.msk [vmem:[#allocation8] sm:$0xff] %vm81_vm1, %v154_v28 }
 0x1a2   :  { %286 = shalt.err (!%p283_p0)
}
 0x1a3   :  { %s287_s30 = scalar_lea.hbm %s399_s3, 256 }
 0x1a4   :  { %p288_p1 = scmp.ne.s32.totalorder %s399_s3, %s287_s30  ;;  %p291_p2 = scmp.lt.u32.totalorder %s287_s30, %s399_s3 }
 0x1a6   :  { %p293_p3 = pnand %p291_p2, %p288_p1 }
 0x1a8   :  { %296 = shalt.err (!%p293_p3)
}
 0x1a9   :  { %169 = dma.vmem_to_hbm [thread:$0]  %s164_s27, 256, %s399_s3, [#allocation4], %s307_s1, %s307_s1, %s308_s9  }
 0x1aa   :  { %301 = dma.done.wait [#allocation4], 256  }
 0x1ab   :  { %302 = vsyncadd [#allocation4], 4294967040 }
 0x1ac   :  { %173 = vsyncpa [#allocation3], 1 }
 0x1ad   :  { %174 = vsyncpa [#allocation6], 1 }
 0x1ae   :  { %175 = vsyncpa [#allocation4], 1 }

// kernel: _lambda_.9
= control target key start
LH: loop header
LB: loop body
LE: loop exit
PB: predicated region body
PF: predicated region fallthrough
CT: control target
= control target key end

     0   :  { %8 = vsyncpa [#allocation3], 0  ;;  %s630_s0 = inlined_call_operand.hbm [shape: f32[16,128], index: 0, kind: input, shape index: {}]   ;;  %s631_s1 = inlined_call_operand.hbm [shape: bf16[4,32,128], index: 1, kind: input, shape index: {}]   ;;  %s632_s2 = inlined_call_operand.hbm [shape: f32[1,512], index: 2, kind: input, shape index: {}]   ;;  %s633_s3 = inlined_call_operand.hbm [shape: f32[16,512], index: 3, kind: output, shape index: {}]  }
   0x1   :  { %9 = vsyncpa [#allocation6], 0 }
   0x2   :  { %10 = vsyncpa [#allocation4], 0  ;;  %s536_s12 = smov [#allocation5]   ;;  %s442_s16 = scalar_lea.hbm %s631_s1, 1024 }
   0x3   :  { %s28_s13 = sshll.u32 %s536_s12, 4  ;;  %p443_p0 = scmp.ne.s32.totalorder %s631_s1, %s442_s16  ;;  %s29_s13 = int_to_ptr.vmem [resolvable:$true] %s28_s13 }
   0x4   :  { %p446_p1 = scmp.lt.u32.totalorder %s442_s16, %s631_s1 }
   0x6   :  { %p448_p2 = pnand %p446_p1, %p443_p0 }
   0x8   :  { %451 = shalt.err (!%p448_p2)
}
   0x9   :  { %s452_s21 = scalar_lea.vmem %s29_s13, 1024  ;;  %p457_p4 = scmp.lt.s32.totalorder %s29_s13, %s29_s13 }
   0xa   :  { %p453_p3 = scmp.ne.s32.totalorder %s29_s13, %s452_s21  ;;  %p458_p5 = scmp.lt.s32.totalorder %s452_s21, %s452_s21 }
   0xc   :  { %p459_p6 = por %p458_p5, %p457_p4 }
   0xe   :  { %p460_p7 = pnand %p459_p6, %p453_p3 }
  0x10   :  { %463 = shalt.err (!%p460_p7)
}
  0x11   :  { %s537_s22 = smov 64   ;;  %s538_s23 = smov 4  }
  0x12   :  { %34 = dma.hbm_to_vmem [thread:$0]  %s631_s1, 1024, %s29_s13, [#allocation6], %s537_s22, %s537_s22, %s538_s23  }
  0x13   :  { %s539_s26 = smov [#allocation2]   ;;  %s464_s30 = scalar_lea.hbm %s630_s0, 256 }
  0x14   :  { %s16_s27 = sshll.u32 %s539_s26, 4  ;;  %p465_p8 = scmp.ne.s32.totalorder %s630_s0, %s464_s30  ;;  %s17_s27 = int_to_ptr.vmem [resolvable:$true] %s16_s27 }
  0x15   :  { %p468_p9 = scmp.lt.u32.totalorder %s464_s30, %s630_s0 }
  0x17   :  { %p470_p10 = pnand %p468_p9, %p465_p8 }
  0x19   :  { %473 = shalt.err (!%p470_p10)
}
  0x1a   :  { %s474_s8 = scalar_lea.vmem %s17_s27, 256  ;;  %p479_p12 = scmp.lt.s32.totalorder %s17_s27, %s17_s27 }
  0x1b   :  { %p475_p11 = scmp.ne.s32.totalorder %s17_s27, %s474_s8  ;;  %p480_p13 = scmp.lt.s32.totalorder %s474_s8, %s474_s8 }
  0x1d   :  { %p481_p0 = por %p480_p13, %p479_p12 }
  0x1f   :  { %p482_p1 = pnand %p481_p0, %p475_p11 }
  0x21   :  { %485 = shalt.err (!%p482_p1)
}
  0x22   :  { %s540_s1 = smov 128   ;;  %s541_s9 = smov 8  }
  0x23   :  { %22 = dma.hbm_to_vmem [thread:$0]  %s630_s0, 256, %s17_s27, [#allocation3], %s540_s1, %s540_s1, %s541_s9  }
  0x24   :  { %s542_s12 = smov [#allocation7]   ;;  %s486_s16 = scalar_lea.hbm %s632_s2, 64 }
  0x25   :  { %s41_s13 = sshll.u32 %s542_s12, 4  ;;  %p487_p2 = scmp.ne.s32.totalorder %s632_s2, %s486_s16  ;;  %s42_s13 = int_to_ptr.vmem [resolvable:$true] %s41_s13 }
  0x26   :  { %p490_p3 = scmp.lt.u32.totalorder %s486_s16, %s632_s2 }
  0x28   :  { %p492_p4 = pnand %p490_p3, %p487_p2 }
  0x2a   :  { %495 = shalt.err (!%p492_p4)
}
  0x2b   :  { %s496_s21 = scalar_lea.vmem %s42_s13, 64  ;;  %p501_p6 = scmp.lt.s32.totalorder %s42_s13, %s42_s13 }
  0x2c   :  { %p497_p5 = scmp.ne.s32.totalorder %s42_s13, %s496_s21  ;;  %p502_p7 = scmp.lt.s32.totalorder %s496_s21, %s496_s21 }
  0x2e   :  { %p503_p8 = por %p502_p7, %p501_p6 }
  0x30   :  { %p504_p9 = pnand %p503_p8, %p497_p5 }
  0x32   :  { %507 = shalt.err (!%p504_p9)
}
  0x33   :  { %44 = dma.hbm_to_vmem [thread:$0]  %s632_s2, 64, %s42_s13, [#allocation6]  }
  0x34   :  { %530 = dma.done.wait [#allocation3], 256  }
  0x35   :  { %531 = vsyncadd [#allocation3], 4294967040 }
  0x36   :  { %532 = dma.done.wait [#allocation6], 1088  }
  0x37   :  { %533 = vsyncadd [#allocation6], 4294966208  ;;  %v543_v0 = vmov 0.0   ;;  %vm544_vm0 = vmmov 0   ;;  %v55_v1 = vld [vmem:[#allocation2] sm:$0xff]  ;;  %v56_v2 = vld [vmem:[#allocation2 + $0x8] sm:$0xff]  ;;  %v311_v15 = vlaneseq }
  0x38   :  { %389 = vmatprep.subr.bf16.mxu0 %v543_v0  ;;  %397 = vmatprep.subr.bf16.mxu1 %v543_v0  ;;  %v57_v3 = vpack.c.bf16 %v56_v2, %v55_v1  ;;  %v434_v4 = vld [vmem:[#allocation5] sm:$0xff]   ;;  %v435_v5 = vld [vmem:[#allocation5 + $0x10] sm:$0xff]   ;;  %s545_s24 = smov 96   ;;  %s546_s2 = smov 32   ;;  %v436_v6 = vld [vmem:[#allocation5 + $0x8] sm:$0xff]   ;;  %vm74_vm1 = vcmask 261120  }
  0x39   :  { %393 = vmatprep.mubr.msk.bf16.mxu0 %vm544_vm0, %v543_v0  ;;  %401 = vmatprep.mubr.msk.bf16.mxu1 %vm544_vm0, %v543_v0  ;;  %v437_v7 = vld [vmem:[#allocation5 + $0x18] sm:$0xff]   ;;  %v438_v8 = vld [vmem:[#allocation5 + $0x20] sm:$0xff]   ;;  %v440_v9 = vld [vmem:[#allocation5 + $0x28] sm:$0xff]   ;;  %v312_v16 = vshrl.u32 %v311_v15, 7 }
  0x3a   :  { %125 = vrot.lane.b32.xlu0 %v57_v3, %s545_s24  ;;  %251 = vrot.lane.b32.xlu1 %v57_v3, %s546_s2  ;;  %v439_v10 = vld [vmem:[#allocation5 + $0x30] sm:$0xff]   ;;  %v441_v12 = vld [vmem:[#allocation5 + $0x38] sm:$0xff]   ;;  %v309_v18 = vld [vmem:[#allocation7] sm:$0xf] }
  0x3b   :  { %390 = vmatpush3.bf16.msra.mxu0 %v434_v4  ;;  %398 = vmatpush3.bf16.msra.mxu1 %v435_v5  ;;  %v313_v17 = vsub.s32 0, %v312_v16  ;;  %v317_v26 = vsub.s32 1, %v312_v16  ;;  %v321_v28 = vsub.s32 2, %v312_v16  ;;  %v325_v33 = vsub.s32 3, %v312_v16 }
  0x3c   :  { %391 = vmatprep.subr.bf16.mxu0 %v543_v0  ;;  %399 = vmatprep.subr.bf16.mxu1 %v543_v0 }
  0x3d   :  { %v314_v19 = vrot.slane %v309_v18, %v313_v17  ;;  %v318_v27 = vrot.slane %v309_v18, %v317_v26  ;;  %v322_v32 = vrot.slane %v309_v18, %v321_v28  ;;  %v326_v40 = vrot.slane %v309_v18, %v325_v33 }
  0x3e   :  { %188 = vrot.lane.b32.xlu0 %v57_v3, %s537_s22  ;;  %s547_s22 = smov [#allocation8]  }
  0x3f   :  { %392 = vmatpush3.bf16.msra.mxu0 %v436_v6  ;;  %400 = vmatpush3.bf16.msra.mxu1 %v437_v7  ;;  %s352_s25 = sshll.u32 %s547_s22, 4  ;;  %s353_s25 = int_to_ptr.vmem [resolvable:$true] %s352_s25 }
  0x40   :  { %405 = vmatprep.subr.bf16.mxu0 %v543_v0  ;;  %413 = vmatprep.subr.bf16.mxu1 %v543_v0  ;;  %s508_s26 = scalar_lea.vmem %s353_s25, 1024  ;;  %p513_p11 = scmp.lt.s32.totalorder %s353_s25, %s353_s25 }
  0x41   :  { %p509_p10 = scmp.ne.s32.totalorder %s353_s25, %s508_s26  ;;  %p514_p12 = scmp.lt.s32.totalorder %s508_s26, %s508_s26 }
  0x42   :  { %394 = vmatmul.mubr.msk.bf16.vlgmr.msra.gmra.mrb[0].mxu0 %vm74_vm1, %v57_v3 }
  0x43   :  { %406 = vmatpush3.bf16.msra.mxu0 %v438_v8  ;;  %409 = vmatprep.mubr.msk.bf16.mxu0 %vm544_vm0, %v543_v0  ;;  %p515_p13 = por %p514_p12, %p513_p11 }
  0x44   :  { %407 = vmatprep.subr.bf16.mxu0 %v543_v0 }
  0x45   :  { %p516_p0 = pnand %p515_p13, %p509_p10 }
  0x47   :  { %408 = vmatpush3.bf16.msra.mxu0 %v440_v9 }
  0xac   :  { %v126_v11 = vpop.permute.xlu0 %125  ;;  %v252_v14 = vpop.permute.xlu1 %251 }
  0xad   :  { %402 = vmatmul.mubr.msk.bf16.vlgmr.msra.gmra.mrb[0].mxu1 %vm74_vm1, %v126_v11 }
  0xae   :  { %414 = vmatpush3.bf16.msra.mxu1 %v439_v10  ;;  %417 = vmatprep.mubr.msk.bf16.mxu1 %vm544_vm0, %v543_v0 }
  0xaf   :  { %415 = vmatprep.subr.bf16.mxu1 %v543_v0 }
  0xb0   :  { %v189_v13 = vpop.permute.xlu0 %188 }
  0xb1   :  { %410 = vmatmul.mubr.msk.bf16.vlgmr.msra.gmra.mrb[4].mxu0 %vm74_vm1, %v189_v13 }
  0xb2   :  { %416 = vmatpush3.bf16.msra.mxu1 %v441_v12 }
  0xb5   :  { %418 = vmatmul.mubr.msk.bf16.vlgmr.msra.gmra.mrb[4].mxu1 %vm74_vm1, %v252_v14 }
 0x115   :  { %v112_v20 = vpop.f32.mrb[0].mxu0 }
 0x116   :  { %v331_v21 = vadd.f32 %v314_v19, %v112_v20  ;;  %v395_v22 = vpop.f32.mrb[1].mxu0 }
 0x117   :  { %v115_v23 = vpop.f32.mrb[2].mxu0 }
 0x118   :  { %339 = vst [vmem:[#allocation8] sm:$0xff] %v331_v21  ;;  %v335_v24 = vadd.f32 %v314_v19, %v115_v23  ;;  %v396_v25 = vpop.f32.mrb[3].mxu0 }
 0x11a   :  { %343 = vst [vmem:[#allocation8 + $0x20] sm:$0xff] %v335_v24 }
 0x180   :  { %v176_v29 = vpop.f32.mrb[0].mxu1 }
 0x181   :  { %v332_v30 = vadd.f32 %v318_v27, %v176_v29  ;;  %v403_v31 = vpop.f32.mrb[1].mxu1 }
 0x182   :  { %v179_v34 = vpop.f32.mrb[2].mxu1 }
 0x183   :  { %340 = vst [vmem:[#allocation8 + $0x8] sm:$0xff] %v332_v30  ;;  %v336_v35 = vadd.f32 %v318_v27, %v179_v34  ;;  %v404_v36 = vpop.f32.mrb[3].mxu1 }
 0x184   :  { %v239_v37 = vpop.f32.mrb[4].mxu0 }
 0x185   :  { %344 = vst [vmem:[#allocation8 + $0x28] sm:$0xff] %v336_v35  ;;  %v333_v38 = vadd.f32 %v322_v32, %v239_v37  ;;  %v411_v39 = vpop.f32.mrb[5].mxu0 }
 0x186   :  { %v242_v41 = vpop.f32.mrb[6].mxu0 }
 0x187   :  { %341 = vst [vmem:[#allocation8 + $0x10] sm:$0xff] %v333_v38  ;;  %v337_v42 = vadd.f32 %v322_v32, %v242_v41  ;;  %v412_v43 = vpop.f32.mrb[7].mxu0 }
 0x188   :  { %v302_v44 = vpop.f32.mrb[4].mxu1 }
 0x189   :  { %345 = vst [vmem:[#allocation8 + $0x30] sm:$0xff] %v337_v42  ;;  %v334_v45 = vadd.f32 %v326_v40, %v302_v44  ;;  %v419_v46 = vpop.f32.mrb[5].mxu1 }
 0x18a   :  { %v305_v47 = vpop.f32.mrb[6].mxu1 }
 0x18b   :  { %342 = vst [vmem:[#allocation8 + $0x18] sm:$0xff] %v334_v45  ;;  %v338_v48 = vadd.f32 %v326_v40, %v305_v47  ;;  %v420_v49 = vpop.f32.mrb[7].mxu1 }
 0x18d   :  { %346 = vst [vmem:[#allocation8 + $0x38] sm:$0xff] %v338_v48 }
 0x18e   :  { %519 = shalt.err (!%p516_p0)
}
 0x18f   :  { %s520_s29 = scalar_lea.hbm %s633_s3, 1024 }
 0x190   :  { %p521_p1 = scmp.ne.s32.totalorder %s633_s3, %s520_s29  ;;  %p524_p2 = scmp.lt.u32.totalorder %s520_s29, %s633_s3 }
 0x192   :  { %p526_p3 = pnand %p524_p2, %p521_p1 }
 0x194   :  { %529 = shalt.err (!%p526_p3)
}
 0x195   :  { %s548_s7 = smov 512  }
 0x196   :  { %358 = dma.vmem_to_hbm [thread:$0]  %s353_s25, 1024, %s633_s3, [#allocation4], %s548_s7, %s548_s7, %s546_s2  }
 0x197   :  { %534 = dma.done.wait [#allocation4], 1024  }
 0x198   :  { %535 = vsyncadd [#allocation4], 4294966272 }
 0x199   :  { %362 = vsyncpa [#allocation3], 1 }
 0x19a   :  { %363 = vsyncpa [#allocation6], 1 }
 0x19b   :  { %364 = vsyncpa [#allocation4], 1 }

// kernel: _lambda_.11
= control target key start
LH: loop header
LB: loop body
LE: loop exit
PB: predicated region body
PF: predicated region fallthrough
CT: control target
= control target key end

     0   :  { %10 = vsyncpa [#allocation3], 0  ;;  %s907_s0 = inlined_call_operand.hbm [shape: f32[16,64], index: 0, kind: input, shape index: {}]   ;;  %s908_s1 = inlined_call_operand.hbm [shape: bf16[64,128], index: 1, kind: input, shape index: {}]   ;;  %s909_s2 = inlined_call_operand.hbm [shape: f32[1,128], index: 2, kind: input, shape index: {}]   ;;  %s910_s3 = inlined_call_operand.hbm [shape: bf16[4,32,64], index: 3, kind: input, shape index: {}]   ;;  %s911_s4 = inlined_call_operand.hbm [shape: f32[4,64], index: 4, kind: input, shape index: {}]   ;;  %s912_s5 = inlined_call_operand.hbm [shape: f32[16,256], index: 5, kind: output, shape index: {}]  }
   0x1   :  { %11 = vsyncpa [#allocation6], 0 }
   0x2   :  { %12 = vsyncpa [#allocation9], 0 }
   0x3   :  { %13 = vsyncpa [#allocation4], 0  ;;  %s749_s18 = smov [#allocation5]   ;;  %s609_s22 = scalar_lea.hbm %s908_s1, 512 }
   0x4   :  { %s31_s19 = sshll.u32 %s749_s18, 4  ;;  %p610_p0 = scmp.ne.s32.totalorder %s908_s1, %s609_s22  ;;  %s32_s19 = int_to_ptr.vmem [resolvable:$true] %s31_s19 }
   0x5   :  { %p613_p1 = scmp.lt.u32.totalorder %s609_s22, %s908_s1 }
   0x7   :  { %p615_p2 = pnand %p613_p1, %p610_p0 }
   0x9   :  { %618 = shalt.err (!%p615_p2)
}
   0xa   :  { %s619_s27 = scalar_lea.vmem %s32_s19, 512  ;;  %p624_p4 = scmp.lt.s32.totalorder %s32_s19, %s32_s19 }
   0xb   :  { %p620_p3 = scmp.ne.s32.totalorder %s32_s19, %s619_s27  ;;  %p625_p5 = scmp.lt.s32.totalorder %s619_s27, %s619_s27 }
   0xd   :  { %p626_p6 = por %p625_p5, %p624_p4 }
   0xf   :  { %p627_p7 = pnand %p626_p6, %p620_p3 }
  0x11   :  { %630 = shalt.err (!%p627_p7)
}
  0x12   :  { %s750_s28 = smov 64   ;;  %s751_s29 = smov 4  }
  0x13   :  { %37 = dma.hbm_to_vmem [thread:$0]  %s908_s1, 512, %s32_s19, [#allocation6], %s750_s28, %s750_s28, %s751_s29  }
  0x14   :  { %s752_s7 = smov [#allocation8]   ;;  %s753_s9 = smov [#allocation2]  }
  0x15   :  { %s53_s8 = sshll.u32 %s752_s7, 4  ;;  %s19_s10 = sshll.u32 %s753_s9, 4  ;;  %s54_s8 = int_to_ptr.vmem [resolvable:$true] %s53_s8  ;;  %s20_s10 = int_to_ptr.vmem [resolvable:$true] %s19_s10 }
  0x16   :  { %s631_s13 = scalar_lea.hbm %s910_s3, 1024 }
  0x17   :  { %p632_p8 = scmp.ne.s32.totalorder %s910_s3, %s631_s13  ;;  %p635_p9 = scmp.lt.u32.totalorder %s631_s13, %s910_s3 }
  0x19   :  { %p637_p10 = pnand %p635_p9, %p632_p8 }
  0x1b   :  { %640 = shalt.err (!%p637_p10)
}
  0x1c   :  { %s641_s1 = scalar_lea.vmem %s54_s8, 1024  ;;  %p646_p12 = scmp.lt.s32.totalorder %s54_s8, %s54_s8 }
  0x1d   :  { %p642_p11 = scmp.ne.s32.totalorder %s54_s8, %s641_s1  ;;  %p647_p13 = scmp.lt.s32.totalorder %s641_s1, %s641_s1 }
  0x1f   :  { %p648_p0 = por %p647_p13, %p646_p12 }
  0x21   :  { %p649_p1 = pnand %p648_p0, %p642_p11 }
  0x23   :  { %652 = shalt.err (!%p649_p1)
}
  0x24   :  { %59 = dma.hbm_to_vmem [thread:$0]  %s910_s3, 1024, %s54_s8, [#allocation9], %s750_s28, %s750_s28, %s751_s29  }
  0x25   :  { %s653_s22 = scalar_lea.hbm %s907_s0, 256 }
  0x26   :  { %p654_p2 = scmp.ne.s32.totalorder %s907_s0, %s653_s22  ;;  %p657_p3 = scmp.lt.u32.totalorder %s653_s22, %s907_s0 }
  0x28   :  { %p659_p4 = pnand %p657_p3, %p654_p2 }
  0x2a   :  { %662 = shalt.err (!%p659_p4)
}
  0x2b   :  { %s663_s27 = scalar_lea.vmem %s20_s10, 256  ;;  %p668_p6 = scmp.lt.s32.totalorder %s20_s10, %s20_s10 }
  0x2c   :  { %p664_p5 = scmp.ne.s32.totalorder %s20_s10, %s663_s27  ;;  %p669_p7 = scmp.lt.s32.totalorder %s663_s27, %s663_s27 }
  0x2e   :  { %p670_p8 = por %p669_p7, %p668_p6 }
  0x30   :  { %p671_p9 = pnand %p670_p8, %p664_p5 }
  0x32   :  { %674 = shalt.err (!%p671_p9)
}
  0x33   :  { %s754_s3 = smov 128   ;;  %s755_s29 = smov 8  }
  0x34   :  { %25 = dma.hbm_to_vmem [thread:$0]  %s907_s0, 256, %s20_s10, [#allocation3], %s754_s3, %s754_s3, %s755_s29  }
  0x35   :  { %s756_s7 = smov [#allocation7]   ;;  %s757_s9 = smov [#allocation10]  }
  0x36   :  { %s44_s8 = sshll.u32 %s756_s7, 4  ;;  %s66_s11 = sshll.u32 %s757_s9, 4  ;;  %s45_s8 = int_to_ptr.vmem [resolvable:$true] %s44_s8  ;;  %s67_s11 = int_to_ptr.vmem [resolvable:$true] %s66_s11 }
  0x37   :  { %s675_s14 = scalar_lea.hbm %s909_s2, 16 }
  0x38   :  { %p676_p10 = scmp.ne.s32.totalorder %s909_s2, %s675_s14  ;;  %p679_p11 = scmp.lt.u32.totalorder %s675_s14, %s909_s2 }
  0x3a   :  { %p681_p12 = pnand %p679_p11, %p676_p10 }
  0x3c   :  { %684 = shalt.err (!%p681_p12)
}
  0x3d   :  { %s685_s0 = scalar_lea.vmem %s45_s8, 16  ;;  %s689_s10 = scalar_lea.vmem %s45_s8, 32 }
  0x3e   :  { %p686_p13 = scmp.ne.s32.totalorder %s45_s8, %s685_s0  ;;  %p690_p0 = scmp.lt.s32.totalorder %s45_s8, %s45_s8 }
  0x3f   :  { %p691_p1 = scmp.lt.s32.totalorder %s689_s10, %s685_s0 }
  0x41   :  { %p692_p2 = por %p691_p1, %p690_p0 }
  0x43   :  { %p693_p3 = pnand %p692_p2, %p686_p13 }
  0x45   :  { %696 = shalt.err (!%p693_p3)
}
  0x46   :  { %47 = dma.hbm_to_vmem [thread:$0]  %s909_s2, 16, %s45_s8, [#allocation6]  }
  0x47   :  { %s697_s22 = scalar_lea.hbm %s911_s4, 64 }
  0x48   :  { %p698_p4 = scmp.ne.s32.totalorder %s911_s4, %s697_s22  ;;  %p701_p5 = scmp.lt.u32.totalorder %s697_s22, %s911_s4 }
  0x4a   :  { %p703_p6 = pnand %p701_p5, %p698_p4 }
  0x4c   :  { %706 = shalt.err (!%p703_p6)
}
  0x4d   :  { %s707_s27 = scalar_lea.vmem %s67_s11, 64  ;;  %p712_p8 = scmp.lt.s32.totalorder %s67_s11, %s67_s11 }
  0x4e   :  { %p708_p7 = scmp.ne.s32.totalorder %s67_s11, %s707_s27  ;;  %p713_p9 = scmp.lt.s32.totalorder %s707_s27, %s707_s27 }
  0x50   :  { %p714_p10 = por %p713_p9, %p712_p8 }
  0x52   :  { %p715_p11 = pnand %p714_p10, %p708_p7 }
  0x54   :  { %718 = shalt.err (!%p715_p11)
}
  0x55   :  { %69 = dma.hbm_to_vmem [thread:$0]  %s911_s4, 64, %s67_s11, [#allocation9]  }
  0x56   :  { %741 = dma.done.wait [#allocation3], 256  }
  0x57   :  { %742 = vsyncadd [#allocation3], 4294967040 }
  0x58   :  { %743 = dma.done.wait [#allocation6], 528  }
  0x59   :  { %744 = vsyncadd [#allocation6], 4294966768 }
  0x5a   :  { %745 = dma.done.wait [#allocation9], 1088  }
  0x5b   :  { %746 = vsyncadd [#allocation9], 4294966208  ;;  %v758_v0 = vmov 0.0   ;;  %vm759_vm0 = vmmov 0   ;;  %v597_v1 = vld [vmem:[#allocation5] sm:$0xff]   ;;  %v598_v2 = vld [vmem:[#allocation5 + $0x8] sm:$0xff]  }
  0x5c   :  { %537 = vmatprep.subr.bf16.mxu0 %v758_v0  ;;  %545 = vmatprep.mubr.msk.bf16.mxu0 %vm759_vm0, %v758_v0  ;;  %v599_v3 = vld [vmem:[#allocation5 + $0x10] sm:$0xff]   ;;  %v600_v4 = vld [vmem:[#allocation5 + $0x18] sm:$0xff]   ;;  %vm128_vm1 = vcmask 523264   ;;  %v601_v8 = vld [vmem:[#allocation8] sm:$0xff]   ;;  %vm197_vm2 = vcmask 261120   ;;  %s760_s4 = smov 96  }
  0x5d   :  { %549 = vmatprep.subr.bf16.mxu1 %v758_v0  ;;  %553 = vmatprep.mubr.msk.bf16.mxu1 %vm759_vm0, %v758_v0  ;;  %v86_v5 = vld [vmem:[#allocation2] sm:$0xff]  ;;  %v87_v6 = vld [vmem:[#allocation2 + $0x8] sm:$0xff]  ;;  %v604_v10 = vld [vmem:[#allocation8 + $0x20] sm:$0xff]   ;;  %s761_s29 = smov 32   ;;  %s762_s30 = smov [#allocation11]  }
  0x5e   :  { %538 = vmatpush3.bf16.msra.mxu0 %v597_v1  ;;  %v88_v7 = vpack.c.bf16 %v87_v6, %v86_v5  ;;  %550 = vmatpush3.bf16.msra.mxu1 %v601_v8  ;;  %v602_v9 = vld [vmem:[#allocation8 + $0x8] sm:$0xff]   ;;  %v498_v12 = vld [vmem:[#allocation7] ss:$0 sm:$0xff]  ;;  %v603_v22 = vld [vmem:[#allocation8 + $0x10] sm:$0xff]   ;;  %s484_s6 = sshll.u32 %s762_s30, 4  ;;  %s485_s6 = int_to_ptr.vmem [resolvable:$true] %s484_s6 }
  0x5f   :  { %539 = vmatprep.subr.bf16.mxu0 %v758_v0  ;;  %551 = vmatprep.subr.bf16.mxu1 %v758_v0  ;;  %v606_v11 = vld [vmem:[#allocation8 + $0x28] sm:$0xff]   ;;  %v605_v23 = vld [vmem:[#allocation8 + $0x18] sm:$0xff]   ;;  %v607_v24 = vld [vmem:[#allocation8 + $0x30] sm:$0xff]   ;;  %p724_p13 = scmp.lt.s32.totalorder %s485_s6, %s485_s6 }
  0x60   :  { %v608_v27 = vld [vmem:[#allocation8 + $0x38] sm:$0xff]   ;;  %v508_v33 = vld [vmem:[#allocation10 + $0x1] ss:$0 sm:$0xff]  ;;  %v516_v46 = vld [vmem:[#allocation10 + $0x3] ss:$0 sm:$0xff] }
  0x61   :  { %v504_v55 = vld [vmem:[#allocation10] ss:$0 sm:$0xff]  ;;  %v512_v59 = vld [vmem:[#allocation10 + $0x2] ss:$0 sm:$0xff] }
  0x62   :  { %540 = vmatpush3.bf16.msra.mxu0 %v598_v2  ;;  %552 = vmatpush3.bf16.msra.mxu1 %v602_v9 }
  0x63   :  { %541 = vmatprep.subr.bf16.mxu0 %v758_v0  ;;  %557 = vmatprep.subr.bf16.mxu1 %v758_v0 }
  0x66   :  { %542 = vmatpush3.bf16.msra.mxu0 %v599_v3 }
  0x67   :  { %543 = vmatprep.subr.bf16.mxu0 %v758_v0 }
  0x6a   :  { %544 = vmatpush3.bf16.msra.mxu0 %v600_v4 }
  0x6b   :  { %565 = vmatprep.subr.bf16.mxu0 %v758_v0 }
  0x6d   :  { %546 = vmatmul.mubr.msk.bf16.vlgmr.msra.gmra.mrb[0].mxu0 %vm128_vm1, %v88_v7 }
  0x6e   :  { %569 = vmatprep.mubr.msk.bf16.mxu0 %vm759_vm0, %v758_v0  ;;  %566 = vmatpush3.bf16.msra.mxu0 %v604_v10 }
  0x6f   :  { %567 = vmatprep.subr.bf16.mxu0 %v758_v0 }
  0x72   :  { %568 = vmatpush3.bf16.msra.mxu0 %v606_v11 }
 0x140   :  { %v166_v13 = vpop.f32.mrb[0].mxu0 }
 0x141   :  { %v167_v14 = vadd.f32 %v498_v12, %v166_v13  ;;  %v547_v15 = vpop.f32.mrb[1].mxu0 }
 0x142   :  { %v169_v16 = vpop.f32.mrb[2].mxu0 }
 0x143   :  { %v170_v17 = vadd.f32 %v498_v12, %v169_v16  ;;  %v548_v18 = vpop.f32.mrb[3].mxu0  ;;  %v173_v19 = vmax.f32 %v167_v14, 0.0 }
 0x145   :  { %v174_v20 = vmax.f32 %v170_v17, 0.0 }
 0x147   :  { %v175_v21 = vpack.c.bf16 %v174_v20, %v173_v19 }
 0x149   :  { %325 = vrot.lane.b32.xlu1 %v175_v21, %s750_s28  ;;  %255 = vrot.lane.b32.xlu0 %v175_v21, %s760_s4 }
 0x14a   :  { %554 = vmatmul.mubr.msk.bf16.vlgmr.msra.gmra.mrb[0].mxu1 %vm197_vm2, %v175_v21 }
 0x14b   :  { %558 = vmatpush3.bf16.msra.mxu1 %v603_v22  ;;  %561 = vmatprep.mubr.msk.bf16.mxu1 %vm759_vm0, %v758_v0 }
 0x14c   :  { %559 = vmatprep.subr.bf16.mxu1 %v758_v0 }
 0x14d   :  { %395 = vrot.lane.b32.xlu0 %v175_v21, %s761_s29 }
 0x14f   :  { %560 = vmatpush3.bf16.msra.mxu1 %v605_v23 }
 0x150   :  { %573 = vmatprep.subr.bf16.mxu1 %v758_v0 }
 0x1bb   :  { %v326_v25 = vpop.permute.xlu1 %325  ;;  %v256_v26 = vpop.permute.xlu0 %255 }
 0x1bc   :  { %562 = vmatmul.mubr.msk.bf16.vlgmr.msra.gmra.mrb[4].mxu1 %vm197_vm2, %v256_v26  ;;  %570 = vmatmul.mubr.msk.bf16.vlgmr.msra.gmra.mrb[4].mxu0 %vm197_vm2, %v326_v25 }
 0x1bd   :  { %574 = vmatpush3.bf16.msra.mxu1 %v607_v24  ;;  %577 = vmatprep.mubr.msk.bf16.mxu1 %vm759_vm0, %v758_v0 }
 0x1be   :  { %575 = vmatprep.subr.bf16.mxu1 %v758_v0 }
 0x1bf   :  { %v396_v28 = vpop.permute.xlu0 %395 }
 0x1c1   :  { %576 = vmatpush3.bf16.msra.mxu1 %v608_v27 }
 0x1c4   :  { %578 = vmatmul.mubr.msk.bf16.vlgmr.msra.gmra.mrb[8].mxu1 %vm197_vm2, %v396_v28 }
 0x21d   :  { %v235_v29 = vpop.f32.mrb[0].mxu1 }
 0x21e   :  { %v555_v30 = vpop.f32.mrb[1].mxu1  ;;  %v236_v56 = vadd.f32 %v504_v55, %v235_v29 }
 0x21f   :  { %v238_v31 = vpop.f32.mrb[2].mxu1 }
 0x220   :  { %v556_v32 = vpop.f32.mrb[3].mxu1  ;;  %v239_v57 = vadd.f32 %v504_v55, %v238_v31  ;;  %v242_v58 = vmax.f32 %v236_v56, 0.0 }
 0x222   :  { %v243_v61 = vmax.f32 %v239_v57, 0.0 }
 0x28f   :  { %v306_v34 = vpop.f32.mrb[4].mxu1  ;;  %v376_v35 = vpop.f32.mrb[4].mxu0 }
 0x290   :  { %v307_v36 = vadd.f32 %v508_v33, %v306_v34  ;;  %v563_v37 = vpop.f32.mrb[5].mxu1  ;;  %v571_v38 = vpop.f32.mrb[5].mxu0  ;;  %v377_v0 = vadd.f32 %v512_v59, %v376_v35 }
 0x291   :  { %v309_v39 = vpop.f32.mrb[6].mxu1  ;;  %v379_v40 = vpop.f32.mrb[6].mxu0 }
 0x292   :  { %v313_v41 = vmax.f32 %v307_v36, 0.0  ;;  %v310_v42 = vadd.f32 %v508_v33, %v309_v39  ;;  %v564_v43 = vpop.f32.mrb[7].mxu1  ;;  %v572_v44 = vpop.f32.mrb[7].mxu0  ;;  %v380_v2 = vadd.f32 %v512_v59, %v379_v40  ;;  %v383_v3 = vmax.f32 %v377_v0, 0.0 }
 0x294   :  { %v314_v45 = vmax.f32 %v310_v42, 0.0  ;;  %457 = vrot.lane.b32.xlu1 %v313_v41, %s750_s28  ;;  %v384_v5 = vmax.f32 %v380_v2, 0.0 }
 0x296   :  { %459 = vrot.lane.b32.xlu0 %v314_v45, %s750_s28 }
 0x297   :  { %v446_v47 = vpop.f32.mrb[8].mxu1 }
 0x298   :  { %v447_v48 = vadd.f32 %v516_v46, %v446_v47  ;;  %v579_v49 = vpop.f32.mrb[9].mxu1 }
 0x299   :  { %v449_v50 = vpop.f32.mrb[10].mxu1 }
 0x29a   :  { %v453_v51 = vmax.f32 %v447_v48, 0.0  ;;  %v450_v52 = vadd.f32 %v516_v46, %v449_v50  ;;  %v580_v53 = vpop.f32.mrb[11].mxu1 }
 0x29c   :  { %v454_v54 = vmax.f32 %v450_v52, 0.0  ;;  %465 = vrot.lane.b32.xlu1 %v453_v51, %s750_s28 }
 0x29e   :  { %467 = vrot.lane.b32.xlu0 %v454_v54, %s750_s28  ;;  %s719_s28 = scalar_lea.vmem %s485_s6, 512 }
 0x29f   :  { %p720_p12 = scmp.ne.s32.totalorder %s485_s6, %s719_s28  ;;  %p725_p0 = scmp.lt.s32.totalorder %s719_s28, %s719_s28 }
 0x2a1   :  { %p726_p1 = por %p725_p0, %p724_p13 }
 0x2a3   :  { %p727_p2 = pnand %p726_p1, %p720_p12 }
 0x306   :  { %v458_v60 = vpop.permute.xlu1 %457 }
 0x307   :  { %v471_v62 = vsel %vm128_vm1, %v242_v58, %v458_v60 }
 0x308   :  { %475 = vst [vmem:[#allocation11] sm:$0xff] %v471_v62  ;;  %v460_v63 = vpop.permute.xlu0 %459 }
 0x309   :  { %v472_v1 = vsel %vm128_vm1, %v243_v61, %v460_v63 }
 0x30a   :  { %477 = vst [vmem:[#allocation11 + $0x10] sm:$0xff] %v472_v1 }
 0x30e   :  { %v466_v4 = vpop.permute.xlu1 %465 }
 0x30f   :  { %v473_v6 = vsel %vm128_vm1, %v383_v3, %v466_v4 }
 0x310   :  { %476 = vst [vmem:[#allocation11 + $0x8] sm:$0xff] %v473_v6  ;;  %v468_v7 = vpop.permute.xlu0 %467 }
 0x311   :  { %v474_v8 = vsel %vm128_vm1, %v384_v5, %v468_v7 }
 0x312   :  { %478 = vst [vmem:[#allocation11 + $0x18] sm:$0xff] %v474_v8 }
 0x313   :  { %730 = shalt.err (!%p727_p2)
}
 0x314   :  { %s731_s9 = scalar_lea.hbm %s912_s5, 512 }
 0x315   :  { %p732_p3 = scmp.ne.s32.totalorder %s912_s5, %s731_s9  ;;  %p735_p4 = scmp.lt.u32.totalorder %s731_s9, %s912_s5 }
 0x317   :  { %p737_p5 = pnand %p735_p4, %p732_p3 }
 0x319   :  { %740 = shalt.err (!%p737_p5)
}
 0x31a   :  { %s763_s15 = smov 256   ;;  %s764_s16 = smov 16  }
 0x31b   :  { %490 = dma.vmem_to_hbm [thread:$0]  %s485_s6, 512, %s912_s5, [#allocation4], %s763_s15, %s763_s15, %s764_s16  }
 0x31c   :  { %747 = dma.done.wait [#allocation4], 512  }
 0x31d   :  { %748 = vsyncadd [#allocation4], 4294966784 }
 0x31e   :  { %494 = vsyncpa [#allocation3], 1 }
 0x31f   :  { %495 = vsyncpa [#allocation6], 1 }
 0x320   :  { %496 = vsyncpa [#allocation9], 1 }
 0x321   :  { %497 = vsyncpa [#allocation4], 1 }

// kernel: _lambda_.8
= control target key start
LH: loop header
LB: loop body
LE: loop exit
PB: predicated region body
PF: predicated region fallthrough
CT: control target
= control target key end

     0   :  { %7 = vsyncpa [#allocation5], 0  ;;  %s8325_s0 = inlined_call_operand.hbm [shape: f32[8,8,2,64], index: 0, kind: input, shape index: {}]   ;;  %s8326_s1 = inlined_call_operand.hbm [shape: bf16[8,16,64], index: 1, kind: input, shape index: {}]   ;;  %s8327_s2 = inlined_call_operand.hbm [shape: f32[8,8,2,16], index: 2, kind: output, shape index: {}]  }
   0x1   :  { %8 = vsyncpa [#allocation8], 0 }
   0x2   :  { %9 = vsyncpa [#allocation6], 0  ;;  %s6501_s9 = smov [#allocation4]   ;;  %s6429_s13 = scalar_lea.hbm %s8325_s0, 2048 }
   0x3   :  { %s15_s10 = sshll.u32 %s6501_s9, 4  ;;  %p6430_p0 = scmp.ne.s32.totalorder %s8325_s0, %s6429_s13  ;;  %s16_s10 = int_to_ptr.vmem [resolvable:$true] %s15_s10 }
   0x4   :  { %p6433_p1 = scmp.lt.u32.totalorder %s6429_s13, %s8325_s0 }
   0x6   :  { %p6435_p2 = pnand %p6433_p1, %p6430_p0 }
   0x8   :  { %6438 = shalt.err (!%p6435_p2)
}
   0x9   :  { %s6439_s18 = scalar_lea.vmem %s16_s10, 2048  ;;  %p6444_p4 = scmp.lt.s32.totalorder %s16_s10, %s16_s10 }
   0xa   :  { %p6440_p3 = scmp.ne.s32.totalorder %s16_s10, %s6439_s18  ;;  %p6445_p5 = scmp.lt.s32.totalorder %s6439_s18, %s6439_s18 }
   0xc   :  { %p6446_p6 = por %p6445_p5, %p6444_p4 }
   0xe   :  { %p6447_p7 = pnand %p6446_p6, %p6440_p3 }
  0x10   :  { %6450 = shalt.err (!%p6447_p7)
}
  0x11   :  { %s6502_s19 = smov 32   ;;  %s6503_s20 = smov 2  }
  0x12   :  { %21 = dma.hbm_to_vmem [thread:$0]  %s8325_s0, 2048, %s16_s10, [#allocation5], %s6502_s19, %s6502_s19, %s6503_s20  }
  0x13   :  { %s6504_s23 = smov [#allocation7]   ;;  %s6451_s27 = scalar_lea.hbm %s8326_s1, 1024 }
  0x14   :  { %s27_s24 = sshll.u32 %s6504_s23, 4  ;;  %p6452_p8 = scmp.ne.s32.totalorder %s8326_s1, %s6451_s27  ;;  %s28_s24 = int_to_ptr.vmem [resolvable:$true] %s27_s24 }
  0x15   :  { %p6455_p9 = scmp.lt.u32.totalorder %s6451_s27, %s8326_s1 }
  0x17   :  { %p6457_p10 = pnand %p6455_p9, %p6452_p8 }
  0x19   :  { %6460 = shalt.err (!%p6457_p10)
}
  0x1a   :  { %s6461_s4 = scalar_lea.vmem %s28_s24, 1024  ;;  %p6466_p12 = scmp.lt.s32.totalorder %s28_s24, %s28_s24 }
  0x1b   :  { %p6462_p11 = scmp.ne.s32.totalorder %s28_s24, %s6461_s4  ;;  %p6467_p13 = scmp.lt.s32.totalorder %s6461_s4, %s6461_s4 }
  0x1d   :  { %p6468_p0 = por %p6467_p13, %p6466_p12 }
  0x1f   :  { %p6469_p1 = pnand %p6468_p0, %p6462_p11 }
  0x21   :  { %6472 = shalt.err (!%p6469_p1)
}
  0x22   :  { %s6505_s0 = smov 64   ;;  %s6506_s5 = smov 4  }
  0x23   :  { %33 = dma.hbm_to_vmem [thread:$0]  %s8326_s1, 1024, %s28_s24, [#allocation8], %s6505_s0, %s6505_s0, %s6506_s5  }
  0x24   :  { %6495 = dma.done.wait [#allocation5], 2048  }
  0x25   :  { %6496 = vsyncadd [#allocation5], 4294965248 }
  0x26   :  { %6497 = dma.done.wait [#allocation8], 1024  }
  0x27   :  { %6498 = vsyncadd [#allocation8], 4294966272  ;;  %vm45_vm0 = vcmask 123904   ;;  %v8328_v0 = vmov 0.0   ;;  %vm6508_vm1 = vmmov 0   ;;  %v6594_v1 = vld [vmem:[#allocation7] sm:$0xff]  }
  0x28   :  { %5488 = vmatprep.subr.bf16.mxu0 %v8328_v0  ;;  %5494 = vmatprep.subr.bf16.mxu1 %v8328_v0  ;;  %46 = vst.msk [vmem:[#allocation2] sm:$0x3] %vm45_vm0, %v8328_v0  ;;  %47 = vst.msk [vmem:[#allocation2 + $0x2] sm:$0x3] %vm45_vm0, %v8328_v0  ;;  %v6596_v2 = vld [vmem:[#allocation7 + $0x8] sm:$0xff]   ;;  %vm116_vm2 = vcmask 130048  }
  0x29   :  { %48 = vst.msk [vmem:[#allocation2 + $0x4] sm:$0x3] %vm45_vm0, %v8328_v0  ;;  %49 = vst.msk [vmem:[#allocation2 + $0x6] sm:$0x3] %vm45_vm0, %v8328_v0  ;;  %5490 = vmatprep.mubr.msk.bf16.mxu0 %vm6508_vm1, %v8328_v0  ;;  %5496 = vmatprep.mubr.msk.bf16.mxu1 %vm6508_vm1, %v8328_v0  ;;  %v6601_v7 = vld [vmem:[#allocation7 + $0x10] sm:$0xff]   ;;  %v6604_v8 = vld [vmem:[#allocation7 + $0x18] sm:$0xff]  }
  0x2a   :  { %50 = vst.msk [vmem:[#allocation2 + $0x8] sm:$0x3] %vm45_vm0, %v8328_v0  ;;  %51 = vst.msk [vmem:[#allocation2 + $0xa] sm:$0x3] %vm45_vm0, %v8328_v0  ;;  %5489 = vmatpush3.bf16.msra.mxu0 %v6594_v1  ;;  %5495 = vmatpush3.bf16.msra.mxu1 %v6596_v2  ;;  %v6616_v13 = vld [vmem:[#allocation7 + $0x20] sm:$0xff]   ;;  %v6618_v14 = vld [vmem:[#allocation7 + $0x28] sm:$0xff]  }
  0x2b   :  { %52 = vst.msk [vmem:[#allocation2 + $0xc] sm:$0x3] %vm45_vm0, %v8328_v0  ;;  %53 = vst.msk [vmem:[#allocation2 + $0xe] sm:$0x3] %vm45_vm0, %v8328_v0  ;;  %5500 = vmatprep.subr.bf16.mxu0 %v8328_v0  ;;  %5506 = vmatprep.subr.bf16.mxu1 %v8328_v0  ;;  %v6630_v19 = vld [vmem:[#allocation7 + $0x30] sm:$0xff]   ;;  %v6632_v20 = vld [vmem:[#allocation7 + $0x38] sm:$0xff]  }
  0x2c   :  { %54 = vst.msk [vmem:[#allocation3] sm:$0x3] %vm45_vm0, %v8328_v0  ;;  %55 = vst.msk [vmem:[#allocation3 + $0x2] sm:$0x3] %vm45_vm0, %v8328_v0  ;;  %v94_v25 = vld [vmem:[#allocation4] sm:$0x3] }
  0x2d   :  { %56 = vst.msk [vmem:[#allocation3 + $0x4] sm:$0x3] %vm45_vm0, %v8328_v0  ;;  %57 = vst.msk [vmem:[#allocation3 + $0x6] sm:$0x3] %vm45_vm0, %v8328_v0  ;;  %v95_v26 = vld [vmem:[#allocation4 + $0x2] sm:$0x3] }
  0x2e   :  { %58 = vst.msk [vmem:[#allocation3 + $0x8] sm:$0x3] %vm45_vm0, %v8328_v0  ;;  %59 = vst.msk [vmem:[#allocation3 + $0xa] sm:$0x3] %vm45_vm0, %v8328_v0  ;;  %v96_v37 = vld [vmem:[#allocation4 + $0x4] sm:$0x3] }
  0x2f   :  { %60 = vst.msk [vmem:[#allocation3 + $0xc] sm:$0x3] %vm45_vm0, %v8328_v0  ;;  %61 = vst.msk [vmem:[#allocation3 + $0xe] sm:$0x3] %vm45_vm0, %v8328_v0  ;;  %v78_v3 = vld [vmem:[#allocation2] sm:$0x3] }
  0x30   :  { %v79_v4 = vld [vmem:[#allocation2 + $0x2] sm:$0x3]  ;;  %v102_v5 = vpack.c.bf16 %v78_v3, %v78_v3  ;;  %v80_v9 = vld [vmem:[#allocation2 + $0x4] sm:$0x3]  ;;  %v81_v10 = vld [vmem:[#allocation2 + $0x6] sm:$0x3] }
  0x31   :  { %v103_v6 = vpack.c.bf16 %v79_v4, %v79_v4  ;;  %v104_v11 = vpack.c.bf16 %v80_v9, %v80_v9  ;;  %v105_v12 = vpack.c.bf16 %v81_v10, %v81_v10  ;;  %v82_v15 = vld [vmem:[#allocation2 + $0x8] sm:$0x3]  ;;  %v83_v16 = vld [vmem:[#allocation2 + $0xa] sm:$0x3]  ;;  %v97_v38 = vld [vmem:[#allocation4 + $0x6] sm:$0x3] }
  0x32   :  { %5491 = vmatmul.mubr.msk.bf16.vlgmr.msra.gmra.mrb[0].mxu0 %vm116_vm2, %v102_v5  ;;  %v106_v17 = vpack.c.bf16 %v82_v15, %v82_v15  ;;  %v107_v18 = vpack.c.bf16 %v83_v16, %v83_v16  ;;  %v84_v21 = vld [vmem:[#allocation2 + $0xc] sm:$0x3]  ;;  %v85_v22 = vld [vmem:[#allocation2 + $0xe] sm:$0x3]  ;;  %s6509_s1 = smov 96   ;;  %s6510_s8 = smov 16  }
  0x33   :  { %5497 = vmatmul.mubr.msk.bf16.vlgmr.msra.gmra.mrb[0].mxu1 %vm116_vm2, %v103_v6  ;;  %5501 = vmatpush3.bf16.msra.mxu0 %v6601_v7  ;;  %v108_v23 = vpack.c.bf16 %v84_v21, %v84_v21  ;;  %v109_v24 = vpack.c.bf16 %v85_v22, %v85_v22  ;;  %v98_v50 = vld [vmem:[#allocation4 + $0x8] sm:$0x3]  ;;  %v99_v53 = vld [vmem:[#allocation4 + $0xa] sm:$0x3]  ;;  %v100_v3 = vld [vmem:[#allocation4 + $0xc] sm:$0x3] }
  0x34   :  { %5507 = vmatpush3.bf16.msra.mxu1 %v6604_v8  ;;  %5502 = vmatprep.mubr.msk.bf16.mxu0 %vm6508_vm1, %v8328_v0  ;;  %v101_v6 = vld [vmem:[#allocation4 + $0xe] sm:$0x3]  ;;  %s6511_s9 = smov 80   ;;  %s6512_s10 = smov 112  }
  0x35   :  { %5508 = vmatprep.mubr.msk.bf16.mxu1 %vm6508_vm1, %v8328_v0  ;;  %5512 = vmatprep.subr.bf16.mxu0 %v8328_v0  ;;  %s6513_s11 = smov [#allocation9]  }
  0x36   :  { %5518 = vmatprep.subr.bf16.mxu1 %v8328_v0  ;;  %s5211_s12 = sshll.u32 %s6513_s11, 4  ;;  %s5212_s12 = int_to_ptr.vmem [resolvable:$true] %s5211_s12 }
  0x37   :  { %s6473_s13 = scalar_lea.vmem %s5212_s12, 2048  ;;  %p6478_p3 = scmp.lt.s32.totalorder %s5212_s12, %s5212_s12 }
  0x38   :  { %p6474_p2 = scmp.ne.s32.totalorder %s5212_s12, %s6473_s13  ;;  %p6479_p4 = scmp.lt.s32.totalorder %s6473_s13, %s6473_s13 }
  0x3a   :  { %5503 = vmatmul.mubr.msk.bf16.vlgmr.msra.gmra.mrb[4].mxu0 %vm116_vm2, %v104_v11  ;;  %p6480_p5 = por %p6479_p4, %p6478_p3 }
  0x3b   :  { %5509 = vmatmul.mubr.msk.bf16.vlgmr.msra.gmra.mrb[4].mxu1 %vm116_vm2, %v105_v12  ;;  %5513 = vmatpush3.bf16.msra.mxu0 %v6616_v13 }
  0x3c   :  { %5519 = vmatpush3.bf16.msra.mxu1 %v6618_v14  ;;  %5514 = vmatprep.mubr.msk.bf16.mxu0 %vm6508_vm1, %v8328_v0  ;;  %p6481_p6 = pnand %p6480_p5, %p6474_p2 }
  0x3d   :  { %5520 = vmatprep.mubr.msk.bf16.mxu1 %vm6508_vm1, %v8328_v0  ;;  %5524 = vmatprep.subr.bf16.mxu0 %v8328_v0 }
  0x3e   :  { %5530 = vmatprep.subr.bf16.mxu1 %v8328_v0 }
  0x42   :  { %5515 = vmatmul.mubr.msk.bf16.vlgmr.msra.gmra.mrb[8].mxu0 %vm116_vm2, %v106_v17 }
  0x43   :  { %5521 = vmatmul.mubr.msk.bf16.vlgmr.msra.gmra.mrb[8].mxu1 %vm116_vm2, %v107_v18  ;;  %5525 = vmatpush3.bf16.msra.mxu0 %v6630_v19 }
  0x44   :  { %5531 = vmatpush3.bf16.msra.mxu1 %v6632_v20  ;;  %5526 = vmatprep.mubr.msk.bf16.mxu0 %vm6508_vm1, %v8328_v0 }
  0x45   :  { %5532 = vmatprep.mubr.msk.bf16.mxu1 %vm6508_vm1, %v8328_v0  ;;  %5536 = vmatprep.subr.bf16.mxu0 %v8328_v0 }
  0x46   :  { %5542 = vmatprep.subr.bf16.mxu1 %v8328_v0 }
  0x4a   :  { %5527 = vmatmul.mubr.msk.bf16.vlgmr.msra.gmra.mrb[12].mxu0 %vm116_vm2, %v108_v23 }
  0x4b   :  { %5533 = vmatmul.mubr.msk.bf16.vlgmr.msra.gmra.mrb[12].mxu1 %vm116_vm2, %v109_v24  ;;  %5537 = vmatpush3.bf16.msra.mxu0 %v6594_v1 }
  0x4c   :  { %5543 = vmatpush3.bf16.msra.mxu1 %v6596_v2  ;;  %5538 = vmatprep.mubr.msk.bf16.mxu0 %vm6508_vm1, %v8328_v0 }
  0x4d   :  { %5544 = vmatprep.mubr.msk.bf16.mxu1 %vm6508_vm1, %v8328_v0  ;;  %5548 = vmatprep.subr.bf16.mxu0 %v8328_v0 }
  0x4e   :  { %5554 = vmatprep.subr.bf16.mxu1 %v8328_v0 }
 0x105   :  { %v154_v27 = vpop.f32.mrb[0].mxu0 }
 0x106   :  { %v6654_v28 = vadd.f32 %v154_v27, %v94_v25  ;;  %v5492_v29 = vpop.f32.mrb[1].mxu0  ;;  %v203_v30 = vpop.f32.mrb[0].mxu1  ;;  %v86_v25 = vld [vmem:[#allocation3] sm:$0x3]  ;;  %v87_v27 = vld [vmem:[#allocation3 + $0x2] sm:$0x3] }
 0x107   :  { %v157_v31 = vpop.f32.mrb[2].mxu0  ;;  %v6656_v32 = vadd.f32 %v203_v30, %v95_v26  ;;  %v5498_v33 = vpop.f32.mrb[1].mxu1 }
 0x108   :  { %5893 = vtanh.f32 %v6654_v28  ;;  %v5493_v34 = vpop.f32.mrb[3].mxu0  ;;  %v206_v35 = vpop.f32.mrb[2].mxu1  ;;  %v5240_v29 = vmul.f32 -1.442695, %v6654_v28 }
 0x109   :  { %v5499_v36 = vpop.f32.mrb[3].mxu1  ;;  %5895 = vtanh.f32 %v6656_v32  ;;  %v5241_v30 = vmul.f32 -1.442695, %v6656_v32 }
 0x10d   :  { %v252_v39 = vpop.f32.mrb[4].mxu0 }
 0x10e   :  { %v6660_v40 = vadd.f32 %v252_v39, %v96_v37  ;;  %v5504_v41 = vpop.f32.mrb[5].mxu0  ;;  %v301_v42 = vpop.f32.mrb[4].mxu1 }
 0x10f   :  { %v255_v43 = vpop.f32.mrb[6].mxu0  ;;  %v506_v44 = vadd.f32 %v301_v42, %v97_v38  ;;  %v5510_v45 = vpop.f32.mrb[5].mxu1 }
 0x110   :  { %5897 = vtanh.f32 %v6660_v40  ;;  %v5505_v46 = vpop.f32.mrb[7].mxu0  ;;  %v304_v47 = vpop.f32.mrb[6].mxu1  ;;  %v5242_v31 = vmul.f32 -1.442695, %v6660_v40 }
 0x111   :  { %v5511_v48 = vpop.f32.mrb[7].mxu1  ;;  %5899 = vtanh.f32 %v506_v44  ;;  %v5243_v33 = vmul.f32 -1.442695, %v506_v44 }
 0x112   :  { %v5894_v49 = vpop.eup %5893 }
 0x113   :  { %615 = vrot.lane.b32.xlu0 %v5894_v49, %s6509_s1  ;;  %v5896_v51 = vpop.eup %5895 }
 0x115   :  { %v350_v52 = vpop.f32.mrb[8].mxu0 }
 0x116   :  { %v507_v54 = vadd.f32 %v350_v52, %v98_v50  ;;  %v399_v55 = vpop.f32.mrb[8].mxu1  ;;  %v5516_v56 = vpop.f32.mrb[9].mxu0  ;;  %v88_v52 = vld [vmem:[#allocation3 + $0x4] sm:$0x3] }
 0x117   :  { %617 = vrot.lane.b32.xlu0 %v5896_v51, %s6509_s1  ;;  %v5522_v57 = vpop.f32.mrb[9].mxu1  ;;  %v353_v58 = vpop.f32.mrb[10].mxu0  ;;  %v508_v59 = vadd.f32 %v399_v55, %v99_v53 }
 0x118   :  { %v402_v60 = vpop.f32.mrb[10].mxu1  ;;  %v5517_v61 = vpop.f32.mrb[11].mxu0  ;;  %5901 = vtanh.f32 %v507_v54  ;;  %v5244_v36 = vmul.f32 -1.442695, %v507_v54  ;;  %v89_v58 = vld [vmem:[#allocation3 + $0x6] sm:$0x3] }
 0x119   :  { %v5523_v62 = vpop.f32.mrb[11].mxu1  ;;  %5903 = vtanh.f32 %v508_v59  ;;  %v5245_v38 = vmul.f32 -1.442695, %v508_v59 }
 0x11a   :  { %v5898_v63 = vpop.eup %5897 }
 0x11b   :  { %619 = vrot.lane.b32.xlu1 %v5898_v63, %s6509_s1  ;;  %v5900_v4 = vpop.eup %5899 }
 0x11d   :  { %v448_v5 = vpop.f32.mrb[12].mxu0 }
 0x11e   :  { %v509_v9 = vadd.f32 %v448_v5, %v100_v3  ;;  %v497_v10 = vpop.f32.mrb[12].mxu1  ;;  %v5528_v11 = vpop.f32.mrb[13].mxu0  ;;  %v90_v3 = vld [vmem:[#allocation3 + $0x8] sm:$0x3] }
 0x11f   :  { %621 = vrot.lane.b32.xlu1 %v5900_v4, %s6509_s1  ;;  %v5534_v12 = vpop.f32.mrb[13].mxu1  ;;  %v451_v15 = vpop.f32.mrb[14].mxu0  ;;  %v510_v16 = vadd.f32 %v497_v10, %v101_v6  ;;  %v91_v6 = vld [vmem:[#allocation3 + $0xa] sm:$0x3] }
 0x120   :  { %v500_v17 = vpop.f32.mrb[14].mxu1  ;;  %v5529_v18 = vpop.f32.mrb[15].mxu0  ;;  %5905 = vtanh.f32 %v509_v9  ;;  %v5246_v28 = vmul.f32 -1.442695, %v509_v9 }
 0x121   :  { %v5535_v21 = vpop.f32.mrb[15].mxu1  ;;  %5907 = vtanh.f32 %v510_v16  ;;  %v5247_v40 = vmul.f32 -1.442695, %v510_v16  ;;  %v92_v17 = vld [vmem:[#allocation3 + $0xc] sm:$0x3] }
 0x122   :  { %v5902_v22 = vpop.eup %5901  ;;  %5909 = vpow2.f32 %v5240_v29  ;;  %v93_v18 = vld [vmem:[#allocation3 + $0xe] sm:$0x3] }
 0x123   :  { %623 = vrot.lane.b32.xlu0 %v5902_v22, %s6509_s1  ;;  %v5904_v23 = vpop.eup %5903  ;;  %5911 = vpow2.f32 %v5241_v30 }
 0x124   :  { %625 = vrot.lane.b32.xlu1 %v5904_v23, %s6509_s1  ;;  %5913 = vpow2.f32 %v5242_v31 }
 0x125   :  { %5915 = vpow2.f32 %v5243_v33 }
 0x12a   :  { %v5906_v24 = vpop.eup %5905 }
 0x12b   :  { %627 = vrot.lane.b32.xlu0 %v5906_v24, %s6509_s1  ;;  %v5908_v26 = vpop.eup %5907 }
 0x12c   :  { %629 = vrot.lane.b32.xlu1 %v5908_v26, %s6509_s1  ;;  %v5910_v34 = vpop.eup %5909 }
 0x12d   :  { %v535_v35 = vadd.f32 1.0, %v5910_v34  ;;  %v5912_v37 = vpop.eup %5911 }
 0x12e   :  { %v5914_v39 = vpop.eup %5913  ;;  %v536_v41 = vadd.f32 1.0, %v5912_v37 }
 0x12f   :  { %575 = vrot.lane.b32.xlu0 %v86_v25, %s6510_s8  ;;  %5917 = vrcp.f32 %v535_v35  ;;  %v537_v42 = vadd.f32 1.0, %v5914_v39  ;;  %v5916_v32 = vpop.eup %5915 }
 0x130   :  { %577 = vrot.lane.b32.xlu1 %v87_v27, %s6510_s8  ;;  %5919 = vpow2.f32 %v5244_v36  ;;  %v538_v43 = vadd.f32 1.0, %v5916_v32 }
 0x131   :  { %5921 = vpow2.f32 %v5245_v38 }
 0x132   :  { %5923 = vrcp.f32 %v536_v41 }
 0x133   :  { %5925 = vrcp.f32 %v537_v42 }
 0x134   :  { %5927 = vpow2.f32 %v5246_v28 }
 0x135   :  { %5929 = vpow2.f32 %v5247_v40 }
 0x136   :  { %5931 = vrcp.f32 %v538_v43 }
 0x139   :  { %v6676_v44 = vpop.eup %5917 }
 0x13a   :  { %v5920_v45 = vpop.eup %5919 }
 0x13b   :  { %v5922_v48 = vpop.eup %5921  ;;  %v539_v49 = vadd.f32 1.0, %v5920_v45 }
 0x13c   :  { %v6680_v50 = vpop.eup %5923  ;;  %v540_v54 = vadd.f32 1.0, %v5922_v48 }
 0x13d   :  { %v6683_v55 = vpop.eup %5925  ;;  %5933 = vrcp.f32 %v539_v49 }
 0x13e   :  { %v5928_v56 = vpop.eup %5927  ;;  %5935 = vrcp.f32 %v540_v54 }
 0x13f   :  { %v5930_v60 = vpop.eup %5929  ;;  %v541_v61 = vadd.f32 1.0, %v5928_v56 }
 0x140   :  { %v6690_v62 = vpop.eup %5931  ;;  %v542_v5 = vadd.f32 1.0, %v5930_v60 }
 0x141   :  { %5937 = vrcp.f32 %v541_v61 }
 0x142   :  { %5939 = vrcp.f32 %v542_v5 }
 0x147   :  { %v6695_v9 = vpop.eup %5933 }
 0x148   :  { %v6699_v12 = vpop.eup %5935 }
 0x14b   :  { %v6705_v21 = vpop.eup %5937 }
 0x14c   :  { %v6709_v24 = vpop.eup %5939 }
 0x185   :  { %v616_v46 = vpop.permute.xlu0 %615 }
 0x186   :  { %v639_v47 = vmul.f32 %v6676_v44, %v616_v46 }
 0x188   :  { %655 = vrot.lane.b32.xlu0 %v639_v47, %s6510_s8 }
 0x189   :  { %v618_v51 = vpop.permute.xlu0 %617 }
 0x18a   :  { %v640_v53 = vmul.f32 %v6680_v50, %v618_v51 }
 0x18c   :  { %657 = vrot.lane.b32.xlu1 %v640_v53, %s6510_s8  ;;  %579 = vrot.lane.b32.xlu0 %v88_v52, %s6510_s8 }
 0x18d   :  { %v620_v57 = vpop.permute.xlu1 %619 }
 0x18e   :  { %v641_v59 = vmul.f32 %v6683_v55, %v620_v57 }
 0x190   :  { %581 = vrot.lane.b32.xlu1 %v89_v58, %s6510_s8  ;;  %659 = vrot.lane.b32.xlu0 %v641_v59, %s6510_s8 }
 0x191   :  { %v622_v63 = vpop.permute.xlu1 %621 }
 0x192   :  { %v642_v4 = vmul.f32 %v6690_v62, %v622_v63 }
 0x194   :  { %661 = vrot.lane.b32.xlu1 %v642_v4, %s6510_s8  ;;  %583 = vrot.lane.b32.xlu0 %v90_v3, %s6510_s8 }
 0x195   :  { %v624_v10 = vpop.permute.xlu0 %623 }
 0x196   :  { %v643_v11 = vmul.f32 %v6695_v9, %v624_v10  ;;  %v626_v15 = vpop.permute.xlu1 %625 }
 0x197   :  { %v644_v16 = vmul.f32 %v6699_v12, %v626_v15 }
 0x198   :  { %585 = vrot.lane.b32.xlu1 %v91_v6, %s6510_s8  ;;  %663 = vrot.lane.b32.xlu0 %v643_v11, %s6510_s8 }
 0x19c   :  { %665 = vrot.lane.b32.xlu1 %v644_v16, %s6510_s8  ;;  %587 = vrot.lane.b32.xlu0 %v92_v17, %s6510_s8 }
 0x19d   :  { %v628_v22 = vpop.permute.xlu0 %627 }
 0x19e   :  { %v645_v23 = vmul.f32 %v6705_v21, %v628_v22  ;;  %v630_v25 = vpop.permute.xlu1 %629 }
 0x19f   :  { %v646_v26 = vmul.f32 %v6709_v24, %v630_v25 }
 0x1a0   :  { %589 = vrot.lane.b32.xlu1 %v93_v18, %s6510_s8  ;;  %667 = vrot.lane.b32.xlu0 %v645_v23, %s6510_s8 }
 0x1a1   :  { %v576_v27 = vpop.permute.xlu0 %575 }
 0x1a2   :  { %v599_v29 = vmul.f32 %v6676_v44, %v576_v27  ;;  %v578_v30 = vpop.permute.xlu1 %577 }
 0x1a3   :  { %v600_v34 = vmul.f32 %v6680_v50, %v578_v30 }
 0x1a4   :  { %669 = vrot.lane.b32.xlu1 %v646_v26, %s6510_s8 }
 0x1fa   :  { %v656_v31 = vpop.permute.xlu0 %655 }
 0x1fb   :  { %v6715_v33 = vadd.f32 %v656_v31, %v599_v29 }
 0x1fd   :  { %5941 = vtanh.f32 %v6715_v33 }
 0x1fe   :  { %v658_v35 = vpop.permute.xlu1 %657  ;;  %v580_v36 = vpop.permute.xlu0 %579 }
 0x1ff   :  { %v6719_v37 = vadd.f32 %v658_v35, %v600_v34  ;;  %v601_v38 = vmul.f32 %v6683_v55, %v580_v36 }
 0x201   :  { %5943 = vtanh.f32 %v6719_v37 }
 0x202   :  { %v582_v39 = vpop.permute.xlu1 %581  ;;  %v660_v41 = vpop.permute.xlu0 %659 }
 0x203   :  { %v6723_v42 = vadd.f32 %v660_v41, %v601_v38  ;;  %v602_v28 = vmul.f32 %v6690_v62, %v582_v39 }
 0x205   :  { %5945 = vtanh.f32 %v6723_v42 }
 0x206   :  { %v662_v32 = vpop.permute.xlu1 %661  ;;  %v584_v40 = vpop.permute.xlu0 %583 }
 0x207   :  { %v5942_v43 = vpop.eup %5941  ;;  %v6727_v45 = vadd.f32 %v662_v32, %v602_v28  ;;  %v603_v46 = vmul.f32 %v6695_v9, %v584_v40 }
 0x208   :  { %703 = vrot.lane.b32.xlu0 %v5942_v43, %s6502_s19 }
 0x209   :  { %5947 = vtanh.f32 %v6727_v45 }
 0x20a   :  { %v586_v47 = vpop.permute.xlu1 %585  ;;  %v664_v49 = vpop.permute.xlu0 %663 }
 0x20b   :  { %v5944_v48 = vpop.eup %5943  ;;  %v6732_v51 = vadd.f32 %v664_v49, %v603_v46  ;;  %v604_v52 = vmul.f32 %v6699_v12, %v586_v47  ;;  %v778_v47 = vld [vmem:[#allocation4 + $0x12] sm:$0x3] }
 0x20c   :  { %705 = vrot.lane.b32.xlu1 %v5944_v48, %s6502_s19 }
 0x20d   :  { %5949 = vtanh.f32 %v6732_v51 }
 0x20e   :  { %v666_v53 = vpop.permute.xlu1 %665  ;;  %v588_v57 = vpop.permute.xlu0 %587 }
 0x20f   :  { %v5946_v54 = vpop.eup %5945  ;;  %v6737_v56 = vadd.f32 %v666_v53, %v604_v52  ;;  %v605_v58 = vmul.f32 %v6705_v21, %v588_v57 }
 0x210   :  { %707 = vrot.lane.b32.xlu0 %v5946_v54, %s6502_s19  ;;  %v779_v54 = vld [vmem:[#allocation4 + $0x14] sm:$0x3] }
 0x211   :  { %5951 = vtanh.f32 %v6737_v56 }
 0x212   :  { %v590_v59 = vpop.permute.xlu1 %589  ;;  %v668_v61 = vpop.permute.xlu0 %667 }
 0x213   :  { %v5948_v60 = vpop.eup %5947  ;;  %v6742_v63 = vadd.f32 %v668_v61, %v605_v58  ;;  %v606_v3 = vmul.f32 %v6709_v24, %v590_v59 }
 0x214   :  { %709 = vrot.lane.b32.xlu1 %v5948_v60, %s6502_s19 }
 0x215   :  { %5953 = vtanh.f32 %v6742_v63 }
 0x216   :  { %v670_v4 = vpop.permute.xlu1 %669 }
 0x217   :  { %v6747_v5 = vadd.f32 %v670_v4, %v606_v3  ;;  %v5950_v6 = vpop.eup %5949  ;;  %v780_v3 = vld [vmem:[#allocation4 + $0x16] sm:$0x3] }
 0x218   :  { %711 = vrot.lane.b32.xlu0 %v5950_v6, %s6502_s19 }
 0x219   :  { %5955 = vtanh.f32 %v6747_v5 }
 0x21b   :  { %v5952_v10 = vpop.eup %5951 }
 0x21c   :  { %713 = vrot.lane.b32.xlu1 %v5952_v10, %s6502_s19 }
 0x21f   :  { %v5954_v11 = vpop.eup %5953 }
 0x220   :  { %715 = vrot.lane.b32.xlu0 %v5954_v11, %s6502_s19 }
 0x223   :  { %v5956_v15 = vpop.eup %5955 }
 0x224   :  { %717 = vrot.lane.b32.xlu1 %v5956_v15, %s6502_s19 }
 0x27a   :  { %v704_v16 = vpop.permute.xlu0 %703 }
 0x27b   :  { %v6755_v17 = vmul.f32 %v6676_v44, %v704_v16 }
 0x27d   :  { %v785_v18 = vpack.c.bf16 %v6755_v17, %v6755_v17 }
 0x27e   :  { %v706_v22 = vpop.permute.xlu1 %705 }
 0x27f   :  { %v6760_v23 = vmul.f32 %v6680_v50, %v706_v22  ;;  %794 = vrot.lane.b32.xlu0 %v785_v18, %s6511_s9  ;;  %v781_v22 = vld [vmem:[#allocation4 + $0x18] sm:$0x3] }
 0x281   :  { %v786_v25 = vpack.c.bf16 %v6760_v23, %v6760_v23 }
 0x282   :  { %v708_v26 = vpop.permute.xlu0 %707 }
 0x283   :  { %v6766_v27 = vmul.f32 %v6683_v55, %v708_v26  ;;  %840 = vrot.lane.b32.xlu1 %v786_v25, %s6511_s9 }
 0x285   :  { %v787_v44 = vpack.c.bf16 %v6766_v27, %v6766_v27 }
 0x286   :  { %v710_v29 = vpop.permute.xlu1 %709 }
 0x287   :  { %v6772_v30 = vmul.f32 %v6690_v62, %v710_v29  ;;  %886 = vrot.lane.b32.xlu0 %v787_v44, %s6511_s9 }
 0x289   :  { %v788_v50 = vpack.c.bf16 %v6772_v30, %v6772_v30 }
 0x28a   :  { %v712_v31 = vpop.permute.xlu0 %711 }
 0x28b   :  { %932 = vrot.lane.b32.xlu1 %v788_v50, %s6511_s9  ;;  %v6779_v55 = vmul.f32 %v6695_v9, %v712_v31  ;;  %v782_v50 = vld [vmem:[#allocation4 + $0x1a] sm:$0x3] }
 0x28d   :  { %v789_v34 = vpack.c.bf16 %v6779_v55, %v6779_v55 }
 0x28e   :  { %v714_v35 = vpop.permute.xlu1 %713 }
 0x28f   :  { %v6784_v36 = vmul.f32 %v6699_v12, %v714_v35  ;;  %978 = vrot.lane.b32.xlu0 %v789_v34, %s6511_s9 }
 0x291   :  { %v790_v62 = vpack.c.bf16 %v6784_v36, %v6784_v36 }
 0x292   :  { %v716_v38 = vpop.permute.xlu0 %715 }
 0x293   :  { %1024 = vrot.lane.b32.xlu1 %v790_v62, %s6511_s9  ;;  %v6791_v39 = vmul.f32 %v6705_v21, %v716_v38 }
 0x295   :  { %v791_v9 = vpack.c.bf16 %v6791_v39, %v6791_v39 }
 0x296   :  { %v718_v41 = vpop.permute.xlu1 %717 }
 0x297   :  { %v6796_v28 = vmul.f32 %v6709_v24, %v718_v41  ;;  %1070 = vrot.lane.b32.xlu0 %v791_v9, %s6511_s9 }
 0x299   :  { %v792_v12 = vpack.c.bf16 %v6796_v28, %v6796_v28 }
 0x29b   :  { %1116 = vrot.lane.b32.xlu1 %v792_v12, %s6511_s9 }
 0x2f1   :  { %v795_v32 = vpop.permute.xlu0 %794 }
 0x2f2   :  { %5539 = vmatmul.mubr.msk.bf16.vlgmr.msra.gmra.mrb[16].mxu0 %vm116_vm2, %v795_v32  ;;  %v783_v32 = vld [vmem:[#allocation4 + $0x1c] sm:$0x3] }
 0x2f3   :  { %5549 = vmatpush3.bf16.msra.mxu0 %v6601_v7  ;;  %5550 = vmatprep.mubr.msk.bf16.mxu0 %vm6508_vm1, %v8328_v0 }
 0x2f4   :  { %5560 = vmatprep.subr.bf16.mxu0 %v8328_v0 }
 0x2f5   :  { %v841_v21 = vpop.permute.xlu1 %840 }
 0x2f6   :  { %5545 = vmatmul.mubr.msk.bf16.vlgmr.msra.gmra.mrb[16].mxu1 %vm116_vm2, %v841_v21 }
 0x2f7   :  { %5555 = vmatpush3.bf16.msra.mxu1 %v6604_v8  ;;  %5556 = vmatprep.mubr.msk.bf16.mxu1 %vm6508_vm1, %v8328_v0 }
 0x2f8   :  { %5566 = vmatprep.subr.bf16.mxu1 %v8328_v0 }
 0x2f9   :  { %v887_v24 = vpop.permute.xlu0 %886 }
 0x2fa   :  { %5551 = vmatmul.mubr.msk.bf16.vlgmr.msra.gmra.mrb[20].mxu0 %vm116_vm2, %v887_v24 }
 0x2fb   :  { %5561 = vmatpush3.bf16.msra.mxu0 %v6616_v13  ;;  %5562 = vmatprep.mubr.msk.bf16.mxu0 %vm6508_vm1, %v8328_v0 }
 0x2fc   :  { %5572 = vmatprep.subr.bf16.mxu0 %v8328_v0 }
 0x2fd   :  { %v933_v7 = vpop.permute.xlu1 %932 }
 0x2fe   :  { %5557 = vmatmul.mubr.msk.bf16.vlgmr.msra.gmra.mrb[20].mxu1 %vm116_vm2, %v933_v7 }
 0x2ff   :  { %5567 = vmatpush3.bf16.msra.mxu1 %v6618_v14  ;;  %5568 = vmatprep.mubr.msk.bf16.mxu1 %vm6508_vm1, %v8328_v0 }
 0x300   :  { %5578 = vmatprep.subr.bf16.mxu1 %v8328_v0 }
 0x301   :  { %v979_v8 = vpop.permute.xlu0 %978 }
 0x302   :  { %5563 = vmatmul.mubr.msk.bf16.vlgmr.msra.gmra.mrb[24].mxu0 %vm116_vm2, %v979_v8 }
 0x303   :  { %5573 = vmatpush3.bf16.msra.mxu0 %v6630_v19  ;;  %5574 = vmatprep.mubr.msk.bf16.mxu0 %vm6508_vm1, %v8328_v0 }
 0x304   :  { %5584 = vmatprep.subr.bf16.mxu0 %v8328_v0 }
 0x305   :  { %v1025_v13 = vpop.permute.xlu1 %1024 }
 0x306   :  { %5569 = vmatmul.mubr.msk.bf16.vlgmr.msra.gmra.mrb[24].mxu1 %vm116_vm2, %v1025_v13  ;;  %v784_v13 = vld [vmem:[#allocation4 + $0x1e] sm:$0x3] }
 0x307   :  { %5579 = vmatpush3.bf16.msra.mxu1 %v6632_v20  ;;  %5580 = vmatprep.mubr.msk.bf16.mxu1 %vm6508_vm1, %v8328_v0  ;;  %v777_v20 = vld [vmem:[#allocation4 + $0x10] sm:$0x3] }
 0x308   :  { %5590 = vmatprep.subr.bf16.mxu1 %v8328_v0 }
 0x309   :  { %v1071_v14 = vpop.permute.xlu0 %1070 }
 0x30a   :  { %5575 = vmatmul.mubr.msk.bf16.vlgmr.msra.gmra.mrb[28].mxu0 %vm116_vm2, %v1071_v14 }
 0x30b   :  { %5585 = vmatpush3.bf16.msra.mxu0 %v6594_v1  ;;  %5586 = vmatprep.mubr.msk.bf16.mxu0 %vm6508_vm1, %v8328_v0 }
 0x30c   :  { %5596 = vmatprep.subr.bf16.mxu0 %v8328_v0 }
 0x30d   :  { %v1117_v19 = vpop.permute.xlu1 %1116 }
 0x30e   :  { %5581 = vmatmul.mubr.msk.bf16.vlgmr.msra.gmra.mrb[28].mxu1 %vm116_vm2, %v1117_v19 }
 0x30f   :  { %5591 = vmatpush3.bf16.msra.mxu1 %v6596_v2  ;;  %5592 = vmatprep.mubr.msk.bf16.mxu1 %vm6508_vm1, %v8328_v0 }
 0x310   :  { %5602 = vmatprep.subr.bf16.mxu1 %v8328_v0 }
 0x3c5   :  { %v833_v40 = vpop.f32.mrb[16].mxu0 }
 0x3c6   :  { %v6842_v43 = vadd.f32 %v833_v40, %v777_v20  ;;  %v5540_v1 = vpop.f32.mrb[17].mxu0 }
 0x3c7   :  { %v836_v46 = vpop.f32.mrb[18].mxu0 }
 0x3c8   :  { %5957 = vtanh.f32 %v6842_v43  ;;  %v5541_v48 = vpop.f32.mrb[19].mxu0 }
 0x3c9   :  { %v879_v49 = vpop.f32.mrb[16].mxu1 }
 0x3ca   :  { %v6845_v52 = vadd.f32 %v879_v49, %v778_v47  ;;  %v5546_v53 = vpop.f32.mrb[17].mxu1 }
 0x3cb   :  { %v882_v2 = vpop.f32.mrb[18].mxu1 }
 0x3cc   :  { %5959 = vtanh.f32 %v6845_v52  ;;  %v5547_v57 = vpop.f32.mrb[19].mxu1 }
 0x3cd   :  { %v925_v58 = vpop.f32.mrb[20].mxu0  ;;  %v5257_v57 = vmul.f32 -1.442695, %v6845_v52 }
 0x3ce   :  { %v1163_v59 = vadd.f32 %v925_v58, %v779_v54  ;;  %v5552_v60 = vpop.f32.mrb[21].mxu0  ;;  %v5256_v54 = vmul.f32 -1.442695, %v6842_v43 }
 0x3cf   :  { %v928_v61 = vpop.f32.mrb[22].mxu0 }
 0x3d0   :  { %5961 = vtanh.f32 %v1163_v59  ;;  %v5553_v4 = vpop.f32.mrb[23].mxu0  ;;  %v5258_v58 = vmul.f32 -1.442695, %v1163_v59 }
 0x3d1   :  { %v971_v6 = vpop.f32.mrb[20].mxu1 }
 0x3d2   :  { %v5958_v10 = vpop.eup %5957  ;;  %v1164_v11 = vadd.f32 %v971_v6, %v780_v3  ;;  %v5558_v15 = vpop.f32.mrb[21].mxu1 }
 0x3d3   :  { %v974_v16 = vpop.f32.mrb[22].mxu1  ;;  %1241 = vrot.lane.b32.xlu0 %v5958_v10, %s6509_s1 }
 0x3d4   :  { %5963 = vtanh.f32 %v1164_v11  ;;  %v5559_v18 = vpop.f32.mrb[23].mxu1  ;;  %v5259_v60 = vmul.f32 -1.442695, %v1164_v11 }
 0x3d5   :  { %v1017_v26 = vpop.f32.mrb[24].mxu0 }
 0x3d6   :  { %v5960_v25 = vpop.eup %5959  ;;  %v1165_v44 = vadd.f32 %v1017_v26, %v781_v22  ;;  %v5564_v29 = vpop.f32.mrb[25].mxu0 }
 0x3d7   :  { %1243 = vrot.lane.b32.xlu1 %v5960_v25, %s6509_s1  ;;  %v1020_v31 = vpop.f32.mrb[26].mxu0 }
 0x3d8   :  { %5965 = vtanh.f32 %v1165_v44  ;;  %v5565_v34 = vpop.f32.mrb[27].mxu0  ;;  %v5260_v6 = vmul.f32 -1.442695, %v1165_v44 }
 0x3d9   :  { %v1063_v35 = vpop.f32.mrb[24].mxu1 }
 0x3da   :  { %v5962_v62 = vpop.eup %5961  ;;  %v1166_v38 = vadd.f32 %v1063_v35, %v782_v50  ;;  %v5570_v9 = vpop.f32.mrb[25].mxu1 }
 0x3db   :  { %v1066_v41 = vpop.f32.mrb[26].mxu1  ;;  %1245 = vrot.lane.b32.xlu0 %v5962_v62, %s6509_s1 }
 0x3dc   :  { %v5571_v12 = vpop.f32.mrb[27].mxu1  ;;  %5967 = vtanh.f32 %v1166_v38  ;;  %v5261_v16 = vmul.f32 -1.442695, %v1166_v38 }
 0x3dd   :  { %v1109_v24 = vpop.f32.mrb[28].mxu0 }
 0x3de   :  { %v5964_v21 = vpop.eup %5963  ;;  %v1167_v7 = vadd.f32 %v1109_v24, %v783_v32  ;;  %v5576_v8 = vpop.f32.mrb[29].mxu0 }
 0x3df   :  { %1247 = vrot.lane.b32.xlu1 %v5964_v21, %s6509_s1  ;;  %v1112_v14 = vpop.f32.mrb[30].mxu0 }
 0x3e0   :  { %5969 = vtanh.f32 %v1167_v7  ;;  %v5577_v19 = vpop.f32.mrb[31].mxu0  ;;  %v5262_v22 = vmul.f32 -1.442695, %v1167_v7 }
 0x3e1   :  { %v1155_v20 = vpop.f32.mrb[28].mxu1 }
 0x3e2   :  { %v1168_v40 = vadd.f32 %v1155_v20, %v784_v13  ;;  %v5582_v1 = vpop.f32.mrb[29].mxu1  ;;  %v5966_v46 = vpop.eup %5965 }
 0x3e3   :  { %v1158_v47 = vpop.f32.mrb[30].mxu1  ;;  %1249 = vrot.lane.b32.xlu0 %v5966_v46, %s6509_s1 }
 0x3e4   :  { %v5583_v48 = vpop.f32.mrb[31].mxu1  ;;  %5971 = vtanh.f32 %v1168_v40  ;;  %v5263_v59 = vmul.f32 -1.442695, %v1168_v40 }
 0x3e5   :  { %5973 = vpow2.f32 %v5256_v54 }
 0x3e6   :  { %v5968_v49 = vpop.eup %5967  ;;  %5975 = vpow2.f32 %v5257_v57 }
 0x3e7   :  { %1251 = vrot.lane.b32.xlu1 %v5968_v49, %s6509_s1  ;;  %5977 = vpow2.f32 %v5258_v58 }
 0x3e8   :  { %5979 = vpow2.f32 %v5259_v60 }
 0x3ea   :  { %v5970_v53 = vpop.eup %5969 }
 0x3eb   :  { %1253 = vrot.lane.b32.xlu0 %v5970_v53, %s6509_s1 }
 0x3ee   :  { %v5972_v2 = vpop.eup %5971 }
 0x3ef   :  { %1255 = vrot.lane.b32.xlu1 %v5972_v2, %s6509_s1  ;;  %v5974_v61 = vpop.eup %5973 }
 0x3f0   :  { %v1193_v3 = vadd.f32 1.0, %v5974_v61  ;;  %v5976_v4 = vpop.eup %5975 }
 0x3f1   :  { %v1194_v10 = vadd.f32 1.0, %v5976_v4  ;;  %v5978_v15 = vpop.eup %5977 }
 0x3f2   :  { %5981 = vrcp.f32 %v1193_v3  ;;  %v1195_v18 = vadd.f32 1.0, %v5978_v15  ;;  %v5980_v43 = vpop.eup %5979 }
 0x3f3   :  { %5983 = vpow2.f32 %v5260_v6  ;;  %v1196_v52 = vadd.f32 1.0, %v5980_v43 }
 0x3f4   :  { %5985 = vrcp.f32 %v1194_v10 }
 0x3f5   :  { %5987 = vpow2.f32 %v5261_v16 }
 0x3f6   :  { %5989 = vrcp.f32 %v1195_v18 }
 0x3f7   :  { %5991 = vpow2.f32 %v5262_v22 }
 0x3f8   :  { %5993 = vrcp.f32 %v1196_v52 }
 0x3f9   :  { %5995 = vpow2.f32 %v5263_v59 }
 0x3fc   :  { %v6858_v11 = vpop.eup %5981 }
 0x3fd   :  { %v5984_v25 = vpop.eup %5983  ;;  %v1225_v57 = vmul.f32 %v6858_v11, %v6715_v33 }
 0x3fe   :  { %v6861_v29 = vpop.eup %5985  ;;  %v1197_v50 = vadd.f32 1.0, %v5984_v25 }
 0x3ff   :  { %v5988_v31 = vpop.eup %5987  ;;  %v1226_v61 = vmul.f32 %v6861_v29, %v6719_v37 }
 0x400   :  { %v6865_v62 = vpop.eup %5989  ;;  %5997 = vrcp.f32 %v1197_v50  ;;  %v1198_v38 = vadd.f32 1.0, %v5988_v31 }
 0x401   :  { %v5992_v9 = vpop.eup %5991  ;;  %v1227_v6 = vmul.f32 %v6865_v62, %v6723_v42 }
 0x402   :  { %v6869_v32 = vpop.eup %5993  ;;  %5999 = vrcp.f32 %v1198_v38  ;;  %v1199_v21 = vadd.f32 1.0, %v5992_v9 }
 0x403   :  { %v5996_v24 = vpop.eup %5995  ;;  %v1228_v33 = vmul.f32 %v6869_v32, %v6727_v45 }
 0x404   :  { %6001 = vrcp.f32 %v1199_v21  ;;  %v1200_v13 = vadd.f32 1.0, %v5996_v24 }
 0x406   :  { %6003 = vrcp.f32 %v1200_v13 }
 0x40a   :  { %v6874_v14 = vpop.eup %5997 }
 0x40b   :  { %v1229_v37 = vmul.f32 %v6874_v14, %v6732_v51 }
 0x40c   :  { %v6878_v40 = vpop.eup %5999 }
 0x40d   :  { %v1230_v45 = vmul.f32 %v6878_v40, %v6737_v56 }
 0x40e   :  { %v6882_v47 = vpop.eup %6001 }
 0x40f   :  { %v1231_v51 = vmul.f32 %v6882_v47, %v6742_v63 }
 0x410   :  { %v6886_v53 = vpop.eup %6003 }
 0x411   :  { %v1232_v56 = vmul.f32 %v6886_v53, %v6747_v5 }
 0x445   :  { %v1242_v26 = vpop.permute.xlu0 %1241 }
 0x446   :  { %v1265_v44 = vmul.f32 %v6858_v11, %v1242_v26 }
 0x448   :  { %1281 = vrot.lane.b32.xlu0 %v1265_v44, %s6510_s8 }
 0x449   :  { %v1244_v34 = vpop.permute.xlu1 %1243 }
 0x44a   :  { %v1266_v35 = vmul.f32 %v6861_v29, %v1244_v34 }
 0x44c   :  { %1283 = vrot.lane.b32.xlu1 %v1266_v35, %s6510_s8 }
 0x44d   :  { %v1246_v41 = vpop.permute.xlu0 %1245 }
 0x44e   :  { %v1267_v12 = vmul.f32 %v6865_v62, %v1246_v41 }
 0x450   :  { %1285 = vrot.lane.b32.xlu0 %v1267_v12, %s6510_s8 }
 0x451   :  { %v1248_v7 = vpop.permute.xlu1 %1247 }
 0x452   :  { %v1268_v8 = vmul.f32 %v6869_v32, %v1248_v7 }
 0x454   :  { %1287 = vrot.lane.b32.xlu1 %v1268_v8, %s6510_s8 }
 0x455   :  { %v1250_v19 = vpop.permute.xlu0 %1249 }
 0x456   :  { %v1269_v20 = vmul.f32 %v6874_v14, %v1250_v19 }
 0x458   :  { %1289 = vrot.lane.b32.xlu0 %v1269_v20, %s6510_s8 }
 0x459   :  { %v1252_v1 = vpop.permute.xlu1 %1251 }
 0x45a   :  { %v1270_v46 = vmul.f32 %v6878_v40, %v1252_v1 }
 0x45c   :  { %1291 = vrot.lane.b32.xlu1 %v1270_v46, %s6510_s8 }
 0x45d   :  { %v1254_v48 = vpop.permute.xlu0 %1253 }
 0x45e   :  { %v1271_v49 = vmul.f32 %v6882_v47, %v1254_v48 }
 0x460   :  { %1293 = vrot.lane.b32.xlu0 %v1271_v49, %s6510_s8 }
 0x461   :  { %v1256_v2 = vpop.permute.xlu1 %1255 }
 0x462   :  { %v1272_v54 = vmul.f32 %v6886_v53, %v1256_v2 }
 0x464   :  { %1295 = vrot.lane.b32.xlu1 %v1272_v54, %s6510_s8 }
 0x4ba   :  { %v1282_v58 = vpop.permute.xlu0 %1281 }
 0x4bb   :  { %v6892_v60 = vadd.f32 %v1282_v58, %v1225_v57 }
 0x4bd   :  { %6005 = vtanh.f32 %v6892_v60 }
 0x4be   :  { %v1284_v3 = vpop.permute.xlu1 %1283 }
 0x4bf   :  { %v6897_v4 = vadd.f32 %v1284_v3, %v1226_v61 }
 0x4c1   :  { %6007 = vtanh.f32 %v6897_v4 }
 0x4c2   :  { %v1286_v10 = vpop.permute.xlu0 %1285 }
 0x4c3   :  { %v6902_v15 = vadd.f32 %v1286_v10, %v1227_v6  ;;  %v6994_v6 = vld [vmem:[#allocation7 + $0x18] sm:$0xff]  }
 0x4c5   :  { %6009 = vtanh.f32 %v6902_v15 }
 0x4c6   :  { %v1288_v16 = vpop.permute.xlu1 %1287 }
 0x4c7   :  { %v6006_v18 = vpop.eup %6005  ;;  %v6907_v43 = vadd.f32 %v1288_v16, %v1228_v33  ;;  %v7001_v33 = vld [vmem:[#allocation7 + $0x20] sm:$0xff]  }
 0x4c8   :  { %1329 = vrot.lane.b32.xlu0 %v6006_v18, %s6502_s19  ;;  %v7008_v18 = vld [vmem:[#allocation7 + $0x28] sm:$0xff]  }
 0x4c9   :  { %6011 = vtanh.f32 %v6907_v43 }
 0x4ca   :  { %v1290_v22 = vpop.permute.xlu0 %1289 }
 0x4cb   :  { %v6008_v42 = vpop.eup %6007  ;;  %v6913_v52 = vadd.f32 %v1290_v22, %v1229_v37 }
 0x4cc   :  { %1331 = vrot.lane.b32.xlu1 %v6008_v42, %s6502_s19  ;;  %v7015_v42 = vld [vmem:[#allocation7 + $0x30] sm:$0xff]  }
 0x4cd   :  { %6013 = vtanh.f32 %v6913_v52 }
 0x4ce   :  { %v1292_v25 = vpop.permute.xlu1 %1291 }
 0x4cf   :  { %v6010_v59 = vpop.eup %6009  ;;  %v6919_v26 = vadd.f32 %v1292_v25, %v1230_v45  ;;  %v7022_v45 = vld [vmem:[#allocation7 + $0x38] sm:$0xff]   ;;  %v7029_v25 = vld [vmem:[#allocation7] sm:$0xff]  }
 0x4d0   :  { %1333 = vrot.lane.b32.xlu0 %v6010_v59, %s6502_s19 }
 0x4d1   :  { %6015 = vtanh.f32 %v6919_v26 }
 0x4d2   :  { %v1294_v50 = vpop.permute.xlu0 %1293 }
 0x4d3   :  { %v6012_v44 = vpop.eup %6011  ;;  %v6925_v31 = vadd.f32 %v1294_v50, %v1231_v51  ;;  %v1403_v50 = vld [vmem:[#allocation4 + $0x20] sm:$0x3] }
 0x4d4   :  { %1335 = vrot.lane.b32.xlu1 %v6012_v44, %s6502_s19  ;;  %v7036_v44 = vld [vmem:[#allocation7 + $0x8] sm:$0xff]  }
 0x4d5   :  { %6017 = vtanh.f32 %v6925_v31 }
 0x4d6   :  { %v1296_v34 = vpop.permute.xlu1 %1295 }
 0x4d7   :  { %v6014_v35 = vpop.eup %6013  ;;  %v6931_v38 = vadd.f32 %v1296_v34, %v1232_v56 }
 0x4d8   :  { %1337 = vrot.lane.b32.xlu0 %v6014_v35, %s6502_s19 }
 0x4d9   :  { %6019 = vtanh.f32 %v6931_v38 }
 0x4db   :  { %v6016_v63 = vpop.eup %6015 }
 0x4dc   :  { %1339 = vrot.lane.b32.xlu1 %v6016_v63, %s6502_s19 }
 0x4df   :  { %v6018_v9 = vpop.eup %6017 }
 0x4e0   :  { %1341 = vrot.lane.b32.xlu0 %v6018_v9, %s6502_s19  ;;  %v1404_v9 = vld [vmem:[#allocation4 + $0x22] sm:$0x3] }
 0x4e3   :  { %v6020_v41 = vpop.eup %6019 }
 0x4e4   :  { %1343 = vrot.lane.b32.xlu1 %v6020_v41, %s6502_s19 }
 0x53a   :  { %v1330_v12 = vpop.permute.xlu0 %1329 }
 0x53b   :  { %v6939_v5 = vmul.f32 %v6858_v11, %v1330_v12 }
 0x53d   :  { %v1411_v21 = vpack.c.bf16 %v6939_v5, %v6939_v5 }
 0x53e   :  { %v1332_v24 = vpop.permute.xlu1 %1331 }
 0x53f   :  { %v6944_v7 = vmul.f32 %v6861_v29, %v1332_v24  ;;  %1420 = vrot.lane.b32.xlu0 %v1411_v21, %s6511_s9 }
 0x541   :  { %v1412_v8 = vpack.c.bf16 %v6944_v7, %v6944_v7 }
 0x542   :  { %v1334_v13 = vpop.permute.xlu0 %1333 }
 0x543   :  { %v6950_v19 = vmul.f32 %v6865_v62, %v1334_v13  ;;  %1466 = vrot.lane.b32.xlu1 %v1412_v8, %s6511_s9  ;;  %v1405_v13 = vld [vmem:[#allocation4 + $0x24] sm:$0x3] }
 0x545   :  { %v1413_v11 = vpack.c.bf16 %v6950_v19, %v6950_v19 }
 0x546   :  { %v1336_v20 = vpop.permute.xlu1 %1335 }
 0x547   :  { %v6956_v1 = vmul.f32 %v6869_v32, %v1336_v20  ;;  %1512 = vrot.lane.b32.xlu0 %v1413_v11, %s6511_s9 }
 0x549   :  { %v1414_v29 = vpack.c.bf16 %v6956_v1, %v6956_v1 }
 0x54a   :  { %v1338_v46 = vpop.permute.xlu0 %1337 }
 0x54b   :  { %1558 = vrot.lane.b32.xlu1 %v1414_v29, %s6511_s9  ;;  %v6963_v62 = vmul.f32 %v6874_v14, %v1338_v46 }
 0x54d   :  { %v1415_v48 = vpack.c.bf16 %v6963_v62, %v6963_v62 }
 0x54e   :  { %v1340_v49 = vpop.permute.xlu1 %1339 }
 0x54f   :  { %v6968_v2 = vmul.f32 %v6878_v40, %v1340_v49  ;;  %1604 = vrot.lane.b32.xlu0 %v1415_v48, %s6511_s9  ;;  %v1406_v49 = vld [vmem:[#allocation4 + $0x26] sm:$0x3] }
 0x551   :  { %v1416_v32 = vpack.c.bf16 %v6968_v2, %v6968_v2 }
 0x552   :  { %v1342_v54 = vpop.permute.xlu0 %1341 }
 0x553   :  { %v6974_v57 = vmul.f32 %v6882_v47, %v1342_v54  ;;  %1650 = vrot.lane.b32.xlu1 %v1416_v32, %s6511_s9  ;;  %v6987_v47 = vld [vmem:[#allocation7 + $0x10] sm:$0xff]  }
 0x555   :  { %v1417_v14 = vpack.c.bf16 %v6974_v57, %v6974_v57 }
 0x556   :  { %v1344_v58 = vpop.permute.xlu1 %1343 }
 0x557   :  { %v6980_v61 = vmul.f32 %v6886_v53, %v1344_v58  ;;  %1696 = vrot.lane.b32.xlu0 %v1417_v14, %s6511_s9 }
 0x559   :  { %v1418_v40 = vpack.c.bf16 %v6980_v61, %v6980_v61 }
 0x55b   :  { %1742 = vrot.lane.b32.xlu1 %v1418_v40, %s6511_s9 }
 0x5b1   :  { %v1421_v3 = vpop.permute.xlu0 %1420 }
 0x5b2   :  { %5587 = vmatmul.mubr.msk.bf16.vlgmr.msra.gmra.mrb[32].mxu0 %vm116_vm2, %v1421_v3 }
 0x5b3   :  { %5597 = vmatpush3.bf16.msra.mxu0 %v6987_v47  ;;  %5598 = vmatprep.mubr.msk.bf16.mxu0 %vm6508_vm1, %v8328_v0 }
 0x5b4   :  { %5608 = vmatprep.subr.bf16.mxu0 %v8328_v0 }
 0x5b5   :  { %v1467_v53 = vpop.permute.xlu1 %1466 }
 0x5b6   :  { %5593 = vmatmul.mubr.msk.bf16.vlgmr.msra.gmra.mrb[32].mxu1 %vm116_vm2, %v1467_v53 }
 0x5b7   :  { %5603 = vmatpush3.bf16.msra.mxu1 %v6994_v6  ;;  %5604 = vmatprep.mubr.msk.bf16.mxu1 %vm6508_vm1, %v8328_v0 }
 0x5b8   :  { %5614 = vmatprep.subr.bf16.mxu1 %v8328_v0 }
 0x5b9   :  { %v1513_v10 = vpop.permute.xlu0 %1512 }
 0x5ba   :  { %5599 = vmatmul.mubr.msk.bf16.vlgmr.msra.gmra.mrb[36].mxu0 %vm116_vm2, %v1513_v10  ;;  %v1407_v10 = vld [vmem:[#allocation4 + $0x28] sm:$0x3] }
 0x5bb   :  { %5609 = vmatpush3.bf16.msra.mxu0 %v7001_v33  ;;  %5610 = vmatprep.mubr.msk.bf16.mxu0 %vm6508_vm1, %v8328_v0 }
 0x5bc   :  { %5620 = vmatprep.subr.bf16.mxu0 %v8328_v0 }
 0x5bd   :  { %v1559_v16 = vpop.permute.xlu1 %1558 }
 0x5be   :  { %5605 = vmatmul.mubr.msk.bf16.vlgmr.msra.gmra.mrb[36].mxu1 %vm116_vm2, %v1559_v16 }
 0x5bf   :  { %5615 = vmatpush3.bf16.msra.mxu1 %v7008_v18  ;;  %5616 = vmatprep.mubr.msk.bf16.mxu1 %vm6508_vm1, %v8328_v0 }
 0x5c0   :  { %5626 = vmatprep.subr.bf16.mxu1 %v8328_v0 }
 0x5c1   :  { %v1605_v37 = vpop.permute.xlu0 %1604 }
 0x5c2   :  { %5611 = vmatmul.mubr.msk.bf16.vlgmr.msra.gmra.mrb[40].mxu0 %vm116_vm2, %v1605_v37 }
 0x5c3   :  { %5621 = vmatpush3.bf16.msra.mxu0 %v7015_v42  ;;  %5622 = vmatprep.mubr.msk.bf16.mxu0 %vm6508_vm1, %v8328_v0 }
 0x5c4   :  { %5632 = vmatprep.subr.bf16.mxu0 %v8328_v0 }
 0x5c5   :  { %v1651_v22 = vpop.permute.xlu1 %1650 }
 0x5c6   :  { %5617 = vmatmul.mubr.msk.bf16.vlgmr.msra.gmra.mrb[40].mxu1 %vm116_vm2, %v1651_v22 }
 0x5c7   :  { %5627 = vmatpush3.bf16.msra.mxu1 %v7022_v45  ;;  %5628 = vmatprep.mubr.msk.bf16.mxu1 %vm6508_vm1, %v8328_v0 }
 0x5c8   :  { %5638 = vmatprep.subr.bf16.mxu1 %v8328_v0 }
 0x5c9   :  { %v1697_v59 = vpop.permute.xlu0 %1696 }
 0x5ca   :  { %5623 = vmatmul.mubr.msk.bf16.vlgmr.msra.gmra.mrb[44].mxu0 %vm116_vm2, %v1697_v59 }
 0x5cb   :  { %5633 = vmatpush3.bf16.msra.mxu0 %v7029_v25  ;;  %5634 = vmatprep.mubr.msk.bf16.mxu0 %vm6508_vm1, %v8328_v0 }
 0x5cc   :  { %5644 = vmatprep.subr.bf16.mxu0 %v8328_v0 }
 0x5cd   :  { %v1743_v51 = vpop.permute.xlu1 %1742 }
 0x5ce   :  { %5629 = vmatmul.mubr.msk.bf16.vlgmr.msra.gmra.mrb[44].mxu1 %vm116_vm2, %v1743_v51 }
 0x5cf   :  { %5639 = vmatpush3.bf16.msra.mxu1 %v7036_v44  ;;  %5640 = vmatprep.mubr.msk.bf16.mxu1 %vm6508_vm1, %v8328_v0 }
 0x5d0   :  { %5650 = vmatprep.subr.bf16.mxu1 %v8328_v0 }
 0x685   :  { %v1459_v56 = vpop.f32.mrb[32].mxu0 }
 0x686   :  { %v7042_v34 = vadd.f32 %v1459_v56, %v1403_v50  ;;  %v5588_v35 = vpop.f32.mrb[33].mxu0  ;;  %v1408_v50 = vld [vmem:[#allocation4 + $0x2a] sm:$0x3] }
 0x687   :  { %v1462_v63 = vpop.f32.mrb[34].mxu0 }
 0x688   :  { %6021 = vtanh.f32 %v7042_v34  ;;  %v5589_v41 = vpop.f32.mrb[35].mxu0 }
 0x689   :  { %v1505_v12 = vpop.f32.mrb[32].mxu1 }
 0x68a   :  { %v7045_v21 = vadd.f32 %v1505_v12, %v1404_v9  ;;  %v5594_v24 = vpop.f32.mrb[33].mxu1 }
 0x68b   :  { %v1508_v8 = vpop.f32.mrb[34].mxu1  ;;  %v1409_v24 = vld [vmem:[#allocation4 + $0x2c] sm:$0x3] }
 0x68c   :  { %6023 = vtanh.f32 %v7045_v21  ;;  %v5595_v11 = vpop.f32.mrb[35].mxu1 }
 0x68d   :  { %v1551_v20 = vpop.f32.mrb[36].mxu0 }
 0x68e   :  { %v1789_v29 = vadd.f32 %v1551_v20, %v1405_v13  ;;  %v5600_v46 = vpop.f32.mrb[37].mxu0 }
 0x68f   :  { %v1554_v48 = vpop.f32.mrb[38].mxu0 }
 0x690   :  { %6025 = vtanh.f32 %v1789_v29  ;;  %v5601_v32 = vpop.f32.mrb[39].mxu0 }
 0x691   :  { %v1597_v54 = vpop.f32.mrb[36].mxu1 }
 0x692   :  { %v6022_v14 = vpop.eup %6021  ;;  %v1790_v58 = vadd.f32 %v1597_v54, %v1406_v49  ;;  %v5606_v40 = vpop.f32.mrb[37].mxu1  ;;  %v1410_v49 = vld [vmem:[#allocation4 + $0x2e] sm:$0x3] }
 0x693   :  { %v1600_v3 = vpop.f32.mrb[38].mxu1  ;;  %1867 = vrot.lane.b32.xlu0 %v6022_v14, %s6509_s1 }
 0x694   :  { %6027 = vtanh.f32 %v1790_v58  ;;  %v5607_v53 = vpop.f32.mrb[39].mxu1 }
 0x695   :  { %v1643_v37 = vpop.f32.mrb[40].mxu0 }
 0x696   :  { %v6024_v16 = vpop.eup %6023  ;;  %v1791_v22 = vadd.f32 %v1643_v37, %v1407_v10  ;;  %v5612_v59 = vpop.f32.mrb[41].mxu0 }
 0x697   :  { %1869 = vrot.lane.b32.xlu1 %v6024_v16, %s6509_s1  ;;  %v1646_v51 = vpop.f32.mrb[42].mxu0 }
 0x698   :  { %6029 = vtanh.f32 %v1791_v22  ;;  %v5613_v56 = vpop.f32.mrb[43].mxu0  ;;  %v5272_v51 = vmul.f32 -1.442695, %v7042_v34 }
 0x699   :  { %v1689_v63 = vpop.f32.mrb[40].mxu1  ;;  %v5274_v56 = vmul.f32 -1.442695, %v1789_v29 }
 0x69a   :  { %v6026_v35 = vpop.eup %6025  ;;  %v1792_v9 = vadd.f32 %v1689_v63, %v1408_v50  ;;  %v5618_v41 = vpop.f32.mrb[41].mxu1  ;;  %v5273_v50 = vmul.f32 -1.442695, %v7045_v21 }
 0x69b   :  { %1871 = vrot.lane.b32.xlu0 %v6026_v35, %s6509_s1  ;;  %v1692_v12 = vpop.f32.mrb[42].mxu1  ;;  %v5275_v35 = vmul.f32 -1.442695, %v1790_v58 }
 0x69c   :  { %6031 = vtanh.f32 %v1792_v9  ;;  %v5619_v8 = vpop.f32.mrb[43].mxu1 }
 0x69d   :  { %v1735_v11 = vpop.f32.mrb[44].mxu0 }
 0x69e   :  { %v6028_v13 = vpop.eup %6027  ;;  %v1793_v20 = vadd.f32 %v1735_v11, %v1409_v24  ;;  %v5624_v46 = vpop.f32.mrb[45].mxu0  ;;  %v5276_v24 = vmul.f32 -1.442695, %v1791_v22  ;;  %v5277_v11 = vmul.f32 -1.442695, %v1792_v9 }
 0x69f   :  { %1873 = vrot.lane.b32.xlu1 %v6028_v13, %s6509_s1  ;;  %v1738_v48 = vpop.f32.mrb[46].mxu0 }
 0x6a0   :  { %6033 = vtanh.f32 %v1793_v20  ;;  %v5625_v32 = vpop.f32.mrb[47].mxu0  ;;  %v5278_v48 = vmul.f32 -1.442695, %v1793_v20 }
 0x6a1   :  { %v1781_v54 = vpop.f32.mrb[44].mxu1 }
 0x6a2   :  { %v6030_v14 = vpop.eup %6029  ;;  %v1794_v40 = vadd.f32 %v1781_v54, %v1410_v49  ;;  %v5630_v3 = vpop.f32.mrb[45].mxu1 }
 0x6a3   :  { %v1784_v53 = vpop.f32.mrb[46].mxu1  ;;  %1875 = vrot.lane.b32.xlu0 %v6030_v14, %s6509_s1 }
 0x6a4   :  { %6035 = vtanh.f32 %v1794_v40  ;;  %v5631_v10 = vpop.f32.mrb[47].mxu1  ;;  %v5279_v29 = vmul.f32 -1.442695, %v1794_v40 }
 0x6a5   :  { %6037 = vpow2.f32 %v5272_v51 }
 0x6a6   :  { %v6032_v16 = vpop.eup %6031  ;;  %6039 = vpow2.f32 %v5273_v50 }
 0x6a7   :  { %1877 = vrot.lane.b32.xlu1 %v6032_v16, %s6509_s1  ;;  %6041 = vpow2.f32 %v5274_v56 }
 0x6a8   :  { %6043 = vpow2.f32 %v5275_v35 }
 0x6aa   :  { %v6034_v37 = vpop.eup %6033 }
 0x6ab   :  { %1879 = vrot.lane.b32.xlu0 %v6034_v37, %s6509_s1 }
 0x6ae   :  { %v6036_v59 = vpop.eup %6035 }
 0x6af   :  { %1881 = vrot.lane.b32.xlu1 %v6036_v59, %s6509_s1  ;;  %v6038_v63 = vpop.eup %6037 }
 0x6b0   :  { %v1819_v41 = vadd.f32 1.0, %v6038_v63  ;;  %v6040_v12 = vpop.eup %6039 }
 0x6b1   :  { %v1820_v8 = vadd.f32 1.0, %v6040_v12  ;;  %v6042_v13 = vpop.eup %6041 }
 0x6b2   :  { %6045 = vrcp.f32 %v1819_v41  ;;  %v1821_v46 = vadd.f32 1.0, %v6042_v13  ;;  %v6044_v34 = vpop.eup %6043 }
 0x6b3   :  { %6047 = vpow2.f32 %v5276_v24  ;;  %v1822_v21 = vadd.f32 1.0, %v6044_v34 }
 0x6b4   :  { %6049 = vrcp.f32 %v1820_v8 }
 0x6b5   :  { %6051 = vpow2.f32 %v5277_v11 }
 0x6b6   :  { %6053 = vrcp.f32 %v1821_v46 }
 0x6b7   :  { %6055 = vpow2.f32 %v5278_v48 }
 0x6b8   :  { %6057 = vrcp.f32 %v1822_v21 }
 0x6b9   :  { %6059 = vpow2.f32 %v5279_v29 }
 0x6bc   :  { %v7058_v58 = vpop.eup %6045 }
 0x6bd   :  { %v6048_v49 = vpop.eup %6047 }
 0x6be   :  { %v7061_v54 = vpop.eup %6049  ;;  %v1823_v9 = vadd.f32 1.0, %v6048_v49 }
 0x6bf   :  { %v6052_v14 = vpop.eup %6051 }
 0x6c0   :  { %v7065_v53 = vpop.eup %6053  ;;  %6061 = vrcp.f32 %v1823_v9  ;;  %v1824_v40 = vadd.f32 1.0, %v6052_v14  ;;  %v1852_v14 = vmul.f32 %v7061_v54, %v6897_v4 }
 0x6c1   :  { %v6056_v10 = vpop.eup %6055 }
 0x6c2   :  { %v7069_v59 = vpop.eup %6057  ;;  %6063 = vrcp.f32 %v1824_v40  ;;  %v1825_v51 = vadd.f32 1.0, %v6056_v10  ;;  %v1853_v40 = vmul.f32 %v7065_v53, %v6902_v15 }
 0x6c3   :  { %v6060_v50 = vpop.eup %6059 }
 0x6c4   :  { %6065 = vrcp.f32 %v1825_v51  ;;  %v1826_v63 = vadd.f32 1.0, %v6060_v50 }
 0x6c6   :  { %6067 = vrcp.f32 %v1826_v63 }
 0x6ca   :  { %v7074_v41 = vpop.eup %6061 }
 0x6cb   :  { %v1855_v4 = vmul.f32 %v7074_v41, %v6913_v52 }
 0x6cc   :  { %v7078_v8 = vpop.eup %6063 }
 0x6ce   :  { %v7082_v46 = vpop.eup %6065 }
 0x6cf   :  { %v1857_v52 = vmul.f32 %v7082_v46, %v6925_v31 }
 0x6d0   :  { %v7086_v21 = vpop.eup %6067 }
 0x705   :  { %v1868_v32 = vpop.permute.xlu0 %1867 }
 0x706   :  { %v1891_v22 = vmul.f32 %v7058_v58, %v1868_v32  ;;  %v1851_v32 = vmul.f32 %v7058_v58, %v6892_v60  ;;  %v1854_v60 = vmul.f32 %v7069_v59, %v6907_v43  ;;  %v1856_v43 = vmul.f32 %v7078_v8, %v6919_v26 }
 0x707   :  { %v1858_v26 = vmul.f32 %v7086_v21, %v6931_v38 }
 0x708   :  { %1907 = vrot.lane.b32.xlu0 %v1891_v22, %s6510_s8 }
 0x709   :  { %v1870_v3 = vpop.permute.xlu1 %1869 }
 0x70a   :  { %v1892_v20 = vmul.f32 %v7061_v54, %v1870_v3 }
 0x70c   :  { %1909 = vrot.lane.b32.xlu1 %v1892_v20, %s6510_s8 }
 0x70d   :  { %v1872_v16 = vpop.permute.xlu0 %1871 }
 0x70e   :  { %v1893_v37 = vmul.f32 %v7065_v53, %v1872_v16 }
 0x710   :  { %1911 = vrot.lane.b32.xlu0 %v1893_v37, %s6510_s8 }
 0x711   :  { %v1874_v56 = vpop.permute.xlu1 %1873 }
 0x712   :  { %v1894_v35 = vmul.f32 %v7069_v59, %v1874_v56 }
 0x714   :  { %1913 = vrot.lane.b32.xlu1 %v1894_v35, %s6510_s8 }
 0x715   :  { %v1876_v12 = vpop.permute.xlu0 %1875 }
 0x716   :  { %v1895_v24 = vmul.f32 %v7074_v41, %v1876_v12 }
 0x718   :  { %1915 = vrot.lane.b32.xlu0 %v1895_v24, %s6510_s8 }
 0x719   :  { %v1878_v13 = vpop.permute.xlu1 %1877 }
 0x71a   :  { %v1896_v11 = vmul.f32 %v7078_v8, %v1878_v13 }
 0x71c   :  { %1917 = vrot.lane.b32.xlu1 %v1896_v11, %s6510_s8 }
 0x71d   :  { %v1880_v34 = vpop.permute.xlu0 %1879 }
 0x71e   :  { %v1897_v48 = vmul.f32 %v7082_v46, %v1880_v34 }
 0x720   :  { %1919 = vrot.lane.b32.xlu0 %v1897_v48, %s6510_s8 }
 0x721   :  { %v1882_v29 = vpop.permute.xlu1 %1881 }
 0x722   :  { %v1898_v49 = vmul.f32 %v7086_v21, %v1882_v29 }
 0x724   :  { %1921 = vrot.lane.b32.xlu1 %v1898_v49, %s6510_s8 }
 0x77a   :  { %v1908_v22 = vpop.permute.xlu0 %1907 }
 0x77b   :  { %v7092_v9 = vadd.f32 %v1908_v22, %v1851_v32 }
 0x77d   :  { %6069 = vtanh.f32 %v7092_v9 }
 0x77e   :  { %v1910_v3 = vpop.permute.xlu1 %1909 }
 0x77f   :  { %v7097_v20 = vadd.f32 %v1910_v3, %v1852_v14 }
 0x781   :  { %6071 = vtanh.f32 %v7097_v20 }
 0x782   :  { %v1912_v10 = vpop.permute.xlu0 %1911 }
 0x783   :  { %v7102_v16 = vadd.f32 %v1912_v10, %v1853_v40 }
 0x785   :  { %6073 = vtanh.f32 %v7102_v16 }
 0x786   :  { %v1914_v37 = vpop.permute.xlu1 %1913 }
 0x787   :  { %v6070_v51 = vpop.eup %6069  ;;  %v7107_v50 = vadd.f32 %v1914_v37, %v1854_v60 }
 0x788   :  { %1955 = vrot.lane.b32.xlu0 %v6070_v51, %s6502_s19 }
 0x789   :  { %6075 = vtanh.f32 %v7107_v50 }
 0x78a   :  { %v1916_v56 = vpop.permute.xlu0 %1915 }
 0x78b   :  { %v6072_v15 = vpop.eup %6071  ;;  %v7113_v35 = vadd.f32 %v1916_v56, %v1855_v4 }
 0x78c   :  { %1957 = vrot.lane.b32.xlu1 %v6072_v15, %s6502_s19 }
 0x78d   :  { %6077 = vtanh.f32 %v7113_v35 }
 0x78e   :  { %v1918_v12 = vpop.permute.xlu1 %1917 }
 0x78f   :  { %v6074_v63 = vpop.eup %6073  ;;  %v7119_v24 = vadd.f32 %v1918_v12, %v1856_v43 }
 0x790   :  { %1959 = vrot.lane.b32.xlu0 %v6074_v63, %s6502_s19 }
 0x791   :  { %6079 = vtanh.f32 %v7119_v24 }
 0x792   :  { %v1920_v11 = vpop.permute.xlu0 %1919 }
 0x793   :  { %v6076_v13 = vpop.eup %6075  ;;  %v7125_v34 = vadd.f32 %v1920_v11, %v1857_v52 }
 0x794   :  { %1961 = vrot.lane.b32.xlu1 %v6076_v13, %s6502_s19 }
 0x795   :  { %6081 = vtanh.f32 %v7125_v34 }
 0x796   :  { %v1922_v48 = vpop.permute.xlu1 %1921 }
 0x797   :  { %v6078_v29 = vpop.eup %6077  ;;  %v7131_v49 = vadd.f32 %v1922_v48, %v1858_v26 }
 0x798   :  { %1963 = vrot.lane.b32.xlu0 %v6078_v29, %s6502_s19 }
 0x799   :  { %6083 = vtanh.f32 %v7131_v49 }
 0x79b   :  { %v6080_v31 = vpop.eup %6079 }
 0x79c   :  { %1965 = vrot.lane.b32.xlu1 %v6080_v31, %s6502_s19 }
 0x79f   :  { %v6082_v32 = vpop.eup %6081 }
 0x7a0   :  { %1967 = vrot.lane.b32.xlu0 %v6082_v32, %s6502_s19 }
 0x7a3   :  { %v6084_v22 = vpop.eup %6083 }
 0x7a4   :  { %1969 = vrot.lane.b32.xlu1 %v6084_v22, %s6502_s19  ;;  %v2030_v22 = vld [vmem:[#allocation4 + $0x32] sm:$0x3] }
 0x7fa   :  { %v1956_v14 = vpop.permute.xlu0 %1955 }
 0x7fb   :  { %v7139_v38 = vmul.f32 %v7058_v58, %v1956_v14 }
 0x7fd   :  { %v2037_v3 = vpack.c.bf16 %v7139_v38, %v7139_v38 }
 0x7fe   :  { %v1958_v40 = vpop.permute.xlu1 %1957 }
 0x7ff   :  { %v7144_v10 = vmul.f32 %v7061_v54, %v1958_v40  ;;  %2046 = vrot.lane.b32.xlu0 %v2037_v3, %s6511_s9 }
 0x801   :  { %v2038_v60 = vpack.c.bf16 %v7144_v10, %v7144_v10 }
 0x802   :  { %v1960_v37 = vpop.permute.xlu0 %1959 }
 0x803   :  { %v7150_v51 = vmul.f32 %v7065_v53, %v1960_v37  ;;  %2092 = vrot.lane.b32.xlu1 %v2038_v60, %s6511_s9  ;;  %v2031_v37 = vld [vmem:[#allocation4 + $0x34] sm:$0x3] }
 0x805   :  { %v2039_v58 = vpack.c.bf16 %v7150_v51, %v7150_v51 }
 0x806   :  { %v1962_v4 = vpop.permute.xlu1 %1961 }
 0x807   :  { %v7156_v15 = vmul.f32 %v7069_v59, %v1962_v4  ;;  %2138 = vrot.lane.b32.xlu0 %v2039_v58, %s6511_s9 }
 0x809   :  { %v2040_v54 = vpack.c.bf16 %v7156_v15, %v7156_v15 }
 0x80a   :  { %v1964_v56 = vpop.permute.xlu0 %1963 }
 0x80b   :  { %2184 = vrot.lane.b32.xlu1 %v2040_v54, %s6511_s9  ;;  %v7163_v53 = vmul.f32 %v7074_v41, %v1964_v56 }
 0x80d   :  { %v2041_v43 = vpack.c.bf16 %v7163_v53, %v7163_v53 }
 0x80e   :  { %v1966_v63 = vpop.permute.xlu1 %1965 }
 0x80f   :  { %v7168_v12 = vmul.f32 %v7078_v8, %v1966_v63  ;;  %2230 = vrot.lane.b32.xlu0 %v2041_v43, %s6511_s9  ;;  %v2032_v63 = vld [vmem:[#allocation4 + $0x36] sm:$0x3] }
 0x811   :  { %v2042_v59 = vpack.c.bf16 %v7168_v12, %v7168_v12 }
 0x812   :  { %v1968_v52 = vpop.permute.xlu0 %1967 }
 0x813   :  { %v7174_v13 = vmul.f32 %v7082_v46, %v1968_v52  ;;  %2276 = vrot.lane.b32.xlu1 %v2042_v59, %s6511_s9 }
 0x815   :  { %v2043_v41 = vpack.c.bf16 %v7174_v13, %v7174_v13 }
 0x816   :  { %v1970_v11 = vpop.permute.xlu1 %1969 }
 0x817   :  { %v7180_v26 = vmul.f32 %v7086_v21, %v1970_v11  ;;  %2322 = vrot.lane.b32.xlu0 %v2043_v41, %s6511_s9 }
 0x819   :  { %v2044_v8 = vpack.c.bf16 %v7180_v26, %v7180_v26 }
 0x81b   :  { %2368 = vrot.lane.b32.xlu1 %v2044_v8, %s6511_s9 }
 0x871   :  { %v2047_v48 = vpop.permute.xlu0 %2046 }
 0x872   :  { %5635 = vmatmul.mubr.msk.bf16.vlgmr.msra.gmra.mrb[48].mxu0 %vm116_vm2, %v2047_v48 }
 0x873   :  { %5645 = vmatpush3.bf16.msra.mxu0 %v6987_v47  ;;  %5646 = vmatprep.mubr.msk.bf16.mxu0 %vm6508_vm1, %v8328_v0 }
 0x874   :  { %5656 = vmatprep.subr.bf16.mxu0 %v8328_v0 }
 0x875   :  { %v2093_v46 = vpop.permute.xlu1 %2092 }
 0x876   :  { %5641 = vmatmul.mubr.msk.bf16.vlgmr.msra.gmra.mrb[48].mxu1 %vm116_vm2, %v2093_v46 }
 0x877   :  { %5651 = vmatpush3.bf16.msra.mxu1 %v6994_v6  ;;  %5652 = vmatprep.mubr.msk.bf16.mxu1 %vm6508_vm1, %v8328_v0 }
 0x878   :  { %5662 = vmatprep.subr.bf16.mxu1 %v8328_v0 }
 0x879   :  { %v2139_v21 = vpop.permute.xlu0 %2138 }
 0x87a   :  { %5647 = vmatmul.mubr.msk.bf16.vlgmr.msra.gmra.mrb[52].mxu0 %vm116_vm2, %v2139_v21  ;;  %v2033_v21 = vld [vmem:[#allocation4 + $0x38] sm:$0x3] }
 0x87b   :  { %5657 = vmatpush3.bf16.msra.mxu0 %v7001_v33  ;;  %5658 = vmatprep.mubr.msk.bf16.mxu0 %vm6508_vm1, %v8328_v0 }
 0x87c   :  { %5668 = vmatprep.subr.bf16.mxu0 %v8328_v0 }
 0x87d   :  { %v2185_v47 = vpop.permute.xlu1 %2184 }
 0x87e   :  { %5653 = vmatmul.mubr.msk.bf16.vlgmr.msra.gmra.mrb[52].mxu1 %vm116_vm2, %v2185_v47 }
 0x87f   :  { %5663 = vmatpush3.bf16.msra.mxu1 %v7008_v18  ;;  %5664 = vmatprep.mubr.msk.bf16.mxu1 %vm6508_vm1, %v8328_v0 }
 0x880   :  { %5674 = vmatprep.subr.bf16.mxu1 %v8328_v0 }
 0x881   :  { %v2231_v6 = vpop.permute.xlu0 %2230 }
 0x882   :  { %5659 = vmatmul.mubr.msk.bf16.vlgmr.msra.gmra.mrb[56].mxu0 %vm116_vm2, %v2231_v6 }
 0x883   :  { %5669 = vmatpush3.bf16.msra.mxu0 %v7015_v42  ;;  %5670 = vmatprep.mubr.msk.bf16.mxu0 %vm6508_vm1, %v8328_v0 }
 0x884   :  { %5680 = vmatprep.subr.bf16.mxu0 %v8328_v0 }
 0x885   :  { %v2277_v33 = vpop.permute.xlu1 %2276 }
 0x886   :  { %5665 = vmatmul.mubr.msk.bf16.vlgmr.msra.gmra.mrb[56].mxu1 %vm116_vm2, %v2277_v33 }
 0x887   :  { %5675 = vmatpush3.bf16.msra.mxu1 %v7022_v45  ;;  %5676 = vmatprep.mubr.msk.bf16.mxu1 %vm6508_vm1, %v8328_v0  ;;  %v2029_v45 = vld [vmem:[#allocation4 + $0x30] sm:$0x3] }
 0x888   :  { %5686 = vmatprep.subr.bf16.mxu1 %v8328_v0 }
 0x889   :  { %v2323_v18 = vpop.permute.xlu0 %2322 }
 0x88a   :  { %5671 = vmatmul.mubr.msk.bf16.vlgmr.msra.gmra.mrb[60].mxu0 %vm116_vm2, %v2323_v18 }
 0x88b   :  { %5681 = vmatpush3.bf16.msra.mxu0 %v7029_v25  ;;  %5682 = vmatprep.mubr.msk.bf16.mxu0 %vm6508_vm1, %v8328_v0 }
 0x88c   :  { %5692 = vmatprep.subr.bf16.mxu0 %v8328_v0 }
 0x88d   :  { %v2369_v42 = vpop.permute.xlu1 %2368 }
 0x88e   :  { %5677 = vmatmul.mubr.msk.bf16.vlgmr.msra.gmra.mrb[60].mxu1 %vm116_vm2, %v2369_v42 }
 0x88f   :  { %5687 = vmatpush3.bf16.msra.mxu1 %v7036_v44  ;;  %5688 = vmatprep.mubr.msk.bf16.mxu1 %vm6508_vm1, %v8328_v0 }
 0x890   :  { %5698 = vmatprep.subr.bf16.mxu1 %v8328_v0 }
 0x945   :  { %v2085_v29 = vpop.f32.mrb[48].mxu0 }
 0x946   :  { %v7226_v31 = vadd.f32 %v2085_v29, %v2029_v45  ;;  %v5636_v25 = vpop.f32.mrb[49].mxu0  ;;  %v2034_v45 = vld [vmem:[#allocation4 + $0x3a] sm:$0x3] }
 0x947   :  { %v2088_v32 = vpop.f32.mrb[50].mxu0 }
 0x948   :  { %6085 = vtanh.f32 %v7226_v31  ;;  %v5637_v14 = vpop.f32.mrb[51].mxu0 }
 0x949   :  { %v2131_v3 = vpop.f32.mrb[48].mxu1 }
 0x94a   :  { %v7229_v40 = vadd.f32 %v2131_v3, %v2030_v22  ;;  %v5642_v60 = vpop.f32.mrb[49].mxu1 }
 0x94b   :  { %v2134_v44 = vpop.f32.mrb[50].mxu1  ;;  %v2035_v60 = vld [vmem:[#allocation4 + $0x3c] sm:$0x3] }
 0x94c   :  { %6087 = vtanh.f32 %v7229_v40  ;;  %v5643_v58 = vpop.f32.mrb[51].mxu1 }
 0x94d   :  { %v2177_v4 = vpop.f32.mrb[52].mxu0 }
 0x94e   :  { %v2415_v54 = vadd.f32 %v2177_v4, %v2031_v37  ;;  %v5648_v56 = vpop.f32.mrb[53].mxu0 }
 0x94f   :  { %v2180_v43 = vpop.f32.mrb[54].mxu0 }
 0x950   :  { %6089 = vtanh.f32 %v2415_v54  ;;  %v5649_v59 = vpop.f32.mrb[55].mxu0 }
 0x951   :  { %v2223_v52 = vpop.f32.mrb[52].mxu1 }
 0x952   :  { %v6086_v41 = vpop.eup %6085  ;;  %v2416_v11 = vadd.f32 %v2223_v52, %v2032_v63  ;;  %v5654_v8 = vpop.f32.mrb[53].mxu1  ;;  %v2036_v63 = vld [vmem:[#allocation4 + $0x3e] sm:$0x3] }
 0x953   :  { %v2226_v48 = vpop.f32.mrb[54].mxu1  ;;  %2493 = vrot.lane.b32.xlu0 %v6086_v41, %s6509_s1 }
 0x954   :  { %6091 = vtanh.f32 %v2416_v11  ;;  %v5655_v46 = vpop.f32.mrb[55].mxu1 }
 0x955   :  { %v2269_v6 = vpop.f32.mrb[56].mxu0 }
 0x956   :  { %v6088_v47 = vpop.eup %6087  ;;  %v2417_v33 = vadd.f32 %v2269_v6, %v2033_v21  ;;  %v5660_v18 = vpop.f32.mrb[57].mxu0 }
 0x957   :  { %2495 = vrot.lane.b32.xlu1 %v6088_v47, %s6509_s1  ;;  %v2272_v42 = vpop.f32.mrb[58].mxu0 }
 0x958   :  { %6093 = vtanh.f32 %v2417_v33  ;;  %v5661_v29 = vpop.f32.mrb[59].mxu0  ;;  %v5288_v42 = vmul.f32 -1.442695, %v7226_v31 }
 0x959   :  { %v2315_v32 = vpop.f32.mrb[56].mxu1  ;;  %v5290_v29 = vmul.f32 -1.442695, %v2415_v54 }
 0x95a   :  { %v6090_v25 = vpop.eup %6089  ;;  %v2418_v22 = vadd.f32 %v2315_v32, %v2034_v45  ;;  %v5666_v14 = vpop.f32.mrb[57].mxu1  ;;  %v5289_v45 = vmul.f32 -1.442695, %v7229_v40 }
 0x95b   :  { %2497 = vrot.lane.b32.xlu0 %v6090_v25, %s6509_s1  ;;  %v2318_v3 = vpop.f32.mrb[58].mxu1  ;;  %v5291_v25 = vmul.f32 -1.442695, %v2416_v11 }
 0x95c   :  { %6095 = vtanh.f32 %v2418_v22  ;;  %v5667_v44 = vpop.f32.mrb[59].mxu1 }
 0x95d   :  { %v2361_v58 = vpop.f32.mrb[60].mxu0 }
 0x95e   :  { %v6092_v37 = vpop.eup %6091  ;;  %v2419_v4 = vadd.f32 %v2361_v58, %v2035_v60  ;;  %v5672_v56 = vpop.f32.mrb[61].mxu0  ;;  %v5292_v60 = vmul.f32 -1.442695, %v2417_v33  ;;  %v5293_v58 = vmul.f32 -1.442695, %v2418_v22 }
 0x95f   :  { %2499 = vrot.lane.b32.xlu1 %v6092_v37, %s6509_s1  ;;  %v2364_v43 = vpop.f32.mrb[62].mxu0 }
 0x960   :  { %6097 = vtanh.f32 %v2419_v4  ;;  %v5673_v59 = vpop.f32.mrb[63].mxu0  ;;  %v5294_v43 = vmul.f32 -1.442695, %v2419_v4 }
 0x961   :  { %v2407_v52 = vpop.f32.mrb[60].mxu1 }
 0x962   :  { %v6094_v41 = vpop.eup %6093  ;;  %v2420_v8 = vadd.f32 %v2407_v52, %v2036_v63  ;;  %v5678_v48 = vpop.f32.mrb[61].mxu1 }
 0x963   :  { %v2410_v46 = vpop.f32.mrb[62].mxu1  ;;  %2501 = vrot.lane.b32.xlu0 %v6094_v41, %s6509_s1 }
 0x964   :  { %6099 = vtanh.f32 %v2420_v8  ;;  %v5679_v21 = vpop.f32.mrb[63].mxu1  ;;  %v5295_v54 = vmul.f32 -1.442695, %v2420_v8 }
 0x965   :  { %6101 = vpow2.f32 %v5288_v42 }
 0x966   :  { %v6096_v47 = vpop.eup %6095  ;;  %6103 = vpow2.f32 %v5289_v45 }
 0x967   :  { %2503 = vrot.lane.b32.xlu1 %v6096_v47, %s6509_s1  ;;  %6105 = vpow2.f32 %v5290_v29 }
 0x968   :  { %6107 = vpow2.f32 %v5291_v25 }
 0x96a   :  { %v6098_v6 = vpop.eup %6097 }
 0x96b   :  { %2505 = vrot.lane.b32.xlu0 %v6098_v6, %s6509_s1 }
 0x96e   :  { %v6100_v18 = vpop.eup %6099 }
 0x96f   :  { %2507 = vrot.lane.b32.xlu1 %v6100_v18, %s6509_s1  ;;  %v6102_v32 = vpop.eup %6101 }
 0x970   :  { %v2445_v14 = vadd.f32 1.0, %v6102_v32  ;;  %v6104_v3 = vpop.eup %6103 }
 0x971   :  { %v2446_v44 = vadd.f32 1.0, %v6104_v3  ;;  %v6106_v37 = vpop.eup %6105 }
 0x972   :  { %6109 = vrcp.f32 %v2445_v14  ;;  %v2447_v56 = vadd.f32 1.0, %v6106_v37  ;;  %v6108_v31 = vpop.eup %6107 }
 0x973   :  { %6111 = vpow2.f32 %v5292_v60  ;;  %v2448_v40 = vadd.f32 1.0, %v6108_v31 }
 0x974   :  { %6113 = vrcp.f32 %v2446_v44 }
 0x975   :  { %6115 = vpow2.f32 %v5293_v58 }
 0x976   :  { %6117 = vrcp.f32 %v2447_v56 }
 0x977   :  { %6119 = vpow2.f32 %v5294_v43 }
 0x978   :  { %6121 = vrcp.f32 %v2448_v40 }
 0x979   :  { %6123 = vpow2.f32 %v5295_v54 }
 0x97c   :  { %v7242_v11 = vpop.eup %6109 }
 0x97d   :  { %v6112_v63 = vpop.eup %6111 }
 0x97e   :  { %v7245_v52 = vpop.eup %6113  ;;  %v2449_v22 = vadd.f32 1.0, %v6112_v63 }
 0x97f   :  { %v6116_v41 = vpop.eup %6115 }
 0x980   :  { %v7249_v46 = vpop.eup %6117  ;;  %6125 = vrcp.f32 %v2449_v22  ;;  %v2450_v8 = vadd.f32 1.0, %v6116_v41  ;;  %v2478_v41 = vmul.f32 %v7245_v52, %v7097_v20 }
 0x981   :  { %v6120_v21 = vpop.eup %6119 }
 0x982   :  { %v7253_v18 = vpop.eup %6121  ;;  %6127 = vrcp.f32 %v2450_v8  ;;  %v2451_v42 = vadd.f32 1.0, %v6120_v21  ;;  %v2479_v8 = vmul.f32 %v7249_v46, %v7102_v16 }
 0x983   :  { %v6124_v45 = vpop.eup %6123 }
 0x984   :  { %6129 = vrcp.f32 %v2451_v42  ;;  %v2452_v32 = vadd.f32 1.0, %v6124_v45 }
 0x986   :  { %6131 = vrcp.f32 %v2452_v32 }
 0x98a   :  { %v7258_v14 = vpop.eup %6125 }
 0x98b   :  { %v2481_v20 = vmul.f32 %v7258_v14, %v7113_v35 }
 0x98c   :  { %v7262_v44 = vpop.eup %6127 }
 0x98e   :  { %v7266_v56 = vpop.eup %6129 }
 0x98f   :  { %v2483_v35 = vmul.f32 %v7266_v56, %v7125_v34 }
 0x990   :  { %v7270_v40 = vpop.eup %6131 }
 0x9c5   :  { %v2494_v59 = vpop.permute.xlu0 %2493 }
 0x9c6   :  { %v2517_v33 = vmul.f32 %v7242_v11, %v2494_v59  ;;  %v2477_v59 = vmul.f32 %v7242_v11, %v7092_v9  ;;  %v2480_v9 = vmul.f32 %v7253_v18, %v7107_v50  ;;  %v2482_v50 = vmul.f32 %v7262_v44, %v7119_v24 }
 0x9c7   :  { %v2484_v24 = vmul.f32 %v7270_v40, %v7131_v49 }
 0x9c8   :  { %2533 = vrot.lane.b32.xlu0 %v2517_v33, %s6510_s8 }
 0x9c9   :  { %v2496_v48 = vpop.permute.xlu1 %2495 }
 0x9ca   :  { %v2518_v4 = vmul.f32 %v7245_v52, %v2496_v48 }
 0x9cc   :  { %2535 = vrot.lane.b32.xlu1 %v2518_v4, %s6510_s8 }
 0x9cd   :  { %v2498_v47 = vpop.permute.xlu0 %2497 }
 0x9ce   :  { %v2519_v6 = vmul.f32 %v7249_v46, %v2498_v47 }
 0x9d0   :  { %2537 = vrot.lane.b32.xlu0 %v2519_v6, %s6510_s8 }
 0x9d1   :  { %v2500_v29 = vpop.permute.xlu1 %2499 }
 0x9d2   :  { %v2520_v25 = vmul.f32 %v7253_v18, %v2500_v29 }
 0x9d4   :  { %2539 = vrot.lane.b32.xlu1 %v2520_v25, %s6510_s8 }
 0x9d5   :  { %v2502_v3 = vpop.permute.xlu0 %2501 }
 0x9d6   :  { %v2521_v60 = vmul.f32 %v7258_v14, %v2502_v3 }
 0x9d8   :  { %2541 = vrot.lane.b32.xlu0 %v2521_v60, %s6510_s8 }
 0x9d9   :  { %v2504_v37 = vpop.permute.xlu1 %2503 }
 0x9da   :  { %v2522_v58 = vmul.f32 %v7262_v44, %v2504_v37 }
 0x9dc   :  { %2543 = vrot.lane.b32.xlu1 %v2522_v58, %s6510_s8 }
 0x9dd   :  { %v2506_v31 = vpop.permute.xlu0 %2505 }
 0x9de   :  { %v2523_v43 = vmul.f32 %v7266_v56, %v2506_v31 }
 0x9e0   :  { %2545 = vrot.lane.b32.xlu0 %v2523_v43, %s6510_s8 }
 0x9e1   :  { %v2508_v54 = vpop.permute.xlu1 %2507 }
 0x9e2   :  { %v2524_v63 = vmul.f32 %v7270_v40, %v2508_v54 }
 0x9e4   :  { %2547 = vrot.lane.b32.xlu1 %v2524_v63, %s6510_s8 }
 0xa3a   :  { %v2534_v33 = vpop.permute.xlu0 %2533 }
 0xa3b   :  { %v7276_v22 = vadd.f32 %v2534_v33, %v2477_v59 }
 0xa3d   :  { %6133 = vtanh.f32 %v7276_v22 }
 0xa3e   :  { %v2536_v48 = vpop.permute.xlu1 %2535 }
 0xa3f   :  { %v7281_v4 = vadd.f32 %v2536_v48, %v2478_v41 }
 0xa41   :  { %6135 = vtanh.f32 %v7281_v4 }
 0xa42   :  { %v2538_v21 = vpop.permute.xlu0 %2537 }
 0xa43   :  { %v7286_v47 = vadd.f32 %v2538_v21, %v2479_v8 }
 0xa45   :  { %6137 = vtanh.f32 %v7286_v47 }
 0xa46   :  { %v2540_v6 = vpop.permute.xlu1 %2539 }
 0xa47   :  { %v6134_v42 = vpop.eup %6133  ;;  %v7291_v45 = vadd.f32 %v2540_v6, %v2480_v9 }
 0xa48   :  { %2581 = vrot.lane.b32.xlu0 %v6134_v42, %s6502_s19 }
 0xa49   :  { %6139 = vtanh.f32 %v7291_v45 }
 0xa4a   :  { %v2542_v29 = vpop.permute.xlu0 %2541 }
 0xa4b   :  { %v6136_v16 = vpop.eup %6135  ;;  %v7297_v25 = vadd.f32 %v2542_v29, %v2481_v20 }
 0xa4c   :  { %2583 = vrot.lane.b32.xlu1 %v6136_v16, %s6502_s19 }
 0xa4d   :  { %6141 = vtanh.f32 %v7297_v25 }
 0xa4e   :  { %v2544_v3 = vpop.permute.xlu1 %2543 }
 0xa4f   :  { %v6138_v32 = vpop.eup %6137  ;;  %v7303_v60 = vadd.f32 %v2544_v3, %v2482_v50 }
 0xa50   :  { %2585 = vrot.lane.b32.xlu0 %v6138_v32, %s6502_s19 }
 0xa51   :  { %6143 = vtanh.f32 %v7303_v60 }
 0xa52   :  { %v2546_v58 = vpop.permute.xlu0 %2545 }
 0xa53   :  { %v6140_v37 = vpop.eup %6139  ;;  %v7309_v31 = vadd.f32 %v2546_v58, %v2483_v35 }
 0xa54   :  { %2587 = vrot.lane.b32.xlu1 %v6140_v37, %s6502_s19 }
 0xa55   :  { %6145 = vtanh.f32 %v7309_v31 }
 0xa56   :  { %v2548_v43 = vpop.permute.xlu1 %2547 }
 0xa57   :  { %v6142_v54 = vpop.eup %6141  ;;  %v7315_v63 = vadd.f32 %v2548_v43, %v2484_v24 }
 0xa58   :  { %2589 = vrot.lane.b32.xlu0 %v6142_v54, %s6502_s19  ;;  %v7378_v54 = vld [vmem:[#allocation7 + $0x18] sm:$0xff]  }
 0xa59   :  { %6147 = vtanh.f32 %v7315_v63 }
 0xa5b   :  { %v6144_v34 = vpop.eup %6143 }
 0xa5c   :  { %2591 = vrot.lane.b32.xlu1 %v6144_v34, %s6502_s19 }
 0xa5f   :  { %v6146_v59 = vpop.eup %6145 }
 0xa60   :  { %2593 = vrot.lane.b32.xlu0 %v6146_v59, %s6502_s19  ;;  %v7385_v59 = vld [vmem:[#allocation7 + $0x20] sm:$0xff]  }
 0xa63   :  { %v6148_v33 = vpop.eup %6147 }
 0xa64   :  { %2595 = vrot.lane.b32.xlu1 %v6148_v33, %s6502_s19 }
 0xaba   :  { %v2582_v41 = vpop.permute.xlu0 %2581 }
 0xabb   :  { %v7323_v49 = vmul.f32 %v7242_v11, %v2582_v41  ;;  %v7392_v41 = vld [vmem:[#allocation7 + $0x28] sm:$0xff]  }
 0xabd   :  { %v2663_v48 = vpack.c.bf16 %v7323_v49, %v7323_v49 }
 0xabe   :  { %v2584_v8 = vpop.permute.xlu1 %2583 }
 0xabf   :  { %v7328_v21 = vmul.f32 %v7245_v52, %v2584_v8  ;;  %2672 = vrot.lane.b32.xlu0 %v2663_v48, %s6511_s9  ;;  %v7399_v8 = vld [vmem:[#allocation7 + $0x30] sm:$0xff]  }
 0xac1   :  { %v2664_v9 = vpack.c.bf16 %v7328_v21, %v7328_v21 }
 0xac2   :  { %v2586_v6 = vpop.permute.xlu0 %2585 }
 0xac3   :  { %v7334_v42 = vmul.f32 %v7249_v46, %v2586_v6  ;;  %2718 = vrot.lane.b32.xlu1 %v2664_v9, %s6511_s9  ;;  %v7406_v6 = vld [vmem:[#allocation7 + $0x38] sm:$0xff]  }
 0xac5   :  { %8352 = vst [vmem:[#allocation13_spill] sm:$0xff] %v7334_v42  ;;  %v2665_v11 = vpack.c.bf16 %v7334_v42, %v7334_v42 }
 0xac6   :  { %v2588_v20 = vpop.permute.xlu1 %2587 }
 0xac7   :  { %v7340_v16 = vmul.f32 %v7253_v18, %v2588_v20  ;;  %2764 = vrot.lane.b32.xlu0 %v2665_v11, %s6511_s9  ;;  %v7413_v20 = vld [vmem:[#allocation7] sm:$0xff]  }
 0xac9   :  { %8353 = vst [vmem:[#allocation14_spill] sm:$0xff] %v7340_v16  ;;  %v2666_v52 = vpack.c.bf16 %v7340_v16, %v7340_v16 }
 0xaca   :  { %v2590_v29 = vpop.permute.xlu0 %2589 }
 0xacb   :  { %2810 = vrot.lane.b32.xlu1 %v2666_v52, %s6511_s9  ;;  %v7347_v46 = vmul.f32 %v7258_v14, %v2590_v29  ;;  %v7420_v29 = vld [vmem:[#allocation7 + $0x8] sm:$0xff]  }
 0xacd   :  { %8354 = vst [vmem:[#allocation15_spill] sm:$0xff] %v7347_v46  ;;  %v2667_v50 = vpack.c.bf16 %v7347_v46, %v7347_v46 }
 0xace   :  { %v2592_v32 = vpop.permute.xlu1 %2591 }
 0xacf   :  { %v7352_v3 = vmul.f32 %v7262_v44, %v2592_v32  ;;  %2856 = vrot.lane.b32.xlu0 %v2667_v50, %s6511_s9  ;;  %v2655_v50 = vld [vmem:[#allocation4 + $0x40] sm:$0x3] }
 0xad1   :  { %8355 = vst [vmem:[#allocation16_spill] sm:$0xff] %v7352_v3  ;;  %v2668_v18 = vpack.c.bf16 %v7352_v3, %v7352_v3 }
 0xad2   :  { %v2594_v35 = vpop.permute.xlu0 %2593 }
 0xad3   :  { %v7358_v37 = vmul.f32 %v7266_v56, %v2594_v35  ;;  %2902 = vrot.lane.b32.xlu1 %v2668_v18, %s6511_s9  ;;  %v7371_v56 = vld [vmem:[#allocation7 + $0x10] sm:$0xff]  }
 0xad5   :  { %8356 = vst [vmem:[#allocation17_spill] sm:$0xff] %v7358_v37  ;;  %v2669_v14 = vpack.c.bf16 %v7358_v37, %v7358_v37 }
 0xad6   :  { %v2596_v58 = vpop.permute.xlu1 %2595 }
 0xad7   :  { %v7364_v24 = vmul.f32 %v7270_v40, %v2596_v58  ;;  %2948 = vrot.lane.b32.xlu0 %v2669_v14, %s6511_s9  ;;  %v2656_v58 = vld [vmem:[#allocation4 + $0x42] sm:$0x3] }
 0xad9   :  { %8357 = vst [vmem:[#allocation18_spill] sm:$0xff] %v7364_v24  ;;  %v2670_v44 = vpack.c.bf16 %v7364_v24, %v7364_v24 }
 0xadb   :  { %2994 = vrot.lane.b32.xlu1 %v2670_v44, %s6511_s9 }
 0xb31   :  { %v2673_v43 = vpop.permute.xlu0 %2672 }
 0xb32   :  { %5683 = vmatmul.mubr.msk.bf16.vlgmr.msra.gmra.mrb[64].mxu0 %vm116_vm2, %v2673_v43 }
 0xb33   :  { %5693 = vmatpush3.bf16.msra.mxu0 %v7371_v56  ;;  %5694 = vmatprep.mubr.msk.bf16.mxu0 %vm6508_vm1, %v8328_v0 }
 0xb34   :  { %5704 = vmatprep.subr.bf16.mxu0 %v8328_v0 }
 0xb35   :  { %v2719_v40 = vpop.permute.xlu1 %2718 }
 0xb36   :  { %5689 = vmatmul.mubr.msk.bf16.vlgmr.msra.gmra.mrb[64].mxu1 %vm116_vm2, %v2719_v40 }
 0xb37   :  { %5699 = vmatpush3.bf16.msra.mxu1 %v7378_v54  ;;  %5700 = vmatprep.mubr.msk.bf16.mxu1 %vm6508_vm1, %v8328_v0 }
 0xb38   :  { %5710 = vmatprep.subr.bf16.mxu1 %v8328_v0 }
 0xb39   :  { %v2765_v34 = vpop.permute.xlu0 %2764 }
 0xb3a   :  { %5695 = vmatmul.mubr.msk.bf16.vlgmr.msra.gmra.mrb[68].mxu0 %vm116_vm2, %v2765_v34 }
 0xb3b   :  { %5705 = vmatpush3.bf16.msra.mxu0 %v7385_v59  ;;  %5706 = vmatprep.mubr.msk.bf16.mxu0 %vm6508_vm1, %v8328_v0 }
 0xb3c   :  { %5716 = vmatprep.subr.bf16.mxu0 %v8328_v0 }
 0xb3d   :  { %v2811_v33 = vpop.permute.xlu1 %2810 }
 0xb3e   :  { %5701 = vmatmul.mubr.msk.bf16.vlgmr.msra.gmra.mrb[68].mxu1 %vm116_vm2, %v2811_v33 }
 0xb3f   :  { %5711 = vmatpush3.bf16.msra.mxu1 %v7392_v41  ;;  %5712 = vmatprep.mubr.msk.bf16.mxu1 %vm6508_vm1, %v8328_v0 }
 0xb40   :  { %5722 = vmatprep.subr.bf16.mxu1 %v8328_v0 }
 0xb41   :  { %v2857_v48 = vpop.permute.xlu0 %2856 }
 0xb42   :  { %5707 = vmatmul.mubr.msk.bf16.vlgmr.msra.gmra.mrb[72].mxu0 %vm116_vm2, %v2857_v48  ;;  %v2657_v48 = vld [vmem:[#allocation4 + $0x44] sm:$0x3] }
 0xb43   :  { %5717 = vmatpush3.bf16.msra.mxu0 %v7399_v8  ;;  %5718 = vmatprep.mubr.msk.bf16.mxu0 %vm6508_vm1, %v8328_v0 }
 0xb44   :  { %5728 = vmatprep.subr.bf16.mxu0 %v8328_v0 }
 0xb45   :  { %v2903_v9 = vpop.permute.xlu1 %2902 }
 0xb46   :  { %5713 = vmatmul.mubr.msk.bf16.vlgmr.msra.gmra.mrb[72].mxu1 %vm116_vm2, %v2903_v9 }
 0xb47   :  { %5723 = vmatpush3.bf16.msra.mxu1 %v7406_v6  ;;  %5724 = vmatprep.mubr.msk.bf16.mxu1 %vm6508_vm1, %v8328_v0 }
 0xb48   :  { %5734 = vmatprep.subr.bf16.mxu1 %v8328_v0 }
 0xb49   :  { %v2949_v11 = vpop.permute.xlu0 %2948 }
 0xb4a   :  { %5719 = vmatmul.mubr.msk.bf16.vlgmr.msra.gmra.mrb[76].mxu0 %vm116_vm2, %v2949_v11 }
 0xb4b   :  { %5729 = vmatpush3.bf16.msra.mxu0 %v7413_v20  ;;  %5730 = vmatprep.mubr.msk.bf16.mxu0 %vm6508_vm1, %v8328_v0 }
 0xb4c   :  { %5740 = vmatprep.subr.bf16.mxu0 %v8328_v0 }
 0xb4d   :  { %v2995_v52 = vpop.permute.xlu1 %2994 }
 0xb4e   :  { %5725 = vmatmul.mubr.msk.bf16.vlgmr.msra.gmra.mrb[76].mxu1 %vm116_vm2, %v2995_v52 }
 0xb4f   :  { %5735 = vmatpush3.bf16.msra.mxu1 %v7420_v29  ;;  %5736 = vmatprep.mubr.msk.bf16.mxu1 %vm6508_vm1, %v8328_v0 }
 0xb50   :  { %5746 = vmatprep.subr.bf16.mxu1 %v8328_v0 }
 0xc05   :  { %v2711_v32 = vpop.f32.mrb[64].mxu0 }
 0xc06   :  { %v7426_v18 = vadd.f32 %v2711_v32, %v2655_v50  ;;  %v5684_v35 = vpop.f32.mrb[65].mxu0  ;;  %v2658_v32 = vld [vmem:[#allocation4 + $0x46] sm:$0x3] }
 0xc07   :  { %v2714_v14 = vpop.f32.mrb[66].mxu0 }
 0xc08   :  { %6149 = vtanh.f32 %v7426_v18  ;;  %v5685_v44 = vpop.f32.mrb[67].mxu0 }
 0xc09   :  { %v2757_v43 = vpop.f32.mrb[64].mxu1 }
 0xc0a   :  { %v7429_v40 = vadd.f32 %v2757_v43, %v2656_v58  ;;  %v5690_v34 = vpop.f32.mrb[65].mxu1  ;;  %v2659_v43 = vld [vmem:[#allocation4 + $0x48] sm:$0x3] }
 0xc0b   :  { %v2760_v33 = vpop.f32.mrb[66].mxu1 }
 0xc0c   :  { %6151 = vtanh.f32 %v7429_v40  ;;  %v5691_v9 = vpop.f32.mrb[67].mxu1 }
 0xc0d   :  { %v2803_v11 = vpop.f32.mrb[68].mxu0 }
 0xc0e   :  { %v3041_v52 = vadd.f32 %v2803_v11, %v2657_v48  ;;  %v5696_v0 = vpop.f32.mrb[69].mxu0  ;;  %v2660_v48 = vld [vmem:[#allocation4 + $0x4a] sm:$0x3] }
 0xc0f   :  { %v2806_v50 = vpop.f32.mrb[70].mxu0 }
 0xc10   :  { %6153 = vtanh.f32 %v3041_v52  ;;  %v5697_v35 = vpop.f32.mrb[71].mxu0 }
 0xc11   :  { %v2849_v14 = vpop.f32.mrb[68].mxu1 }
 0xc12   :  { %v6150_v24 = vpop.eup %6149  ;;  %v3042_v37 = vadd.f32 %v2849_v14, %v2658_v32  ;;  %v5702_v44 = vpop.f32.mrb[69].mxu1 }
 0xc13   :  { %v2852_v3 = vpop.f32.mrb[70].mxu1  ;;  %3119 = vrot.lane.b32.xlu0 %v6150_v24, %s6509_s1  ;;  %v2661_v24 = vld [vmem:[#allocation4 + $0x4c] sm:$0x3] }
 0xc14   :  { %6155 = vtanh.f32 %v3042_v37  ;;  %v5703_v58 = vpop.f32.mrb[71].mxu1 }
 0xc15   :  { %v2895_v33 = vpop.f32.mrb[72].mxu0 }
 0xc16   :  { %v6152_v34 = vpop.eup %6151  ;;  %v3043_v9 = vadd.f32 %v2895_v33, %v2659_v43  ;;  %v5708_v46 = vpop.f32.mrb[73].mxu0  ;;  %v2662_v33 = vld [vmem:[#allocation4 + $0x4e] sm:$0x3] }
 0xc17   :  { %3121 = vrot.lane.b32.xlu1 %v6152_v34, %s6509_s1  ;;  %v2898_v0 = vpop.f32.mrb[74].mxu0 }
 0xc18   :  { %6157 = vtanh.f32 %v3043_v9  ;;  %v5709_v11 = vpop.f32.mrb[75].mxu0 }
 0xc19   :  { %v2941_v35 = vpop.f32.mrb[72].mxu1 }
 0xc1a   :  { %v6154_v50 = vpop.eup %6153  ;;  %v3044_v32 = vadd.f32 %v2941_v35, %v2660_v48  ;;  %v5714_v14 = vpop.f32.mrb[73].mxu1 }
 0xc1b   :  { %3123 = vrot.lane.b32.xlu0 %v6154_v50, %s6509_s1  ;;  %v2944_v3 = vpop.f32.mrb[74].mxu1 }
 0xc1c   :  { %6159 = vtanh.f32 %v3044_v32  ;;  %v5715_v44 = vpop.f32.mrb[75].mxu1 }
 0xc1d   :  { %v2987_v16 = vpop.f32.mrb[76].mxu0  ;;  %v5304_v44 = vmul.f32 -1.442695, %v7426_v18 }
 0xc1e   :  { %v6156_v58 = vpop.eup %6155  ;;  %v3045_v43 = vadd.f32 %v2987_v16, %v2661_v24  ;;  %v5720_v46 = vpop.f32.mrb[77].mxu0 }
 0xc1f   :  { %3125 = vrot.lane.b32.xlu1 %v6156_v58, %s6509_s1  ;;  %v2990_v34 = vpop.f32.mrb[78].mxu0  ;;  %v5305_v58 = vmul.f32 -1.442695, %v7429_v40  ;;  %v5306_v46 = vmul.f32 -1.442695, %v3041_v52 }
 0xc20   :  { %6161 = vtanh.f32 %v3045_v43  ;;  %v5721_v0 = vpop.f32.mrb[79].mxu0 }
 0xc21   :  { %v3033_v11 = vpop.f32.mrb[76].mxu1 }
 0xc22   :  { %v6158_v42 = vpop.eup %6157  ;;  %v3046_v48 = vadd.f32 %v3033_v11, %v2662_v33  ;;  %v5726_v35 = vpop.f32.mrb[77].mxu1  ;;  %v5308_v11 = vmul.f32 -1.442695, %v3043_v9 }
 0xc23   :  { %v3036_v14 = vpop.f32.mrb[78].mxu1  ;;  %3127 = vrot.lane.b32.xlu0 %v6158_v42, %s6509_s1  ;;  %v5307_v42 = vmul.f32 -1.442695, %v3042_v37 }
 0xc24   :  { %6163 = vtanh.f32 %v3046_v48  ;;  %v5727_v50 = vpop.f32.mrb[79].mxu1  ;;  %v5311_v52 = vmul.f32 -1.442695, %v3046_v48 }
 0xc25   :  { %6165 = vpow2.f32 %v5304_v44  ;;  %v5309_v50 = vmul.f32 -1.442695, %v3044_v32 }
 0xc26   :  { %v6160_v3 = vpop.eup %6159  ;;  %6167 = vpow2.f32 %v5305_v58 }
 0xc27   :  { %3129 = vrot.lane.b32.xlu1 %v6160_v3, %s6509_s1  ;;  %6169 = vpow2.f32 %v5306_v46 }
 0xc28   :  { %6171 = vpow2.f32 %v5307_v42 }
 0xc2a   :  { %v6162_v16 = vpop.eup %6161 }
 0xc2b   :  { %3131 = vrot.lane.b32.xlu0 %v6162_v16, %s6509_s1  ;;  %v5310_v16 = vmul.f32 -1.442695, %v3045_v43 }
 0xc2e   :  { %v6164_v24 = vpop.eup %6163 }
 0xc2f   :  { %3133 = vrot.lane.b32.xlu1 %v6164_v24, %s6509_s1  ;;  %v6166_v34 = vpop.eup %6165 }
 0xc30   :  { %v3071_v33 = vadd.f32 1.0, %v6166_v34  ;;  %v6168_v0 = vpop.eup %6167 }
 0xc31   :  { %v3072_v35 = vadd.f32 1.0, %v6168_v0  ;;  %v6170_v14 = vpop.eup %6169 }
 0xc32   :  { %6173 = vrcp.f32 %v3071_v33  ;;  %v3073_v3 = vadd.f32 1.0, %v6170_v14  ;;  %v6172_v18 = vpop.eup %6171 }
 0xc33   :  { %6175 = vpow2.f32 %v5308_v11  ;;  %v3074_v40 = vadd.f32 1.0, %v6172_v18 }
 0xc34   :  { %6177 = vrcp.f32 %v3072_v35 }
 0xc35   :  { %6179 = vpow2.f32 %v5309_v50 }
 0xc36   :  { %6181 = vrcp.f32 %v3073_v3 }
 0xc37   :  { %6183 = vpow2.f32 %v5310_v16 }
 0xc38   :  { %6185 = vrcp.f32 %v3074_v40 }
 0xc39   :  { %6187 = vpow2.f32 %v5311_v52 }
 0xc3c   :  { %v7442_v37 = vpop.eup %6173 }
 0xc3d   :  { %v6176_v24 = vpop.eup %6175 }
 0xc3e   :  { %v7445_v58 = vpop.eup %6177  ;;  %v3075_v32 = vadd.f32 1.0, %v6176_v24 }
 0xc3f   :  { %v6180_v46 = vpop.eup %6179 }
 0xc40   :  { %v7449_v34 = vpop.eup %6181  ;;  %6189 = vrcp.f32 %v3075_v32  ;;  %v3076_v48 = vadd.f32 1.0, %v6180_v46 }
 0xc41   :  { %v6184_v33 = vpop.eup %6183 }
 0xc42   :  { %v7453_v35 = vpop.eup %6185  ;;  %6191 = vrcp.f32 %v3076_v48  ;;  %v3077_v14 = vadd.f32 1.0, %v6184_v33 }
 0xc43   :  { %v6188_v50 = vpop.eup %6187 }
 0xc44   :  { %6193 = vrcp.f32 %v3077_v14  ;;  %v3078_v16 = vadd.f32 1.0, %v6188_v50 }
 0xc46   :  { %6195 = vrcp.f32 %v3078_v16 }
 0xc4a   :  { %v7458_v40 = vpop.eup %6189 }
 0xc85   :  { %v3120_v44 = vpop.permute.xlu0 %3119 }
 0xc86   :  { %v3143_v9 = vmul.f32 %v7442_v37, %v3120_v44  ;;  %v7462_v44 = vpop.eup %6191 }
 0xc87   :  { %v7466_v46 = vpop.eup %6193 }
 0xc88   :  { %3159 = vrot.lane.b32.xlu0 %v3143_v9, %s6510_s8  ;;  %v7470_v48 = vpop.eup %6195 }
 0xc89   :  { %v3122_v42 = vpop.permute.xlu1 %3121 }
 0xc8a   :  { %v3144_v43 = vmul.f32 %v7445_v58, %v3122_v42 }
 0xc8c   :  { %3161 = vrot.lane.b32.xlu1 %v3144_v43, %s6510_s8 }
 0xc8d   :  { %v3124_v0 = vpop.permute.xlu0 %3123 }
 0xc8e   :  { %v3145_v11 = vmul.f32 %v7449_v34, %v3124_v0 }
 0xc90   :  { %3163 = vrot.lane.b32.xlu0 %v3145_v11, %s6510_s8  ;;  %v3103_v11 = vmul.f32 %v7442_v37, %v7276_v22  ;;  %v3106_v22 = vmul.f32 %v7453_v35, %v7291_v45  ;;  %v3108_v45 = vmul.f32 %v7462_v44, %v7303_v60  ;;  %v3110_v60 = vmul.f32 %v7470_v48, %v7315_v63 }
 0xc91   :  { %v3126_v3 = vpop.permute.xlu1 %3125 }
 0xc92   :  { %v3146_v18 = vmul.f32 %v7453_v35, %v3126_v3  ;;  %v3104_v3 = vmul.f32 %v7445_v58, %v7281_v4  ;;  %v3107_v4 = vmul.f32 %v7458_v40, %v7297_v25  ;;  %v3109_v25 = vmul.f32 %v7466_v46, %v7309_v31 }
 0xc94   :  { %3165 = vrot.lane.b32.xlu1 %v3146_v18, %s6510_s8 }
 0xc95   :  { %v3128_v52 = vpop.permute.xlu0 %3127 }
 0xc96   :  { %v3147_v24 = vmul.f32 %v7458_v40, %v3128_v52  ;;  %v3105_v52 = vmul.f32 %v7449_v34, %v7286_v47 }
 0xc98   :  { %3167 = vrot.lane.b32.xlu0 %v3147_v24, %s6510_s8 }
 0xc99   :  { %v3130_v9 = vpop.permute.xlu1 %3129 }
 0xc9a   :  { %v3148_v32 = vmul.f32 %v7462_v44, %v3130_v9 }
 0xc9c   :  { %3169 = vrot.lane.b32.xlu1 %v3148_v32, %s6510_s8 }
 0xc9d   :  { %v3132_v42 = vpop.permute.xlu0 %3131 }
 0xc9e   :  { %v3149_v43 = vmul.f32 %v7466_v46, %v3132_v42 }
 0xca0   :  { %3171 = vrot.lane.b32.xlu0 %v3149_v43, %s6510_s8 }
 0xca1   :  { %v3134_v33 = vpop.permute.xlu1 %3133 }
 0xca2   :  { %v3150_v0 = vmul.f32 %v7470_v48, %v3134_v33 }
 0xca4   :  { %3173 = vrot.lane.b32.xlu1 %v3150_v0, %s6510_s8 }
 0xcfa   :  { %v3160_v14 = vpop.permute.xlu0 %3159 }
 0xcfb   :  { %v7476_v50 = vadd.f32 %v3160_v14, %v3103_v11 }
 0xcfd   :  { %6197 = vtanh.f32 %v7476_v50 }
 0xcfe   :  { %v3162_v18 = vpop.permute.xlu1 %3161 }
 0xcff   :  { %v7481_v16 = vadd.f32 %v3162_v18, %v3104_v3 }
 0xd01   :  { %6199 = vtanh.f32 %v7481_v16 }
 0xd02   :  { %v3164_v24 = vpop.permute.xlu0 %3163 }
 0xd03   :  { %v7486_v9 = vadd.f32 %v3164_v24, %v3105_v52 }
 0xd05   :  { %6201 = vtanh.f32 %v7486_v9 }
 0xd06   :  { %v3166_v32 = vpop.permute.xlu1 %3165 }
 0xd07   :  { %v6198_v42 = vpop.eup %6197  ;;  %v7491_v43 = vadd.f32 %v3166_v32, %v3106_v22 }
 0xd08   :  { %3207 = vrot.lane.b32.xlu0 %v6198_v42, %s6502_s19 }
 0xd09   :  { %6203 = vtanh.f32 %v7491_v43 }
 0xd0a   :  { %v3168_v33 = vpop.permute.xlu0 %3167 }
 0xd0b   :  { %v6200_v47 = vpop.eup %6199  ;;  %v7497_v0 = vadd.f32 %v3168_v33, %v3107_v4 }
 0xd0c   :  { %3209 = vrot.lane.b32.xlu1 %v6200_v47, %s6502_s19 }
 0xd0d   :  { %6205 = vtanh.f32 %v7497_v0 }
 0xd0e   :  { %v3170_v14 = vpop.permute.xlu1 %3169 }
 0xd0f   :  { %v6202_v11 = vpop.eup %6201  ;;  %v7503_v3 = vadd.f32 %v3170_v14, %v3108_v45 }
 0xd10   :  { %3211 = vrot.lane.b32.xlu0 %v6202_v11, %s6502_s19 }
 0xd11   :  { %6207 = vtanh.f32 %v7503_v3 }
 0xd12   :  { %v3172_v52 = vpop.permute.xlu0 %3171 }
 0xd13   :  { %v6204_v18 = vpop.eup %6203  ;;  %v7509_v24 = vadd.f32 %v3172_v52, %v3109_v25 }
 0xd14   :  { %3213 = vrot.lane.b32.xlu1 %v6204_v18, %s6502_s19 }
 0xd15   :  { %6209 = vtanh.f32 %v7509_v24 }
 0xd16   :  { %v3174_v22 = vpop.permute.xlu1 %3173 }
 0xd17   :  { %v6206_v32 = vpop.eup %6205  ;;  %v7515_v42 = vadd.f32 %v3174_v22, %v3110_v60 }
 0xd18   :  { %3215 = vrot.lane.b32.xlu0 %v6206_v32, %s6502_s19 }
 0xd19   :  { %6211 = vtanh.f32 %v7515_v42 }
 0xd1b   :  { %v6208_v31 = vpop.eup %6207 }
 0xd1c   :  { %3217 = vrot.lane.b32.xlu1 %v6208_v31, %s6502_s19 }
 0xd1f   :  { %v6210_v4 = vpop.eup %6209 }
 0xd20   :  { %3219 = vrot.lane.b32.xlu0 %v6210_v4, %s6502_s19 }
 0xd23   :  { %v6212_v47 = vpop.eup %6211 }
 0xd24   :  { %3221 = vrot.lane.b32.xlu1 %v6212_v47, %s6502_s19 }
 0xd7a   :  { %v3208_v33 = vpop.permute.xlu0 %3207 }
 0xd7b   :  { %v7523_v63 = vmul.f32 %v7442_v37, %v3208_v33 }
 0xd7d   :  { %v3289_v45 = vpack.c.bf16 %v7523_v63, %v7523_v63 }
 0xd7e   :  { %v3210_v11 = vpop.permute.xlu1 %3209 }
 0xd7f   :  { %v7528_v14 = vmul.f32 %v7445_v58, %v3210_v11  ;;  %3298 = vrot.lane.b32.xlu0 %v3289_v45, %s6511_s9 }
 0xd81   :  { %8358 = vst [vmem:[#allocation19_spill] sm:$0xff] %v7528_v14  ;;  %v3290_v25 = vpack.c.bf16 %v7528_v14, %v7528_v14 }
 0xd82   :  { %v3212_v18 = vpop.permute.xlu0 %3211 }
 0xd83   :  { %v7534_v52 = vmul.f32 %v7449_v34, %v3212_v18  ;;  %3344 = vrot.lane.b32.xlu1 %v3290_v25, %s6511_s9 }
 0xd85   :  { %8359 = vst [vmem:[#allocation20_spill] sm:$0xff] %v7534_v52  ;;  %v3291_v37 = vpack.c.bf16 %v7534_v52, %v7534_v52 }
 0xd86   :  { %v3214_v60 = vpop.permute.xlu1 %3213 }
 0xd87   :  { %v7540_v22 = vmul.f32 %v7453_v35, %v3214_v60  ;;  %3390 = vrot.lane.b32.xlu0 %v3291_v37, %s6511_s9 }
 0xd89   :  { %8360 = vst [vmem:[#allocation21_spill] sm:$0xff] %v7540_v22  ;;  %v3292_v58 = vpack.c.bf16 %v7540_v22, %v7540_v22 }
 0xd8a   :  { %v3216_v32 = vpop.permute.xlu0 %3215 }
 0xd8b   :  { %3436 = vrot.lane.b32.xlu1 %v3292_v58, %s6511_s9  ;;  %v7547_v34 = vmul.f32 %v7458_v40, %v3216_v32 }
 0xd8d   :  { %8361 = vst [vmem:[#allocation22_spill] sm:$0xff] %v7547_v34  ;;  %v3293_v31 = vpack.c.bf16 %v7547_v34, %v7547_v34 }
 0xd8e   :  { %v3218_v4 = vpop.permute.xlu1 %3217 }
 0xd8f   :  { %v7552_v47 = vmul.f32 %v7462_v44, %v3218_v4  ;;  %3482 = vrot.lane.b32.xlu0 %v3293_v31, %s6511_s9  ;;  %v3282_v31 = vld [vmem:[#allocation4 + $0x52] sm:$0x3] }
 0xd91   :  { %8362 = vst [vmem:[#allocation23_spill] sm:$0xff] %v7552_v47  ;;  %v3294_v35 = vpack.c.bf16 %v7552_v47, %v7552_v47 }
 0xd92   :  { %v3220_v33 = vpop.permute.xlu0 %3219 }
 0xd93   :  { %v7558_v45 = vmul.f32 %v7466_v46, %v3220_v33  ;;  %3528 = vrot.lane.b32.xlu1 %v3294_v35, %s6511_s9  ;;  %v8365_v46 = vmov 0.0  }
 0xd95   :  { %8363 = vst [vmem:[#allocation24_spill] sm:$0xff] %v7558_v45  ;;  %v3295_v40 = vpack.c.bf16 %v7558_v45, %v7558_v45 }
 0xd96   :  { %v3222_v11 = vpop.permute.xlu1 %3221 }
 0xd97   :  { %v7564_v25 = vmul.f32 %v7470_v48, %v3222_v11  ;;  %3574 = vrot.lane.b32.xlu0 %v3295_v40, %s6511_s9  ;;  %v3283_v11 = vld [vmem:[#allocation4 + $0x54] sm:$0x3] }
 0xd99   :  { %8364 = vst [vmem:[#allocation25_spill] sm:$0xff] %v7564_v25  ;;  %v3296_v44 = vpack.c.bf16 %v7564_v25, %v7564_v25 }
 0xd9b   :  { %3620 = vrot.lane.b32.xlu1 %v3296_v44, %s6511_s9 }
 0xdf1   :  { %v3299_v18 = vpop.permute.xlu0 %3298 }
 0xdf2   :  { %5731 = vmatmul.mubr.msk.bf16.vlgmr.msra.gmra.mrb[80].mxu0 %vm116_vm2, %v3299_v18 }
 0xdf3   :  { %5741 = vmatpush3.bf16.msra.mxu0 %v7371_v56  ;;  %5742 = vmatprep.mubr.msk.bf16.mxu0 %vm6508_vm1, %v8365_v46 }
 0xdf4   :  { %5752 = vmatprep.subr.bf16.mxu0 %v8365_v46 }
 0xdf5   :  { %v3345_v37 = vpop.permute.xlu1 %3344 }
 0xdf6   :  { %5737 = vmatmul.mubr.msk.bf16.vlgmr.msra.gmra.mrb[80].mxu1 %vm116_vm2, %v3345_v37 }
 0xdf7   :  { %5747 = vmatpush3.bf16.msra.mxu1 %v7378_v54  ;;  %5748 = vmatprep.mubr.msk.bf16.mxu1 %vm6508_vm1, %v8365_v46 }
 0xdf8   :  { %5758 = vmatprep.subr.bf16.mxu1 %v8365_v46 }
 0xdf9   :  { %v3391_v48 = vpop.permute.xlu0 %3390 }
 0xdfa   :  { %5743 = vmatmul.mubr.msk.bf16.vlgmr.msra.gmra.mrb[84].mxu0 %vm116_vm2, %v3391_v48 }
 0xdfb   :  { %5753 = vmatpush3.bf16.msra.mxu0 %v7385_v59  ;;  %5754 = vmatprep.mubr.msk.bf16.mxu0 %vm6508_vm1, %v8365_v46 }
 0xdfc   :  { %5764 = vmatprep.subr.bf16.mxu0 %v8365_v46 }
 0xdfd   :  { %v3437_v56 = vpop.permute.xlu1 %3436 }
 0xdfe   :  { %5749 = vmatmul.mubr.msk.bf16.vlgmr.msra.gmra.mrb[84].mxu1 %vm116_vm2, %v3437_v56 }
 0xdff   :  { %5759 = vmatpush3.bf16.msra.mxu1 %v7392_v41  ;;  %5760 = vmatprep.mubr.msk.bf16.mxu1 %vm6508_vm1, %v8365_v46 }
 0xe00   :  { %5770 = vmatprep.subr.bf16.mxu1 %v8365_v46 }
 0xe01   :  { %v3483_v54 = vpop.permute.xlu0 %3482 }
 0xe02   :  { %5755 = vmatmul.mubr.msk.bf16.vlgmr.msra.gmra.mrb[88].mxu0 %vm116_vm2, %v3483_v54  ;;  %v3284_v54 = vld [vmem:[#allocation4 + $0x56] sm:$0x3] }
 0xe03   :  { %5765 = vmatpush3.bf16.msra.mxu0 %v7399_v8  ;;  %5766 = vmatprep.mubr.msk.bf16.mxu0 %vm6508_vm1, %v8365_v46 }
 0xe04   :  { %5776 = vmatprep.subr.bf16.mxu0 %v8365_v46 }
 0xe05   :  { %v3529_v59 = vpop.permute.xlu1 %3528 }
 0xe06   :  { %5761 = vmatmul.mubr.msk.bf16.vlgmr.msra.gmra.mrb[88].mxu1 %vm116_vm2, %v3529_v59 }
 0xe07   :  { %5771 = vmatpush3.bf16.msra.mxu1 %v7406_v6  ;;  %5772 = vmatprep.mubr.msk.bf16.mxu1 %vm6508_vm1, %v8365_v46  ;;  %v3281_v6 = vld [vmem:[#allocation4 + $0x50] sm:$0x3] }
 0xe08   :  { %5782 = vmatprep.subr.bf16.mxu1 %v8365_v46 }
 0xe09   :  { %v3575_v41 = vpop.permute.xlu0 %3574 }
 0xe0a   :  { %5767 = vmatmul.mubr.msk.bf16.vlgmr.msra.gmra.mrb[92].mxu0 %vm116_vm2, %v3575_v41 }
 0xe0b   :  { %5777 = vmatpush3.bf16.msra.mxu0 %v7413_v20  ;;  %5778 = vmatprep.mubr.msk.bf16.mxu0 %vm6508_vm1, %v8365_v46 }
 0xe0c   :  { %5788 = vmatprep.subr.bf16.mxu0 %v8365_v46 }
 0xe0d   :  { %v3621_v8 = vpop.permute.xlu1 %3620 }
 0xe0e   :  { %5773 = vmatmul.mubr.msk.bf16.vlgmr.msra.gmra.mrb[92].mxu1 %vm116_vm2, %v3621_v8 }
 0xe0f   :  { %5783 = vmatpush3.bf16.msra.mxu1 %v7420_v29  ;;  %5784 = vmatprep.mubr.msk.bf16.mxu1 %vm6508_vm1, %v8365_v46 }
 0xe10   :  { %5794 = vmatprep.subr.bf16.mxu1 %v8365_v46 }
 0xec5   :  { %v3337_v60 = vpop.f32.mrb[80].mxu0 }
 0xec6   :  { %v7610_v58 = vadd.f32 %v3337_v60, %v3281_v6  ;;  %v5732_v20 = vpop.f32.mrb[81].mxu0 }
 0xec7   :  { %v3340_v32 = vpop.f32.mrb[82].mxu0 }
 0xec8   :  { %6213 = vtanh.f32 %v7610_v58  ;;  %v5733_v4 = vpop.f32.mrb[83].mxu0 }
 0xec9   :  { %v3383_v35 = vpop.f32.mrb[80].mxu1 }
 0xeca   :  { %v7613_v33 = vadd.f32 %v3383_v35, %v3282_v31  ;;  %v5738_v40 = vpop.f32.mrb[81].mxu1  ;;  %v3285_v31 = vld [vmem:[#allocation4 + $0x58] sm:$0x3] }
 0xecb   :  { %v3386_v29 = vpop.f32.mrb[82].mxu1 }
 0xecc   :  { %6215 = vtanh.f32 %v7613_v33  ;;  %v5739_v44 = vpop.f32.mrb[83].mxu1 }
 0xecd   :  { %v3429_v18 = vpop.f32.mrb[84].mxu0  ;;  %v3286_v44 = vld [vmem:[#allocation4 + $0x5a] sm:$0x3] }
 0xece   :  { %v3667_v37 = vadd.f32 %v3429_v18, %v3283_v11  ;;  %v5744_v48 = vpop.f32.mrb[85].mxu0 }
 0xecf   :  { %v3432_v56 = vpop.f32.mrb[86].mxu0 }
 0xed0   :  { %6217 = vtanh.f32 %v3667_v37  ;;  %v5745_v59 = vpop.f32.mrb[87].mxu0 }
 0xed1   :  { %v3475_v41 = vpop.f32.mrb[84].mxu1 }
 0xed2   :  { %v6214_v8 = vpop.eup %6213  ;;  %v3668_v6 = vadd.f32 %v3475_v41, %v3284_v54  ;;  %v5750_v60 = vpop.f32.mrb[85].mxu1 }
 0xed3   :  { %v3478_v20 = vpop.f32.mrb[86].mxu1  ;;  %3745 = vrot.lane.b32.xlu0 %v6214_v8, %s6509_s1  ;;  %v3287_v8 = vld [vmem:[#allocation4 + $0x5c] sm:$0x3] }
 0xed4   :  { %6219 = vtanh.f32 %v3668_v6  ;;  %v5751_v32 = vpop.f32.mrb[87].mxu1 }
 0xed5   :  { %v3521_v35 = vpop.f32.mrb[88].mxu0 }
 0xed6   :  { %v6216_v4 = vpop.eup %6215  ;;  %v3669_v40 = vadd.f32 %v3521_v35, %v3285_v31  ;;  %v5756_v29 = vpop.f32.mrb[89].mxu0 }
 0xed7   :  { %3747 = vrot.lane.b32.xlu1 %v6216_v4, %s6509_s1  ;;  %v3524_v11 = vpop.f32.mrb[90].mxu0  ;;  %v3288_v29 = vld [vmem:[#allocation4 + $0x5e] sm:$0x3] }
 0xed8   :  { %6221 = vtanh.f32 %v3669_v40  ;;  %v5757_v18 = vpop.f32.mrb[91].mxu0 }
 0xed9   :  { %v3567_v56 = vpop.f32.mrb[88].mxu1 }
 0xeda   :  { %v6218_v48 = vpop.eup %6217  ;;  %v3670_v54 = vadd.f32 %v3567_v56, %v3286_v44  ;;  %v5762_v59 = vpop.f32.mrb[89].mxu1 }
 0xedb   :  { %3749 = vrot.lane.b32.xlu0 %v6218_v48, %s6509_s1  ;;  %v3570_v41 = vpop.f32.mrb[90].mxu1 }
 0xedc   :  { %6223 = vtanh.f32 %v3670_v54  ;;  %v5763_v60 = vpop.f32.mrb[91].mxu1 }
 0xedd   :  { %v3613_v32 = vpop.f32.mrb[92].mxu0 }
 0xede   :  { %v6220_v20 = vpop.eup %6219  ;;  %v3671_v31 = vadd.f32 %v3613_v32, %v3287_v8  ;;  %v5768_v35 = vpop.f32.mrb[93].mxu0  ;;  %v5321_v32 = vmul.f32 -1.442695, %v7613_v33 }
 0xedf   :  { %3751 = vrot.lane.b32.xlu1 %v6220_v20, %s6509_s1  ;;  %v3616_v4 = vpop.f32.mrb[94].mxu0  ;;  %v5320_v20 = vmul.f32 -1.442695, %v7610_v58  ;;  %v5322_v35 = vmul.f32 -1.442695, %v3667_v37 }
 0xee0   :  { %6225 = vtanh.f32 %v3671_v31  ;;  %v5769_v11 = vpop.f32.mrb[95].mxu0 }
 0xee1   :  { %v3659_v18 = vpop.f32.mrb[92].mxu1 }
 0xee2   :  { %v6222_v25 = vpop.eup %6221  ;;  %v3672_v44 = vadd.f32 %v3659_v18, %v3288_v29  ;;  %v5774_v56 = vpop.f32.mrb[93].mxu1  ;;  %v5324_v18 = vmul.f32 -1.442695, %v3669_v40 }
 0xee3   :  { %v3662_v59 = vpop.f32.mrb[94].mxu1  ;;  %3753 = vrot.lane.b32.xlu0 %v6222_v25, %s6509_s1  ;;  %v5323_v25 = vmul.f32 -1.442695, %v3668_v6 }
 0xee4   :  { %6227 = vtanh.f32 %v3672_v44  ;;  %v5775_v48 = vpop.f32.mrb[95].mxu1  ;;  %v5327_v37 = vmul.f32 -1.442695, %v3672_v44 }
 0xee5   :  { %6229 = vpow2.f32 %v5320_v20  ;;  %v5325_v48 = vmul.f32 -1.442695, %v3670_v54 }
 0xee6   :  { %v6224_v41 = vpop.eup %6223  ;;  %6231 = vpow2.f32 %v5321_v32 }
 0xee7   :  { %3755 = vrot.lane.b32.xlu1 %v6224_v41, %s6509_s1  ;;  %6233 = vpow2.f32 %v5322_v35 }
 0xee8   :  { %6235 = vpow2.f32 %v5323_v25 }
 0xeea   :  { %v6226_v8 = vpop.eup %6225 }
 0xeeb   :  { %3757 = vrot.lane.b32.xlu0 %v6226_v8, %s6509_s1  ;;  %v5326_v8 = vmul.f32 -1.442695, %v3671_v31 }
 0xeee   :  { %v6228_v60 = vpop.eup %6227 }
 0xeef   :  { %3759 = vrot.lane.b32.xlu1 %v6228_v60, %s6509_s1  ;;  %v6230_v4 = vpop.eup %6229 }
 0xef0   :  { %v3697_v29 = vadd.f32 1.0, %v6230_v4  ;;  %v6232_v11 = vpop.eup %6231 }
 0xef1   :  { %v3698_v56 = vadd.f32 1.0, %v6232_v11  ;;  %v6234_v59 = vpop.eup %6233 }
 0xef2   :  { %6237 = vrcp.f32 %v3697_v29  ;;  %v3699_v41 = vadd.f32 1.0, %v6234_v59  ;;  %v6236_v58 = vpop.eup %6235 }
 0xef3   :  { %6239 = vpow2.f32 %v5324_v18  ;;  %v3700_v33 = vadd.f32 1.0, %v6236_v58 }
 0xef4   :  { %6241 = vrcp.f32 %v3698_v56 }
 0xef5   :  { %6243 = vpow2.f32 %v5325_v48 }
 0xef6   :  { %6245 = vrcp.f32 %v3699_v41 }
 0xef7   :  { %6247 = vpow2.f32 %v5326_v8 }
 0xef8   :  { %6249 = vrcp.f32 %v3700_v33 }
 0xef9   :  { %6251 = vpow2.f32 %v5327_v37 }
 0xefc   :  { %v7626_v6 = vpop.eup %6237 }
 0xefd   :  { %v6240_v60 = vpop.eup %6239 }
 0xefe   :  { %v7629_v32 = vpop.eup %6241  ;;  %v3701_v54 = vadd.f32 1.0, %v6240_v60 }
 0xeff   :  { %v6244_v35 = vpop.eup %6243 }
 0xf00   :  { %v7633_v4 = vpop.eup %6245  ;;  %6253 = vrcp.f32 %v3701_v54  ;;  %v3702_v44 = vadd.f32 1.0, %v6244_v35 }
 0xf01   :  { %v6248_v29 = vpop.eup %6247 }
 0xf02   :  { %v7637_v56 = vpop.eup %6249  ;;  %6255 = vrcp.f32 %v3702_v44  ;;  %v3703_v59 = vadd.f32 1.0, %v6248_v29 }
 0xf03   :  { %v6252_v48 = vpop.eup %6251 }
 0xf04   :  { %6257 = vrcp.f32 %v3703_v59  ;;  %v3704_v8 = vadd.f32 1.0, %v6252_v48 }
 0xf06   :  { %6259 = vrcp.f32 %v3704_v8 }
 0xf0a   :  { %v7642_v33 = vpop.eup %6253 }
 0xf45   :  { %v3746_v20 = vpop.permute.xlu0 %3745 }
 0xf46   :  { %v3769_v40 = vmul.f32 %v7626_v6, %v3746_v20  ;;  %v7646_v20 = vpop.eup %6255 }
 0xf47   :  { %v7650_v35 = vpop.eup %6257 }
 0xf48   :  { %3785 = vrot.lane.b32.xlu0 %v3769_v40, %s6510_s8  ;;  %v7654_v44 = vpop.eup %6259 }
 0xf49   :  { %v3748_v25 = vpop.permute.xlu1 %3747 }
 0xf4a   :  { %v3770_v31 = vmul.f32 %v7629_v32, %v3748_v25 }
 0xf4c   :  { %3787 = vrot.lane.b32.xlu1 %v3770_v31, %s6510_s8 }
 0xf4d   :  { %v3750_v11 = vpop.permute.xlu0 %3749 }
 0xf4e   :  { %v3771_v18 = vmul.f32 %v7633_v4, %v3750_v11 }
 0xf50   :  { %3789 = vrot.lane.b32.xlu0 %v3771_v18, %s6510_s8  ;;  %v3729_v18 = vmul.f32 %v7626_v6, %v7476_v50  ;;  %v3732_v50 = vmul.f32 %v7637_v56, %v7491_v43  ;;  %v3734_v43 = vmul.f32 %v7646_v20, %v7503_v3  ;;  %v3736_v3 = vmul.f32 %v7654_v44, %v7515_v42 }
 0xf51   :  { %v3752_v41 = vpop.permute.xlu1 %3751 }
 0xf52   :  { %v3772_v58 = vmul.f32 %v7637_v56, %v3752_v41  ;;  %v3730_v41 = vmul.f32 %v7629_v32, %v7481_v16  ;;  %v3733_v16 = vmul.f32 %v7642_v33, %v7497_v0  ;;  %v3735_v0 = vmul.f32 %v7650_v35, %v7509_v24 }
 0xf54   :  { %3791 = vrot.lane.b32.xlu1 %v3772_v58, %s6510_s8 }
 0xf55   :  { %v3754_v37 = vpop.permute.xlu0 %3753 }
 0xf56   :  { %v3773_v60 = vmul.f32 %v7642_v33, %v3754_v37  ;;  %v3731_v37 = vmul.f32 %v7633_v4, %v7486_v9 }
 0xf58   :  { %3793 = vrot.lane.b32.xlu0 %v3773_v60, %s6510_s8 }
 0xf59   :  { %v3756_v40 = vpop.permute.xlu1 %3755 }
 0xf5a   :  { %v3774_v54 = vmul.f32 %v7646_v20, %v3756_v40 }
 0xf5c   :  { %3795 = vrot.lane.b32.xlu1 %v3774_v54, %s6510_s8 }
 0xf5d   :  { %v3758_v25 = vpop.permute.xlu0 %3757 }
 0xf5e   :  { %v3775_v31 = vmul.f32 %v7650_v35, %v3758_v25 }
 0xf60   :  { %3797 = vrot.lane.b32.xlu0 %v3775_v31, %s6510_s8 }
 0xf61   :  { %v3760_v29 = vpop.permute.xlu1 %3759 }
 0xf62   :  { %v3776_v11 = vmul.f32 %v7654_v44, %v3760_v29 }
 0xf64   :  { %3799 = vrot.lane.b32.xlu1 %v3776_v11, %s6510_s8 }
 0xfba   :  { %v3786_v59 = vpop.permute.xlu0 %3785 }
 0xfbb   :  { %v7660_v48 = vadd.f32 %v3786_v59, %v3729_v18 }
 0xfbd   :  { %6261 = vtanh.f32 %v7660_v48 }
 0xfbe   :  { %v3788_v58 = vpop.permute.xlu1 %3787 }
 0xfbf   :  { %v7665_v8 = vadd.f32 %v3788_v58, %v3730_v41 }
 0xfc1   :  { %6263 = vtanh.f32 %v7665_v8 }
 0xfc2   :  { %v3790_v60 = vpop.permute.xlu0 %3789 }
 0xfc3   :  { %v7670_v40 = vadd.f32 %v3790_v60, %v3731_v37 }
 0xfc5   :  { %6265 = vtanh.f32 %v7670_v40 }
 0xfc6   :  { %v3792_v54 = vpop.permute.xlu1 %3791 }
 0xfc7   :  { %v6262_v25 = vpop.eup %6261  ;;  %v7675_v31 = vadd.f32 %v3792_v54, %v3732_v50 }
 0xfc8   :  { %3833 = vrot.lane.b32.xlu0 %v6262_v25, %s6502_s19 }
 0xfc9   :  { %6267 = vtanh.f32 %v7675_v31 }
 0xfca   :  { %v3794_v29 = vpop.permute.xlu0 %3793 }
 0xfcb   :  { %v6264_v9 = vpop.eup %6263  ;;  %v7681_v11 = vadd.f32 %v3794_v29, %v3733_v16 }
 0xfcc   :  { %3835 = vrot.lane.b32.xlu1 %v6264_v9, %s6502_s19 }
 0xfcd   :  { %6269 = vtanh.f32 %v7681_v11 }
 0xfce   :  { %v3796_v59 = vpop.permute.xlu1 %3795 }
 0xfcf   :  { %v6266_v18 = vpop.eup %6265  ;;  %v7687_v41 = vadd.f32 %v3796_v59, %v3734_v43 }
 0xfd0   :  { %3837 = vrot.lane.b32.xlu0 %v6266_v18, %s6502_s19 }
 0xfd1   :  { %6271 = vtanh.f32 %v7687_v41 }
 0xfd2   :  { %v3798_v37 = vpop.permute.xlu0 %3797 }
 0xfd3   :  { %v6268_v58 = vpop.eup %6267  ;;  %v7693_v60 = vadd.f32 %v3798_v37, %v3735_v0 }
 0xfd4   :  { %3839 = vrot.lane.b32.xlu1 %v6268_v58, %s6502_s19 }
 0xfd5   :  { %6273 = vtanh.f32 %v7693_v60 }
 0xfd6   :  { %v3800_v50 = vpop.permute.xlu1 %3799 }
 0xfd7   :  { %v6270_v54 = vpop.eup %6269  ;;  %v7699_v25 = vadd.f32 %v3800_v50, %v3736_v3 }
 0xfd8   :  { %3841 = vrot.lane.b32.xlu0 %v6270_v54, %s6502_s19 }
 0xfd9   :  { %6275 = vtanh.f32 %v7699_v25 }
 0xfdb   :  { %v6272_v24 = vpop.eup %6271 }
 0xfdc   :  { %3843 = vrot.lane.b32.xlu1 %v6272_v24, %s6502_s19 }
 0xfdf   :  { %v6274_v16 = vpop.eup %6273 }
 0xfe0   :  { %3845 = vrot.lane.b32.xlu0 %v6274_v16, %s6502_s19 }
 0xfe3   :  { %v6276_v9 = vpop.eup %6275 }
 0xfe4   :  { %3847 = vrot.lane.b32.xlu1 %v6276_v9, %s6502_s19 }
0x103a   :  { %v3834_v29 = vpop.permute.xlu0 %3833 }
0x103b   :  { %v7707_v42 = vmul.f32 %v7626_v6, %v3834_v29 }
0x103d   :  { %8366 = vst [vmem:[#allocation26_spill] sm:$0xff] %v7707_v42  ;;  %v3915_v43 = vpack.c.bf16 %v7707_v42, %v7707_v42 }
0x103e   :  { %v3836_v18 = vpop.permute.xlu1 %3835 }
0x103f   :  { %v7712_v59 = vmul.f32 %v7629_v32, %v3836_v18  ;;  %3924 = vrot.lane.b32.xlu0 %v3915_v43, %s6511_s9 }
0x1041   :  { %8367 = vst [vmem:[#allocation27_spill] sm:$0xff] %v7712_v59  ;;  %v3916_v0 = vpack.c.bf16 %v7712_v59, %v7712_v59 }
0x1042   :  { %v3838_v58 = vpop.permute.xlu0 %3837 }
0x1043   :  { %v7718_v37 = vmul.f32 %v7633_v4, %v3838_v58  ;;  %3970 = vrot.lane.b32.xlu1 %v3916_v0, %s6511_s9 }
0x1045   :  { %8368 = vst [vmem:[#allocation28_spill] sm:$0xff] %v7718_v37  ;;  %v3917_v6 = vpack.c.bf16 %v7718_v37, %v7718_v37 }
0x1046   :  { %v3840_v3 = vpop.permute.xlu1 %3839 }
0x1047   :  { %v7724_v50 = vmul.f32 %v7637_v56, %v3840_v3  ;;  %4016 = vrot.lane.b32.xlu0 %v3917_v6, %s6511_s9  ;;  %v7762_v6 = vld [vmem:[#allocation7 + $0x18] sm:$0xff]  }
0x1049   :  { %8369 = vst [vmem:[#allocation29_spill] sm:$0xff] %v7724_v50  ;;  %v3918_v32 = vpack.c.bf16 %v7724_v50, %v7724_v50 }
0x104a   :  { %v3842_v54 = vpop.permute.xlu0 %3841 }
0x104b   :  { %4062 = vrot.lane.b32.xlu1 %v3918_v32, %s6511_s9  ;;  %v7731_v4 = vmul.f32 %v7642_v33, %v3842_v54  ;;  %v7769_v32 = vld [vmem:[#allocation7 + $0x20] sm:$0xff]  }
0x104d   :  { %8370 = vst [vmem:[#allocation30_spill] sm:$0xff] %v7731_v4  ;;  %v3919_v24 = vpack.c.bf16 %v7731_v4, %v7731_v4 }
0x104e   :  { %v3844_v16 = vpop.permute.xlu1 %3843 }
0x104f   :  { %v7736_v9 = vmul.f32 %v7646_v20, %v3844_v16  ;;  %4108 = vrot.lane.b32.xlu0 %v3919_v24, %s6511_s9  ;;  %v7776_v24 = vld [vmem:[#allocation7 + $0x28] sm:$0xff]  }
0x1051   :  { %8371 = vst [vmem:[#allocation31_spill] sm:$0xff] %v7736_v9  ;;  %v3920_v56 = vpack.c.bf16 %v7736_v9, %v7736_v9  ;;  %v3909_v9 = vld [vmem:[#allocation4 + $0x64] sm:$0x3] }
0x1052   :  { %v3846_v29 = vpop.permute.xlu0 %3845 }
0x1053   :  { %v7742_v43 = vmul.f32 %v7650_v35, %v3846_v29  ;;  %4154 = vrot.lane.b32.xlu1 %v3920_v56, %s6511_s9  ;;  %v7755_v35 = vld [vmem:[#allocation7 + $0x10] sm:$0xff]  }
0x1054   :  { %v7783_v56 = vld [vmem:[#allocation7 + $0x30] sm:$0xff]  }
0x1055   :  { %8372 = vst [vmem:[#allocation32_spill] sm:$0xff] %v7742_v43  ;;  %v3921_v33 = vpack.c.bf16 %v7742_v43, %v7742_v43 }
0x1056   :  { %v3848_v18 = vpop.permute.xlu1 %3847 }
0x1057   :  { %v7748_v0 = vmul.f32 %v7654_v44, %v3848_v18  ;;  %4200 = vrot.lane.b32.xlu0 %v3921_v33, %s6511_s9  ;;  %v7790_v33 = vld [vmem:[#allocation7 + $0x38] sm:$0xff]  }
0x1059   :  { %8373 = vst [vmem:[#allocation33_spill] sm:$0xff] %v7748_v0  ;;  %v3922_v20 = vpack.c.bf16 %v7748_v0, %v7748_v0 }
0x105b   :  { %4246 = vrot.lane.b32.xlu1 %v3922_v20, %s6511_s9  ;;  %v6427_v20 = vld [vmem:[#allocation7] sm:$0xff]  }
0x10b1   :  { %v3925_v58 = vpop.permute.xlu0 %3924 }
0x10b2   :  { %5779 = vmatmul.mubr.msk.bf16.vlgmr.msra.gmra.mrb[96].mxu0 %vm116_vm2, %v3925_v58 }
0x10b3   :  { %5789 = vmatpush3.bf16.msra.mxu0 %v7755_v35  ;;  %5790 = vmatprep.mubr.msk.bf16.mxu0 %vm6508_vm1, %v8365_v46 }
0x10b4   :  { %5800 = vmatprep.subr.bf16.mxu0 %v8365_v46 }
0x10b5   :  { %v3971_v44 = vpop.permute.xlu1 %3970 }
0x10b6   :  { %5785 = vmatmul.mubr.msk.bf16.vlgmr.msra.gmra.mrb[96].mxu1 %vm116_vm2, %v3971_v44  ;;  %v6428_v44 = vld [vmem:[#allocation7 + $0x8] sm:$0xff]  }
0x10b7   :  { %5795 = vmatpush3.bf16.msra.mxu1 %v7762_v6  ;;  %5796 = vmatprep.mubr.msk.bf16.mxu1 %vm6508_vm1, %v8365_v46 }
0x10b8   :  { %5806 = vmatprep.subr.bf16.mxu1 %v8365_v46 }
0x10b9   :  { %v4017_v3 = vpop.permute.xlu0 %4016 }
0x10ba   :  { %5791 = vmatmul.mubr.msk.bf16.vlgmr.msra.gmra.mrb[100].mxu0 %vm116_vm2, %v4017_v3  ;;  %v3907_v3 = vld [vmem:[#allocation4 + $0x60] sm:$0x3] }
0x10bb   :  { %5801 = vmatpush3.bf16.msra.mxu0 %v7769_v32  ;;  %5802 = vmatprep.mubr.msk.bf16.mxu0 %vm6508_vm1, %v8365_v46 }
0x10bc   :  { %5812 = vmatprep.subr.bf16.mxu0 %v8365_v46 }
0x10bd   :  { %v4063_v54 = vpop.permute.xlu1 %4062 }
0x10be   :  { %5797 = vmatmul.mubr.msk.bf16.vlgmr.msra.gmra.mrb[100].mxu1 %vm116_vm2, %v4063_v54 }
0x10bf   :  { %5807 = vmatpush3.bf16.msra.mxu1 %v7776_v24  ;;  %5808 = vmatprep.mubr.msk.bf16.mxu1 %vm6508_vm1, %v8365_v46 }
0x10c0   :  { %5818 = vmatprep.subr.bf16.mxu1 %v8365_v46 }
0x10c1   :  { %v4109_v16 = vpop.permute.xlu0 %4108 }
0x10c2   :  { %5803 = vmatmul.mubr.msk.bf16.vlgmr.msra.gmra.mrb[104].mxu0 %vm116_vm2, %v4109_v16 }
0x10c3   :  { %5813 = vmatpush3.bf16.msra.mxu0 %v7783_v56  ;;  %5814 = vmatprep.mubr.msk.bf16.mxu0 %vm6508_vm1, %v8365_v46 }
0x10c4   :  { %5824 = vmatprep.subr.bf16.mxu0 %v8365_v46 }
0x10c5   :  { %v4155_v29 = vpop.permute.xlu1 %4154 }
0x10c6   :  { %5809 = vmatmul.mubr.msk.bf16.vlgmr.msra.gmra.mrb[104].mxu1 %vm116_vm2, %v4155_v29 }
0x10c7   :  { %5819 = vmatpush3.bf16.msra.mxu1 %v7790_v33  ;;  %5820 = vmatprep.mubr.msk.bf16.mxu1 %vm6508_vm1, %v8365_v46 }
0x10c8   :  { %5830 = vmatprep.subr.bf16.mxu1 %v8365_v46 }
0x10c9   :  { %v4201_v18 = vpop.permute.xlu0 %4200 }
0x10ca   :  { %5815 = vmatmul.mubr.msk.bf16.vlgmr.msra.gmra.mrb[108].mxu0 %vm116_vm2, %v4201_v18 }
0x10cb   :  { %5825 = vmatpush3.bf16.msra.mxu0 %v6427_v20  ;;  %5826 = vmatprep.mubr.msk.bf16.mxu0 %vm6508_vm1, %v8365_v46  ;;  %v3908_v20 = vld [vmem:[#allocation4 + $0x62] sm:$0x3] }
0x10cc   :  { %5836 = vmatprep.subr.bf16.mxu0 %v8365_v46 }
0x10cd   :  { %v4247_v58 = vpop.permute.xlu1 %4246 }
0x10ce   :  { %5821 = vmatmul.mubr.msk.bf16.vlgmr.msra.gmra.mrb[108].mxu1 %vm116_vm2, %v4247_v58 }
0x10cf   :  { %5831 = vmatpush3.bf16.msra.mxu1 %v6428_v44  ;;  %5832 = vmatprep.mubr.msk.bf16.mxu1 %vm6508_vm1, %v8365_v46 }
0x10d0   :  { %5842 = vmatprep.subr.bf16.mxu1 %v8365_v46 }
0x1185   :  { %v3963_v54 = vpop.f32.mrb[96].mxu0 }
0x1186   :  { %v7804_v16 = vadd.f32 %v3963_v54, %v3907_v3  ;;  %v5780_v29 = vpop.f32.mrb[97].mxu0  ;;  %v3910_v54 = vld [vmem:[#allocation4 + $0x66] sm:$0x3] }
0x1187   :  { %v3966_v18 = vpop.f32.mrb[98].mxu0 }
0x1188   :  { %6277 = vtanh.f32 %v7804_v16  ;;  %v5781_v43 = vpop.f32.mrb[99].mxu0 }
0x1189   :  { %v4009_v0 = vpop.f32.mrb[96].mxu1 }
0x118a   :  { %v7807_v4 = vadd.f32 %v4009_v0, %v3908_v20  ;;  %v5786_v58 = vpop.f32.mrb[97].mxu1  ;;  %v3911_v20 = vld [vmem:[#allocation4 + $0x68] sm:$0x3] }
0x118b   :  { %v4012_v44 = vpop.f32.mrb[98].mxu1 }
0x118c   :  { %6279 = vtanh.f32 %v7807_v4  ;;  %v5787_v37 = vpop.f32.mrb[99].mxu1 }
0x118d   :  { %v4055_v50 = vpop.f32.mrb[100].mxu0 }
0x118e   :  { %v4293_v42 = vadd.f32 %v4055_v50, %v3909_v9  ;;  %v5792_v59 = vpop.f32.mrb[101].mxu0  ;;  %v3912_v50 = vld [vmem:[#allocation4 + $0x6a] sm:$0x3] }
0x118f   :  { %v4058_v3 = vpop.f32.mrb[102].mxu0 }
0x1190   :  { %6281 = vtanh.f32 %v4293_v42  ;;  %v5793_v29 = vpop.f32.mrb[103].mxu0 }
0x1191   :  { %v4101_v18 = vpop.f32.mrb[100].mxu1 }
0x1192   :  { %v6278_v45 = vpop.eup %6277  ;;  %v4294_v47 = vadd.f32 %v4101_v18, %v3910_v54  ;;  %v5798_v43 = vpop.f32.mrb[101].mxu1 }
0x1193   :  { %v4104_v34 = vpop.f32.mrb[102].mxu1  ;;  %4371 = vrot.lane.b32.xlu0 %v6278_v45, %s6509_s1  ;;  %v3913_v45 = vld [vmem:[#allocation4 + $0x6c] sm:$0x3] }
0x1194   :  { %6283 = vtanh.f32 %v4294_v47  ;;  %v5799_v0 = vpop.f32.mrb[103].mxu1 }
0x1195   :  { %v4147_v44 = vpop.f32.mrb[104].mxu0 }
0x1196   :  { %v6280_v58 = vpop.eup %6279  ;;  %v4295_v37 = vadd.f32 %v4147_v44, %v3911_v20  ;;  %v5804_v22 = vpop.f32.mrb[105].mxu0  ;;  %v3914_v44 = vld [vmem:[#allocation4 + $0x6e] sm:$0x3] }
0x1197   :  { %4373 = vrot.lane.b32.xlu1 %v6280_v58, %s6509_s1  ;;  %v4150_v59 = vpop.f32.mrb[106].mxu0 }
0x1198   :  { %6285 = vtanh.f32 %v4295_v37  ;;  %v5805_v9 = vpop.f32.mrb[107].mxu0 }
0x1199   :  { %v4193_v29 = vpop.f32.mrb[104].mxu1 }
0x119a   :  { %v6282_v3 = vpop.eup %6281  ;;  %v4296_v54 = vadd.f32 %v4193_v29, %v3912_v50  ;;  %v5810_v18 = vpop.f32.mrb[105].mxu1 }
0x119b   :  { %4375 = vrot.lane.b32.xlu0 %v6282_v3, %s6509_s1  ;;  %v4196_v34 = vpop.f32.mrb[106].mxu1 }
0x119c   :  { %6287 = vtanh.f32 %v4296_v54  ;;  %v5811_v43 = vpop.f32.mrb[107].mxu1 }
0x119d   :  { %v4239_v52 = vpop.f32.mrb[108].mxu0  ;;  %v5336_v43 = vmul.f32 -1.442695, %v7804_v16 }
0x119e   :  { %v6284_v0 = vpop.eup %6283  ;;  %v4297_v20 = vadd.f32 %v4239_v52, %v3913_v45  ;;  %v5816_v22 = vpop.f32.mrb[109].mxu0 }
0x119f   :  { %4377 = vrot.lane.b32.xlu1 %v6284_v0, %s6509_s1  ;;  %v4242_v58 = vpop.f32.mrb[110].mxu0  ;;  %v5337_v0 = vmul.f32 -1.442695, %v7807_v4  ;;  %v5338_v22 = vmul.f32 -1.442695, %v4293_v42 }
0x11a0   :  { %6289 = vtanh.f32 %v4297_v20  ;;  %v5817_v59 = vpop.f32.mrb[111].mxu0 }
0x11a1   :  { %v4285_v9 = vpop.f32.mrb[108].mxu1 }
0x11a2   :  { %v6286_v14 = vpop.eup %6285  ;;  %v4298_v50 = vadd.f32 %v4285_v9, %v3914_v44  ;;  %v5822_v29 = vpop.f32.mrb[109].mxu1  ;;  %v5340_v9 = vmul.f32 -1.442695, %v4295_v37 }
0x11a3   :  { %v4288_v18 = vpop.f32.mrb[110].mxu1  ;;  %4379 = vrot.lane.b32.xlu0 %v6286_v14, %s6509_s1  ;;  %v5339_v14 = vmul.f32 -1.442695, %v4294_v47 }
0x11a4   :  { %6291 = vtanh.f32 %v4298_v50  ;;  %v5823_v3 = vpop.f32.mrb[111].mxu1  ;;  %v5343_v42 = vmul.f32 -1.442695, %v4298_v50 }
0x11a5   :  { %6293 = vpow2.f32 %v5336_v43  ;;  %v5341_v3 = vmul.f32 -1.442695, %v4296_v54 }
0x11a6   :  { %v6288_v34 = vpop.eup %6287  ;;  %6295 = vpow2.f32 %v5337_v0 }
0x11a7   :  { %4381 = vrot.lane.b32.xlu1 %v6288_v34, %s6509_s1  ;;  %6297 = vpow2.f32 %v5338_v22 }
0x11a8   :  { %6299 = vpow2.f32 %v5339_v14 }
0x11aa   :  { %v6290_v52 = vpop.eup %6289 }
0x11ab   :  { %4383 = vrot.lane.b32.xlu0 %v6290_v52, %s6509_s1  ;;  %v5342_v52 = vmul.f32 -1.442695, %v4297_v20 }
0x11ae   :  { %v6292_v45 = vpop.eup %6291 }
0x11af   :  { %4385 = vrot.lane.b32.xlu1 %v6292_v45, %s6509_s1  ;;  %v6294_v58 = vpop.eup %6293 }
0x11b0   :  { %v4323_v44 = vadd.f32 1.0, %v6294_v58  ;;  %v6296_v59 = vpop.eup %6295 }
0x11b1   :  { %v4324_v29 = vadd.f32 1.0, %v6296_v59  ;;  %v6298_v18 = vpop.eup %6297 }
0x11b2   :  { %6301 = vrcp.f32 %v4323_v44  ;;  %v4325_v34 = vadd.f32 1.0, %v6298_v18  ;;  %v6300_v16 = vpop.eup %6299 }
0x11b3   :  { %6303 = vpow2.f32 %v5340_v9  ;;  %v4326_v4 = vadd.f32 1.0, %v6300_v16 }
0x11b4   :  { %6305 = vrcp.f32 %v4324_v29 }
0x11b5   :  { %6307 = vpow2.f32 %v5341_v3 }
0x11b6   :  { %6309 = vrcp.f32 %v4325_v34 }
0x11b7   :  { %6311 = vpow2.f32 %v5342_v52 }
0x11b8   :  { %6313 = vrcp.f32 %v4326_v4 }
0x11b9   :  { %6315 = vpow2.f32 %v5343_v42 }
0x11bc   :  { %v7820_v47 = vpop.eup %6301 }
0x11bd   :  { %v6304_v45 = vpop.eup %6303 }
0x11be   :  { %v7823_v0 = vpop.eup %6305  ;;  %v4327_v54 = vadd.f32 1.0, %v6304_v45 }
0x11bf   :  { %v6308_v22 = vpop.eup %6307 }
0x11c0   :  { %v7827_v58 = vpop.eup %6309  ;;  %6317 = vrcp.f32 %v4327_v54  ;;  %v4328_v50 = vadd.f32 1.0, %v6308_v22 }
0x11c1   :  { %v6312_v44 = vpop.eup %6311 }
0x11c2   :  { %v7831_v29 = vpop.eup %6313  ;;  %6319 = vrcp.f32 %v4328_v50  ;;  %v4329_v18 = vadd.f32 1.0, %v6312_v44 }
0x11c3   :  { %v6316_v3 = vpop.eup %6315 }
0x11c4   :  { %6321 = vrcp.f32 %v4329_v18  ;;  %v4330_v52 = vadd.f32 1.0, %v6316_v3 }
0x11c6   :  { %6323 = vrcp.f32 %v4330_v52 }
0x11ca   :  { %v7836_v4 = vpop.eup %6317 }
0x1205   :  { %v4372_v43 = vpop.permute.xlu0 %4371 }
0x1206   :  { %v4395_v37 = vmul.f32 %v7820_v47, %v4372_v43  ;;  %v7840_v43 = vpop.eup %6319 }
0x1207   :  { %v7844_v22 = vpop.eup %6321 }
0x1208   :  { %4411 = vrot.lane.b32.xlu0 %v4395_v37, %s6510_s8  ;;  %v7848_v50 = vpop.eup %6323 }
0x1209   :  { %v4374_v14 = vpop.permute.xlu1 %4373 }
0x120a   :  { %v4396_v20 = vmul.f32 %v7823_v0, %v4374_v14 }
0x120c   :  { %4413 = vrot.lane.b32.xlu1 %v4396_v20, %s6510_s8 }
0x120d   :  { %v4376_v59 = vpop.permute.xlu0 %4375 }
0x120e   :  { %v4397_v9 = vmul.f32 %v7827_v58, %v4376_v59 }
0x1210   :  { %4415 = vrot.lane.b32.xlu0 %v4397_v9, %s6510_s8  ;;  %v4355_v9 = vmul.f32 %v7820_v47, %v7660_v48  ;;  %v4358_v48 = vmul.f32 %v7831_v29, %v7675_v31  ;;  %v4360_v31 = vmul.f32 %v7840_v43, %v7687_v41  ;;  %v4362_v41 = vmul.f32 %v7848_v50, %v7699_v25 }
0x1211   :  { %v4378_v34 = vpop.permute.xlu1 %4377 }
0x1212   :  { %v4398_v16 = vmul.f32 %v7831_v29, %v4378_v34  ;;  %v4356_v34 = vmul.f32 %v7823_v0, %v7665_v8  ;;  %v4359_v8 = vmul.f32 %v7836_v4, %v7681_v11  ;;  %v4361_v11 = vmul.f32 %v7844_v22, %v7693_v60 }
0x1214   :  { %4417 = vrot.lane.b32.xlu1 %v4398_v16, %s6510_s8 }
0x1215   :  { %v4380_v42 = vpop.permute.xlu0 %4379 }
0x1216   :  { %v4399_v45 = vmul.f32 %v7836_v4, %v4380_v42  ;;  %v4357_v42 = vmul.f32 %v7827_v58, %v7670_v40 }
0x1218   :  { %4419 = vrot.lane.b32.xlu0 %v4399_v45, %s6510_s8 }
0x1219   :  { %v4382_v37 = vpop.permute.xlu1 %4381 }
0x121a   :  { %v4400_v54 = vmul.f32 %v7840_v43, %v4382_v37 }
0x121c   :  { %4421 = vrot.lane.b32.xlu1 %v4400_v54, %s6510_s8 }
0x121d   :  { %v4384_v14 = vpop.permute.xlu0 %4383 }
0x121e   :  { %v4401_v20 = vmul.f32 %v7844_v22, %v4384_v14 }
0x1220   :  { %4423 = vrot.lane.b32.xlu0 %v4401_v20, %s6510_s8 }
0x1221   :  { %v4386_v44 = vpop.permute.xlu1 %4385 }
0x1222   :  { %v4402_v59 = vmul.f32 %v7848_v50, %v4386_v44 }
0x1224   :  { %4425 = vrot.lane.b32.xlu1 %v4402_v59, %s6510_s8 }
0x127a   :  { %v4412_v18 = vpop.permute.xlu0 %4411 }
0x127b   :  { %v7854_v3 = vadd.f32 %v4412_v18, %v4355_v9 }
0x127d   :  { %6325 = vtanh.f32 %v7854_v3 }
0x127e   :  { %v4414_v16 = vpop.permute.xlu1 %4413 }
0x127f   :  { %v7859_v52 = vadd.f32 %v4414_v16, %v4356_v34 }
0x1281   :  { %6327 = vtanh.f32 %v7859_v52 }
0x1282   :  { %v4416_v45 = vpop.permute.xlu0 %4415 }
0x1283   :  { %v7864_v37 = vadd.f32 %v4416_v45, %v4357_v42 }
0x1285   :  { %6329 = vtanh.f32 %v7864_v37 }
0x1286   :  { %v4418_v54 = vpop.permute.xlu1 %4417 }
0x1287   :  { %v6326_v14 = vpop.eup %6325  ;;  %v7869_v20 = vadd.f32 %v4418_v54, %v4358_v48 }
0x1288   :  { %4459 = vrot.lane.b32.xlu0 %v6326_v14, %s6502_s19 }
0x1289   :  { %6331 = vtanh.f32 %v7869_v20 }
0x128a   :  { %v4420_v44 = vpop.permute.xlu0 %4419 }
0x128b   :  { %v6328_v40 = vpop.eup %6327  ;;  %v7875_v59 = vadd.f32 %v4420_v44, %v4359_v8 }
0x128c   :  { %4461 = vrot.lane.b32.xlu1 %v6328_v40, %s6502_s19 }
0x128d   :  { %6333 = vtanh.f32 %v7875_v59 }
0x128e   :  { %v4422_v18 = vpop.permute.xlu1 %4421 }
0x128f   :  { %v6330_v9 = vpop.eup %6329  ;;  %v7881_v34 = vadd.f32 %v4422_v18, %v4360_v31 }
0x1290   :  { %4463 = vrot.lane.b32.xlu0 %v6330_v9, %s6502_s19 }
0x1291   :  { %6335 = vtanh.f32 %v7881_v34 }
0x1292   :  { %v4424_v42 = vpop.permute.xlu0 %4423 }
0x1293   :  { %v6332_v16 = vpop.eup %6331  ;;  %v7887_v45 = vadd.f32 %v4424_v42, %v4361_v11 }
0x1294   :  { %4465 = vrot.lane.b32.xlu1 %v6332_v16, %s6502_s19 }
0x1295   :  { %6337 = vtanh.f32 %v7887_v45 }
0x1296   :  { %v4426_v48 = vpop.permute.xlu1 %4425 }
0x1297   :  { %v6334_v54 = vpop.eup %6333  ;;  %v7893_v14 = vadd.f32 %v4426_v48, %v4362_v41 }
0x1298   :  { %4467 = vrot.lane.b32.xlu0 %v6334_v54, %s6502_s19 }
0x1299   :  { %6339 = vtanh.f32 %v7893_v14 }
0x129b   :  { %v6336_v60 = vpop.eup %6335 }
0x129c   :  { %4469 = vrot.lane.b32.xlu1 %v6336_v60, %s6502_s19 }
0x129f   :  { %v6338_v8 = vpop.eup %6337 }
0x12a0   :  { %4471 = vrot.lane.b32.xlu0 %v6338_v8, %s6502_s19 }
0x12a3   :  { %v6340_v40 = vpop.eup %6339 }
0x12a4   :  { %4473 = vrot.lane.b32.xlu1 %v6340_v40, %s6502_s19 }
0x12fa   :  { %v4460_v44 = vpop.permute.xlu0 %4459 }
0x12fb   :  { %v7901_v25 = vmul.f32 %v7820_v47, %v4460_v44 }
0x12fd   :  { %v4541_v31 = vpack.c.bf16 %v7901_v25, %v7901_v25 }
0x12fe   :  { %v4462_v9 = vpop.permute.xlu1 %4461 }
0x12ff   :  { %v7906_v18 = vmul.f32 %v7823_v0, %v4462_v9  ;;  %4550 = vrot.lane.b32.xlu0 %v4541_v31, %s6511_s9 }
0x1301   :  { %v4542_v11 = vpack.c.bf16 %v7906_v18, %v7906_v18 }
0x1302   :  { %v4464_v16 = vpop.permute.xlu0 %4463 }
0x1303   :  { %v7912_v42 = vmul.f32 %v7827_v58, %v4464_v16  ;;  %4596 = vrot.lane.b32.xlu1 %v4542_v11, %s6511_s9 }
0x1305   :  { %v4543_v47 = vpack.c.bf16 %v7912_v42, %v7912_v42 }
0x1306   :  { %v4466_v41 = vpop.permute.xlu1 %4465 }
0x1307   :  { %v7918_v48 = vmul.f32 %v7831_v29, %v4466_v41  ;;  %4642 = vrot.lane.b32.xlu0 %v4543_v47, %s6511_s9  ;;  %v4533_v41 = vld [vmem:[#allocation4 + $0x70] sm:$0x3] }
0x1309   :  { %v4544_v0 = vpack.c.bf16 %v7918_v48, %v7918_v48 }
0x130a   :  { %v4468_v54 = vpop.permute.xlu0 %4467 }
0x130b   :  { %4688 = vrot.lane.b32.xlu1 %v4544_v0, %s6511_s9  ;;  %v7925_v58 = vmul.f32 %v7836_v4, %v4468_v54 }
0x130d   :  { %v4545_v60 = vpack.c.bf16 %v7925_v58, %v7925_v58 }
0x130e   :  { %v4470_v8 = vpop.permute.xlu1 %4469 }
0x130f   :  { %v7930_v40 = vmul.f32 %v7840_v43, %v4470_v8  ;;  %4734 = vrot.lane.b32.xlu0 %v4545_v60, %s6511_s9  ;;  %v4534_v8 = vld [vmem:[#allocation4 + $0x72] sm:$0x3] }
0x1311   :  { %v4546_v29 = vpack.c.bf16 %v7930_v40, %v7930_v40 }
0x1312   :  { %v4472_v44 = vpop.permute.xlu0 %4471 }
0x1313   :  { %v7936_v31 = vmul.f32 %v7844_v22, %v4472_v44  ;;  %4780 = vrot.lane.b32.xlu1 %v4546_v29, %s6511_s9 }
0x1315   :  { %8374 = vst [vmem:[#allocation34_spill] sm:$0xff] %v7936_v31  ;;  %v4547_v4 = vpack.c.bf16 %v7936_v31, %v7936_v31 }
0x1316   :  { %v4474_v9 = vpop.permute.xlu1 %4473 }
0x1317   :  { %v7942_v11 = vmul.f32 %v7848_v50, %v4474_v9  ;;  %4826 = vrot.lane.b32.xlu0 %v4547_v4, %s6511_s9  ;;  %v4535_v9 = vld [vmem:[#allocation4 + $0x74] sm:$0x3] }
0x1319   :  { %v4548_v43 = vpack.c.bf16 %v7942_v11, %v7942_v11 }
0x131b   :  { %4872 = vrot.lane.b32.xlu1 %v4548_v43, %s6511_s9 }
0x1371   :  { %v4551_v16 = vpop.permute.xlu0 %4550 }
0x1372   :  { %5827 = vmatmul.mubr.msk.bf16.vlgmr.msra.gmra.mrb[112].mxu0 %vm116_vm2, %v4551_v16 }
0x1373   :  { %5837 = vmatpush3.bf16.msra.mxu0 %v7755_v35  ;;  %5838 = vmatprep.mubr.msk.bf16.mxu0 %vm6508_vm1, %v8365_v46 }
0x1374   :  { %5848 = vmatprep.subr.bf16.mxu0 %v8365_v46 }
0x1375   :  { %v4597_v22 = vpop.permute.xlu1 %4596 }
0x1376   :  { %5833 = vmatmul.mubr.msk.bf16.vlgmr.msra.gmra.mrb[112].mxu1 %vm116_vm2, %v4597_v22 }
0x1377   :  { %5843 = vmatpush3.bf16.msra.mxu1 %v7762_v6  ;;  %5844 = vmatprep.mubr.msk.bf16.mxu1 %vm6508_vm1, %v8365_v46 }
0x1378   :  { %5854 = vmatprep.subr.bf16.mxu1 %v8365_v46 }
0x1379   :  { %v4643_v50 = vpop.permute.xlu0 %4642 }
0x137a   :  { %5839 = vmatmul.mubr.msk.bf16.vlgmr.msra.gmra.mrb[116].mxu0 %vm116_vm2, %v4643_v50 }
0x137b   :  { %5849 = vmatpush3.bf16.msra.mxu0 %v7769_v32  ;;  %5850 = vmatprep.mubr.msk.bf16.mxu0 %vm6508_vm1, %v8365_v46 }
0x137c   :  { %5860 = vmatprep.subr.bf16.mxu0 %v8365_v46 }
0x137d   :  { %v4689_v35 = vpop.permute.xlu1 %4688 }
0x137e   :  { %5845 = vmatmul.mubr.msk.bf16.vlgmr.msra.gmra.mrb[116].mxu1 %vm116_vm2, %v4689_v35 }
0x137f   :  { %5855 = vmatpush3.bf16.msra.mxu1 %v7776_v24  ;;  %5856 = vmatprep.mubr.msk.bf16.mxu1 %vm6508_vm1, %v8365_v46 }
0x1380   :  { %5866 = vmatprep.subr.bf16.mxu1 %v8365_v46 }
0x1381   :  { %v4735_v6 = vpop.permute.xlu0 %4734 }
0x1382   :  { %5851 = vmatmul.mubr.msk.bf16.vlgmr.msra.gmra.mrb[120].mxu0 %vm116_vm2, %v4735_v6  ;;  %v4536_v6 = vld [vmem:[#allocation4 + $0x76] sm:$0x3] }
0x1383   :  { %5861 = vmatpush3.bf16.msra.mxu0 %v7783_v56  ;;  %5862 = vmatprep.mubr.msk.bf16.mxu0 %vm6508_vm1, %v8365_v46 }
0x1385   :  { %v4781_v32 = vpop.permute.xlu1 %4780 }
0x1386   :  { %5857 = vmatmul.mubr.msk.bf16.vlgmr.msra.gmra.mrb[120].mxu1 %vm116_vm2, %v4781_v32 }
0x1387   :  { %5867 = vmatpush3.bf16.msra.mxu1 %v7790_v33  ;;  %5868 = vmatprep.mubr.msk.bf16.mxu1 %vm6508_vm1, %v8365_v46 }
0x1389   :  { %v4827_v24 = vpop.permute.xlu0 %4826 }
0x138a   :  { %5863 = vmatmul.mubr.msk.bf16.vlgmr.msra.gmra.mrb[124].mxu0 %vm116_vm2, %v4827_v24 }
0x138d   :  { %v4873_v47 = vpop.permute.xlu1 %4872 }
0x138e   :  { %5869 = vmatmul.mubr.msk.bf16.vlgmr.msra.gmra.mrb[124].mxu1 %vm116_vm2, %v4873_v47 }
0x1445   :  { %v4589_v0 = vpop.f32.mrb[112].mxu0 }
0x1446   :  { %v7978_v56 = vadd.f32 %v4589_v0, %v4533_v41  ;;  %v5828_v54 = vpop.f32.mrb[113].mxu0 }
0x1447   :  { %v4592_v60 = vpop.f32.mrb[114].mxu0 }
0x1448   :  { %6341 = vtanh.f32 %v7978_v56  ;;  %v5829_v29 = vpop.f32.mrb[115].mxu0 }
0x1449   :  { %v4635_v33 = vpop.f32.mrb[112].mxu1 }
0x144a   :  { %v7981_v44 = vadd.f32 %v4635_v33, %v4534_v8  ;;  %v5834_v46 = vpop.f32.mrb[113].mxu1  ;;  %v4537_v8 = vld [vmem:[#allocation4 + $0x78] sm:$0x3] }
0x144b   :  { %v4638_v4 = vpop.f32.mrb[114].mxu1 }
0x144c   :  { %6343 = vtanh.f32 %v7981_v44  ;;  %v5835_v43 = vpop.f32.mrb[115].mxu1 }
0x144d   :  { %v4681_v16 = vpop.f32.mrb[116].mxu0  ;;  %v4538_v43 = vld [vmem:[#allocation4 + $0x7a] sm:$0x3] }
0x144e   :  { %v7984_v22 = vadd.f32 %v4681_v16, %v4535_v9  ;;  %v5840_v50 = vpop.f32.mrb[117].mxu0 }
0x144f   :  { %v4684_v35 = vpop.f32.mrb[118].mxu0 }
0x1450   :  { %6345 = vtanh.f32 %v7984_v22  ;;  %v5841_v32 = vpop.f32.mrb[119].mxu0 }
0x1451   :  { %v4727_v24 = vpop.f32.mrb[116].mxu1 }
0x1452   :  { %v6342_v47 = vpop.eup %6341  ;;  %v7987_v41 = vadd.f32 %v4727_v24, %v4536_v6  ;;  %v5846_v0 = vpop.f32.mrb[117].mxu1 }
0x1453   :  { %v4730_v54 = vpop.f32.mrb[118].mxu1  ;;  %4997 = vrot.lane.b32.xlu0 %v6342_v47, %s6509_s1  ;;  %v4539_v47 = vld [vmem:[#allocation4 + $0x7c] sm:$0x3] }
0x1454   :  { %6347 = vtanh.f32 %v7987_v41  ;;  %v5847_v60 = vpop.f32.mrb[119].mxu1 }
0x1455   :  { %v4773_v33 = vpop.f32.mrb[120].mxu0 }
0x1456   :  { %v6344_v29 = vpop.eup %6343  ;;  %v7991_v46 = vadd.f32 %v4773_v33, %v4537_v8  ;;  %v5852_v4 = vpop.f32.mrb[121].mxu0 }
0x1457   :  { %4999 = vrot.lane.b32.xlu1 %v6344_v29, %s6509_s1  ;;  %v4776_v9 = vpop.f32.mrb[122].mxu0  ;;  %v4540_v4 = vld [vmem:[#allocation4 + $0x7e] sm:$0x3] }
0x1458   :  { %6349 = vtanh.f32 %v7991_v46  ;;  %v5853_v16 = vpop.f32.mrb[123].mxu0 }
0x1459   :  { %v4819_v35 = vpop.f32.mrb[120].mxu1 }
0x145a   :  { %v6346_v50 = vpop.eup %6345  ;;  %v4922_v6 = vadd.f32 %v4819_v35, %v4538_v43  ;;  %v5858_v32 = vpop.f32.mrb[121].mxu1 }
0x145b   :  { %5001 = vrot.lane.b32.xlu0 %v6346_v50, %s6509_s1  ;;  %v4822_v24 = vpop.f32.mrb[122].mxu1 }
0x145c   :  { %6351 = vtanh.f32 %v4922_v6  ;;  %v5859_v0 = vpop.f32.mrb[123].mxu1 }
0x145d   :  { %v4865_v60 = vpop.f32.mrb[124].mxu0 }
0x145e   :  { %v6348_v54 = vpop.eup %6347  ;;  %v4923_v8 = vadd.f32 %v4865_v60, %v4539_v47  ;;  %v5864_v33 = vpop.f32.mrb[125].mxu0 }
0x145f   :  { %5003 = vrot.lane.b32.xlu1 %v6348_v54, %s6509_s1  ;;  %v4868_v29 = vpop.f32.mrb[126].mxu0 }
0x1460   :  { %6353 = vtanh.f32 %v4923_v8  ;;  %v5865_v9 = vpop.f32.mrb[127].mxu0 }
0x1461   :  { %v4911_v16 = vpop.f32.mrb[124].mxu1 }
0x1462   :  { %v6350_v31 = vpop.eup %6349  ;;  %v4924_v43 = vadd.f32 %v4911_v16, %v4540_v4  ;;  %v5870_v35 = vpop.f32.mrb[125].mxu1 }
0x1463   :  { %v4914_v32 = vpop.f32.mrb[126].mxu1  ;;  %5005 = vrot.lane.b32.xlu0 %v6350_v31, %s6509_s1 }
0x1464   :  { %6355 = vtanh.f32 %v4924_v43  ;;  %v5871_v50 = vpop.f32.mrb[127].mxu1 }
0x1466   :  { %v6352_v24 = vpop.eup %6351 }
0x1467   :  { %5007 = vrot.lane.b32.xlu1 %v6352_v24, %s6509_s1 }
0x146a   :  { %v6354_v47 = vpop.eup %6353 }
0x146b   :  { %5009 = vrot.lane.b32.xlu0 %v6354_v47, %s6509_s1 }
0x146e   :  { %v6356_v0 = vpop.eup %6355 }
0x146f   :  { %5011 = vrot.lane.b32.xlu1 %v6356_v0, %s6509_s1  ;;  %743 = vrot.lane.b32.xlu0 %v6755_v17, %s6511_s9  ;;  %v5352_v17 = vmul.f32 -1.442695, %v7978_v56  ;;  %v5359_v56 = vmul.f32 -1.442695, %v4924_v43 }
0x1471   :  { %6357 = vpow2.f32 %v5352_v17 }
0x1473   :  { %745 = vrot.lane.b32.xlu1 %v6760_v23, %s6511_s9  ;;  %747 = vrot.lane.b32.xlu0 %v6766_v27, %s6511_s9  ;;  %v5353_v23 = vmul.f32 -1.442695, %v7981_v44  ;;  %v5354_v27 = vmul.f32 -1.442695, %v7984_v22 }
0x1475   :  { %6359 = vpow2.f32 %v5353_v23 }
0x1476   :  { %6361 = vpow2.f32 %v5354_v27 }
0x1477   :  { %749 = vrot.lane.b32.xlu1 %v6772_v30, %s6511_s9  ;;  %751 = vrot.lane.b32.xlu0 %v6779_v55, %s6511_s9  ;;  %v5355_v30 = vmul.f32 -1.442695, %v7987_v41 }
0x1479   :  { %6363 = vpow2.f32 %v5355_v30 }
0x147b   :  { %753 = vrot.lane.b32.xlu1 %v6784_v36, %s6511_s9  ;;  %755 = vrot.lane.b32.xlu0 %v6791_v39, %s6511_s9  ;;  %v6358_v55 = vpop.eup %6357 }
0x147c   :  { %v4949_v36 = vadd.f32 1.0, %v6358_v55 }
0x147e   :  { %6365 = vrcp.f32 %v4949_v36 }
0x147f   :  { %757 = vrot.lane.b32.xlu1 %v6796_v28, %s6511_s9  ;;  %1369 = vrot.lane.b32.xlu0 %v6939_v5, %s6511_s9  ;;  %v6360_v39 = vpop.eup %6359  ;;  %v5356_v28 = vmul.f32 -1.442695, %v7991_v46 }
0x1480   :  { %v4950_v5 = vadd.f32 1.0, %v6360_v39 }
0x1481   :  { %6367 = vpow2.f32 %v5356_v28 }
0x1482   :  { %6369 = vrcp.f32 %v4950_v5 }
0x1483   :  { %1371 = vrot.lane.b32.xlu1 %v6944_v7, %s6511_s9  ;;  %1373 = vrot.lane.b32.xlu0 %v6950_v19, %s6511_s9  ;;  %v6362_v7 = vpop.eup %6361  ;;  %v5357_v19 = vmul.f32 -1.442695, %v4922_v6 }
0x1485   :  { %6371 = vpow2.f32 %v5357_v19 }
0x1487   :  { %1375 = vrot.lane.b32.xlu1 %v6956_v1, %s6511_s9  ;;  %1377 = vrot.lane.b32.xlu0 %v6963_v62, %s6511_s9  ;;  %v4951_v1 = vadd.f32 1.0, %v6362_v7  ;;  %v6364_v62 = vpop.eup %6363 }
0x1488   :  { %v4952_v31 = vadd.f32 1.0, %v6364_v62  ;;  %v8034_v44 = vpop.eup %6365 }
0x1489   :  { %6373 = vrcp.f32 %v4951_v1 }
0x148b   :  { %1379 = vrot.lane.b32.xlu1 %v6968_v2, %s6511_s9  ;;  %v5358_v2 = vmul.f32 -1.442695, %v4923_v8  ;;  %v6368_v22 = vpop.eup %6367 }
0x148c   :  { %v8037_v54 = vpop.eup %6369  ;;  %v4953_v6 = vadd.f32 1.0, %v6368_v22 }
0x148d   :  { %6375 = vpow2.f32 %v5358_v2 }
0x148e   :  { %6377 = vrcp.f32 %v4952_v31 }
0x148f   :  { %6379 = vpow2.f32 %v5359_v56  ;;  %v6372_v60 = vpop.eup %6371 }
0x1490   :  { %6381 = vrcp.f32 %v4953_v6  ;;  %v4954_v4 = vadd.f32 1.0, %v6372_v60  ;;  %v8379_v6 = vld [vmem:[#allocation17_spill] sm:$0xff]  ;;  %v8381_v60 = vld [vmem:[#allocation19_spill] sm:$0xff] }
0x1492   :  { %6383 = vrcp.f32 %v4954_v4  ;;  %v8384_v4 = vld [vmem:[#allocation22_spill] sm:$0xff] }
0x1493   :  { %v8041_v29 = vpop.eup %6373 }
0x1497   :  { %v6376_v9 = vpop.eup %6375 }
0x1498   :  { %v8045_v35 = vpop.eup %6377  ;;  %v4955_v32 = vadd.f32 1.0, %v6376_v9  ;;  %v8385_v9 = vld [vmem:[#allocation23_spill] sm:$0xff] }
0x1499   :  { %v6380_v50 = vpop.eup %6379 }
0x149a   :  { %6385 = vrcp.f32 %v4955_v32  ;;  %v4956_v0 = vadd.f32 1.0, %v6380_v50  ;;  %v8050_v17 = vpop.eup %6381 }
0x149c   :  { %6387 = vrcp.f32 %v4956_v0  ;;  %v8054_v30 = vpop.eup %6383 }
0x14a4   :  { %v8058_v39 = vpop.eup %6385 }
0x14a6   :  { %v8062_v7 = vpop.eup %6387 }
0x14c5   :  { %v4998_v41 = vpop.permute.xlu0 %4997 }
0x14c6   :  { %v5021_v46 = vmul.f32 %v8034_v44, %v4998_v41 }
0x14c8   :  { %5037 = vrot.lane.b32.xlu0 %v5021_v46, %s6510_s8  ;;  %v8378_v46 = vld [vmem:[#allocation16_spill] sm:$0xff] }
0x14c9   :  { %v5000_v33 = vpop.permute.xlu1 %4999 }
0x14ca   :  { %v5022_v8 = vmul.f32 %v8037_v54, %v5000_v33  ;;  %v8382_v33 = vld [vmem:[#allocation20_spill] sm:$0xff] }
0x14cc   :  { %5039 = vrot.lane.b32.xlu1 %v5022_v8, %s6510_s8  ;;  %v8383_v8 = vld [vmem:[#allocation21_spill] sm:$0xff] }
0x14cd   :  { %v5002_v16 = vpop.permute.xlu0 %5001 }
0x14ce   :  { %v5023_v43 = vmul.f32 %v8041_v29, %v5002_v16  ;;  %v8386_v16 = vld [vmem:[#allocation24_spill] sm:$0xff] }
0x14d0   :  { %5041 = vrot.lane.b32.xlu0 %v5023_v43, %s6510_s8  ;;  %v4981_v43 = vmul.f32 %v8034_v44, %v7854_v3  ;;  %v4984_v3 = vmul.f32 %v8045_v35, %v7869_v20  ;;  %v4986_v20 = vmul.f32 %v8054_v30, %v7881_v34  ;;  %v4988_v34 = vmul.f32 %v8062_v7, %v7893_v14 }
0x14d1   :  { %v5004_v24 = vpop.permute.xlu1 %5003 }
0x14d2   :  { %v5024_v47 = vmul.f32 %v8045_v35, %v5004_v24  ;;  %v4982_v24 = vmul.f32 %v8037_v54, %v7859_v52  ;;  %v4985_v52 = vmul.f32 %v8050_v17, %v7875_v59  ;;  %v4987_v59 = vmul.f32 %v8058_v39, %v7887_v45 }
0x14d4   :  { %5043 = vrot.lane.b32.xlu1 %v5024_v47, %s6510_s8 }
0x14d5   :  { %v5006_v23 = vpop.permute.xlu0 %5005 }
0x14d6   :  { %v5025_v27 = vmul.f32 %v8050_v17, %v5006_v23  ;;  %v4983_v23 = vmul.f32 %v8041_v29, %v7864_v37 }
0x14d8   :  { %5045 = vrot.lane.b32.xlu0 %v5025_v27, %s6510_s8 }
0x14d9   :  { %v5008_v55 = vpop.permute.xlu1 %5007 }
0x14da   :  { %v5026_v36 = vmul.f32 %v8054_v30, %v5008_v55 }
0x14dc   :  { %5047 = vrot.lane.b32.xlu1 %v5026_v36, %s6510_s8 }
0x14dd   :  { %v5010_v28 = vpop.permute.xlu0 %5009 }
0x14de   :  { %v5027_v5 = vmul.f32 %v8058_v39, %v5010_v28 }
0x14e0   :  { %5049 = vrot.lane.b32.xlu0 %v5027_v5, %s6510_s8 }
0x14e1   :  { %v5012_v19 = vpop.permute.xlu1 %5011  ;;  %v744_v1 = vpop.permute.xlu0 %743 }
0x14e2   :  { %v5028_v62 = vmul.f32 %v8062_v7, %v5012_v19  ;;  %768 = vst.msk [vmem:[#allocation9] sm:$0x3] %vm45_vm0, %v744_v1 }
0x14e4   :  { %5051 = vrot.lane.b32.xlu1 %v5028_v62, %s6510_s8  ;;  %1381 = vrot.lane.b32.xlu0 %v6974_v57, %s6511_s9 }
0x14e5   :  { %v746_v2 = vpop.permute.xlu1 %745  ;;  %v748_v31 = vpop.permute.xlu0 %747 }
0x14e6   :  { %769 = vst.msk [vmem:[#allocation9 + $0x2] sm:$0x3] %vm45_vm0, %v746_v2  ;;  %770 = vst.msk [vmem:[#allocation9 + $0x4] sm:$0x3] %vm45_vm0, %v748_v31 }
0x14e8   :  { %1383 = vrot.lane.b32.xlu1 %v6980_v61, %s6511_s9  ;;  %1995 = vrot.lane.b32.xlu0 %v7139_v38, %s6511_s9 }
0x14e9   :  { %v750_v56 = vpop.permute.xlu1 %749  ;;  %v752_v22 = vpop.permute.xlu0 %751 }
0x14ea   :  { %771 = vst.msk [vmem:[#allocation9 + $0x6] sm:$0x3] %vm45_vm0, %v750_v56  ;;  %772 = vst.msk [vmem:[#allocation9 + $0x8] sm:$0x3] %vm45_vm0, %v752_v22 }
0x14ec   :  { %1997 = vrot.lane.b32.xlu1 %v7144_v10, %s6511_s9  ;;  %1999 = vrot.lane.b32.xlu0 %v7150_v51, %s6511_s9 }
0x14ed   :  { %v754_v57 = vpop.permute.xlu1 %753  ;;  %v756_v41 = vpop.permute.xlu0 %755 }
0x14ee   :  { %773 = vst.msk [vmem:[#allocation9 + $0xa] sm:$0x3] %vm45_vm0, %v754_v57  ;;  %774 = vst.msk [vmem:[#allocation9 + $0xc] sm:$0x3] %vm45_vm0, %v756_v41 }
0x14f0   :  { %2001 = vrot.lane.b32.xlu1 %v7156_v15, %s6511_s9  ;;  %2003 = vrot.lane.b32.xlu0 %v7163_v53, %s6511_s9 }
0x14f1   :  { %v758_v61 = vpop.permute.xlu1 %757  ;;  %v1370_v38 = vpop.permute.xlu0 %1369 }
0x14f2   :  { %775 = vst.msk [vmem:[#allocation9 + $0xe] sm:$0x3] %vm45_vm0, %v758_v61  ;;  %1394 = vst.msk [vmem:[#allocation9 + $0x10] sm:$0x3] %vm45_vm0, %v1370_v38 }
0x14f4   :  { %2005 = vrot.lane.b32.xlu1 %v7168_v12, %s6511_s9  ;;  %2007 = vrot.lane.b32.xlu0 %v7174_v13, %s6511_s9  ;;  %v8375_v12 = vld [vmem:[#allocation13_spill] sm:$0xff] }
0x14f5   :  { %v1372_v10 = vpop.permute.xlu1 %1371  ;;  %v1374_v51 = vpop.permute.xlu0 %1373 }
0x14f6   :  { %1395 = vst.msk [vmem:[#allocation9 + $0x12] sm:$0x3] %vm45_vm0, %v1372_v10  ;;  %1396 = vst.msk [vmem:[#allocation9 + $0x14] sm:$0x3] %vm45_vm0, %v1374_v51 }
0x14f8   :  { %2009 = vrot.lane.b32.xlu1 %v7180_v26, %s6511_s9  ;;  %2621 = vrot.lane.b32.xlu0 %v7323_v49, %s6511_s9  ;;  %v8376_v26 = vld [vmem:[#allocation14_spill] sm:$0xff]  ;;  %v8377_v49 = vld [vmem:[#allocation15_spill] sm:$0xff] }
0x14f9   :  { %v1376_v15 = vpop.permute.xlu1 %1375  ;;  %v1378_v53 = vpop.permute.xlu0 %1377 }
0x14fa   :  { %1397 = vst.msk [vmem:[#allocation9 + $0x16] sm:$0x3] %vm45_vm0, %v1376_v15  ;;  %1398 = vst.msk [vmem:[#allocation9 + $0x18] sm:$0x3] %vm45_vm0, %v1378_v53 }
0x14fc   :  { %2623 = vrot.lane.b32.xlu1 %v7328_v21, %s6511_s9  ;;  %2625 = vrot.lane.b32.xlu0 %v8375_v12, %s6511_s9  ;;  %v8380_v21 = vld [vmem:[#allocation18_spill] sm:$0xff] }
0x14fd   :  { %v1380_v13 = vpop.permute.xlu1 %1379 }
0x14fe   :  { %1399 = vst.msk [vmem:[#allocation9 + $0x1a] sm:$0x3] %vm45_vm0, %v1380_v13 }
0x1500   :  { %2627 = vrot.lane.b32.xlu1 %v8376_v26, %s6511_s9  ;;  %2629 = vrot.lane.b32.xlu0 %v8377_v49, %s6511_s9 }
0x1504   :  { %2631 = vrot.lane.b32.xlu1 %v8378_v46, %s6511_s9  ;;  %2633 = vrot.lane.b32.xlu0 %v8379_v6, %s6511_s9  ;;  %v8388_v46 = vld [vmem:[#allocation27_spill] sm:$0xff] }
0x1508   :  { %2635 = vrot.lane.b32.xlu1 %v8380_v21, %s6511_s9  ;;  %3247 = vrot.lane.b32.xlu0 %v7523_v63, %s6511_s9  ;;  %v8387_v63 = vld [vmem:[#allocation25_spill] sm:$0xff] }
0x150c   :  { %3249 = vrot.lane.b32.xlu1 %v8381_v60, %s6511_s9  ;;  %3251 = vrot.lane.b32.xlu0 %v8382_v33, %s6511_s9  ;;  %v8389_v60 = vld [vmem:[#allocation26_spill] sm:$0xff]  ;;  %v8390_v33 = vld [vmem:[#allocation29_spill] sm:$0xff] }
0x1510   :  { %3253 = vrot.lane.b32.xlu1 %v8383_v8, %s6511_s9  ;;  %3255 = vrot.lane.b32.xlu0 %v8384_v4, %s6511_s9 }
0x1514   :  { %3257 = vrot.lane.b32.xlu1 %v8385_v9, %s6511_s9  ;;  %3259 = vrot.lane.b32.xlu0 %v8386_v16, %s6511_s9  ;;  %v8391_v9 = vld [vmem:[#allocation28_spill] sm:$0xff]  ;;  %v8392_v16 = vld [vmem:[#allocation31_spill] sm:$0xff] }
0x1518   :  { %3261 = vrot.lane.b32.xlu1 %v8387_v63, %s6511_s9 }
0x153a   :  { %v5038_v32 = vpop.permute.xlu0 %5037 }
0x153b   :  { %v8134_v50 = vadd.f32 %v5038_v32, %v4981_v43  ;;  %v8393_v32 = vld [vmem:[#allocation30_spill] sm:$0xff] }
0x153d   :  { %6389 = vtanh.f32 %v8134_v50 }
0x153e   :  { %v5040_v47 = vpop.permute.xlu1 %5039 }
0x153f   :  { %v8139_v0 = vadd.f32 %v5040_v47, %v4982_v24  ;;  %v8394_v24 = vld [vmem:[#allocation33_spill] sm:$0xff] }
0x1541   :  { %6391 = vtanh.f32 %v8139_v0 }
0x1542   :  { %v5042_v27 = vpop.permute.xlu0 %5041 }
0x1543   :  { %v8144_v55 = vadd.f32 %v5042_v27, %v4983_v23  ;;  %v8395_v27 = vld [vmem:[#allocation32_spill] sm:$0xff] }
0x1545   :  { %6393 = vtanh.f32 %v8144_v55 }
0x1546   :  { %v5044_v36 = vpop.permute.xlu1 %5043 }
0x1547   :  { %v6390_v28 = vpop.eup %6389  ;;  %v8149_v5 = vadd.f32 %v5044_v36, %v4984_v3 }
0x1548   :  { %5085 = vrot.lane.b32.xlu1 %v6390_v28, %s6502_s19 }
0x1549   :  { %6395 = vtanh.f32 %v8149_v5 }
0x154a   :  { %v5046_v19 = vpop.permute.xlu0 %5045 }
0x154b   :  { %v6392_v37 = vpop.eup %6391  ;;  %v8155_v1 = vadd.f32 %v5046_v19, %v4985_v52 }
0x154c   :  { %5087 = vrot.lane.b32.xlu0 %v6392_v37, %s6502_s19 }
0x154d   :  { %6397 = vtanh.f32 %v8155_v1 }
0x154e   :  { %v5048_v2 = vpop.permute.xlu1 %5047 }
0x154f   :  { %v6394_v62 = vpop.eup %6393  ;;  %v8161_v31 = vadd.f32 %v5048_v2, %v4986_v20 }
0x1550   :  { %5089 = vrot.lane.b32.xlu1 %v6394_v62, %s6502_s19 }
0x1551   :  { %6399 = vtanh.f32 %v8161_v31 }
0x1552   :  { %v5050_v22 = vpop.permute.xlu0 %5049 }
0x1553   :  { %v6396_v56 = vpop.eup %6395  ;;  %v8167_v57 = vadd.f32 %v5050_v22, %v4987_v59 }
0x1554   :  { %5091 = vrot.lane.b32.xlu0 %v6396_v56, %s6502_s19 }
0x1555   :  { %6401 = vtanh.f32 %v8167_v57 }
0x1556   :  { %v5052_v41 = vpop.permute.xlu1 %5051  ;;  %v1382_v61 = vpop.permute.xlu0 %1381 }
0x1557   :  { %v6398_v38 = vpop.eup %6397  ;;  %v8173_v10 = vadd.f32 %v5052_v41, %v4988_v34  ;;  %1400 = vst.msk [vmem:[#allocation9 + $0x1c] sm:$0x3] %vm45_vm0, %v1382_v61 }
0x1558   :  { %5093 = vrot.lane.b32.xlu1 %v6398_v38, %s6502_s19 }
0x1559   :  { %6403 = vtanh.f32 %v8173_v10 }
0x155a   :  { %v1384_v45 = vpop.permute.xlu1 %1383  ;;  %v1996_v51 = vpop.permute.xlu0 %1995 }
0x155b   :  { %v6400_v15 = vpop.eup %6399  ;;  %1401 = vst.msk [vmem:[#allocation9 + $0x1e] sm:$0x3] %vm45_vm0, %v1384_v45  ;;  %2020 = vst.msk [vmem:[#allocation9 + $0x20] sm:$0x3] %vm45_vm0, %v1996_v51 }
0x155c   :  { %5095 = vrot.lane.b32.xlu0 %v6400_v15, %s6502_s19 }
0x155e   :  { %v1998_v14 = vpop.permute.xlu1 %1997  ;;  %v2000_v53 = vpop.permute.xlu0 %1999 }
0x155f   :  { %v6402_v12 = vpop.eup %6401  ;;  %2021 = vst.msk [vmem:[#allocation9 + $0x22] sm:$0x3] %vm45_vm0, %v1998_v14  ;;  %2022 = vst.msk [vmem:[#allocation9 + $0x24] sm:$0x3] %vm45_vm0, %v2000_v53 }
0x1560   :  { %5097 = vrot.lane.b32.xlu1 %v6402_v12, %s6502_s19 }
0x1562   :  { %v2002_v13 = vpop.permute.xlu1 %2001  ;;  %v2004_v26 = vpop.permute.xlu0 %2003 }
0x1563   :  { %v6404_v49 = vpop.eup %6403  ;;  %2023 = vst.msk [vmem:[#allocation9 + $0x26] sm:$0x3] %vm45_vm0, %v2002_v13  ;;  %2024 = vst.msk [vmem:[#allocation9 + $0x28] sm:$0x3] %vm45_vm0, %v2004_v26 }
0x1564   :  { %5099 = vrot.lane.b32.xlu0 %v6404_v49, %s6502_s19  ;;  %3875 = vrot.lane.b32.xlu1 %v8388_v46, %s6511_s9 }
0x1566   :  { %v2006_v6 = vpop.permute.xlu1 %2005  ;;  %v2008_v21 = vpop.permute.xlu0 %2007 }
0x1567   :  { %2025 = vst.msk [vmem:[#allocation9 + $0x2a] sm:$0x3] %vm45_vm0, %v2006_v6  ;;  %2026 = vst.msk [vmem:[#allocation9 + $0x2c] sm:$0x3] %vm45_vm0, %v2008_v21 }
0x1568   :  { %3873 = vrot.lane.b32.xlu0 %v8389_v60, %s6511_s9  ;;  %3879 = vrot.lane.b32.xlu1 %v8390_v33, %s6511_s9 }
0x156a   :  { %v2010_v8 = vpop.permute.xlu1 %2009  ;;  %v2622_v4 = vpop.permute.xlu0 %2621 }
0x156b   :  { %2027 = vst.msk [vmem:[#allocation9 + $0x2e] sm:$0x3] %vm45_vm0, %v2010_v8  ;;  %2646 = vst.msk [vmem:[#allocation9 + $0x30] sm:$0x3] %vm45_vm0, %v2622_v4 }
0x156c   :  { %3877 = vrot.lane.b32.xlu0 %v8391_v9, %s6511_s9  ;;  %3883 = vrot.lane.b32.xlu1 %v8392_v16, %s6511_s9 }
0x156e   :  { %v2624_v63 = vpop.permute.xlu1 %2623  ;;  %v2626_v43 = vpop.permute.xlu0 %2625 }
0x156f   :  { %2647 = vst.msk [vmem:[#allocation9 + $0x32] sm:$0x3] %vm45_vm0, %v2624_v63  ;;  %2648 = vst.msk [vmem:[#allocation9 + $0x34] sm:$0x3] %vm45_vm0, %v2626_v43 }
0x1570   :  { %3881 = vrot.lane.b32.xlu0 %v8393_v32, %s6511_s9  ;;  %3887 = vrot.lane.b32.xlu1 %v8394_v24, %s6511_s9 }
0x1572   :  { %v2628_v47 = vpop.permute.xlu1 %2627  ;;  %v2630_v23 = vpop.permute.xlu0 %2629 }
0x1573   :  { %2649 = vst.msk [vmem:[#allocation9 + $0x36] sm:$0x3] %vm45_vm0, %v2628_v47  ;;  %2650 = vst.msk [vmem:[#allocation9 + $0x38] sm:$0x3] %vm45_vm0, %v2630_v23 }
0x1574   :  { %3885 = vrot.lane.b32.xlu0 %v8395_v27, %s6511_s9  ;;  %4501 = vrot.lane.b32.xlu1 %v7906_v18, %s6511_s9 }
0x1576   :  { %v2632_v3 = vpop.permute.xlu1 %2631  ;;  %v2634_v36 = vpop.permute.xlu0 %2633 }
0x1577   :  { %2651 = vst.msk [vmem:[#allocation9 + $0x3a] sm:$0x3] %vm45_vm0, %v2632_v3  ;;  %2652 = vst.msk [vmem:[#allocation9 + $0x3c] sm:$0x3] %vm45_vm0, %v2634_v36 }
0x1578   :  { %4499 = vrot.lane.b32.xlu0 %v7901_v25, %s6511_s9  ;;  %4505 = vrot.lane.b32.xlu1 %v7918_v48, %s6511_s9 }
0x157a   :  { %v2636_v28 = vpop.permute.xlu1 %2635  ;;  %v3248_v52 = vpop.permute.xlu0 %3247 }
0x157b   :  { %2653 = vst.msk [vmem:[#allocation9 + $0x3e] sm:$0x3] %vm45_vm0, %v2636_v28  ;;  %3272 = vst.msk [vmem:[#allocation9 + $0x40] sm:$0x3] %vm45_vm0, %v3248_v52 }
0x157c   :  { %4503 = vrot.lane.b32.xlu0 %v7912_v42, %s6511_s9  ;;  %4509 = vrot.lane.b32.xlu1 %v7930_v40, %s6511_s9  ;;  %v8396_v42 = vld [vmem:[#allocation34_spill] sm:$0xff] }
0x157e   :  { %v3250_v18 = vpop.permute.xlu1 %3249  ;;  %v3252_v37 = vpop.permute.xlu0 %3251 }
0x157f   :  { %3273 = vst.msk [vmem:[#allocation9 + $0x42] sm:$0x3] %vm45_vm0, %v3250_v18  ;;  %3274 = vst.msk [vmem:[#allocation9 + $0x44] sm:$0x3] %vm45_vm0, %v3252_v37 }
0x1580   :  { %4507 = vrot.lane.b32.xlu0 %v7925_v58, %s6511_s9  ;;  %4513 = vrot.lane.b32.xlu1 %v7942_v11, %s6511_s9 }
0x1582   :  { %v3254_v25 = vpop.permute.xlu1 %3253  ;;  %v3256_v48 = vpop.permute.xlu0 %3255 }
0x1583   :  { %3275 = vst.msk [vmem:[#allocation9 + $0x46] sm:$0x3] %vm45_vm0, %v3254_v25  ;;  %3276 = vst.msk [vmem:[#allocation9 + $0x48] sm:$0x3] %vm45_vm0, %v3256_v48 }
0x1584   :  { %4511 = vrot.lane.b32.xlu0 %v8396_v42, %s6511_s9  ;;  %5176 = vrot.lane.b32.xlu1 %v8139_v0, %s6512_s10 }
0x1586   :  { %v3258_v40 = vpop.permute.xlu1 %3257  ;;  %v3260_v19 = vpop.permute.xlu0 %3259 }
0x1587   :  { %3277 = vst.msk [vmem:[#allocation9 + $0x4a] sm:$0x3] %vm45_vm0, %v3258_v40  ;;  %3278 = vst.msk [vmem:[#allocation9 + $0x4c] sm:$0x3] %vm45_vm0, %v3260_v19 }
0x1588   :  { %5174 = vrot.lane.b32.xlu0 %v8134_v50, %s6512_s10  ;;  %5180 = vrot.lane.b32.xlu1 %v8149_v5, %s6512_s10 }
0x158a   :  { %v3262_v58 = vpop.permute.xlu1 %3261 }
0x158b   :  { %3279 = vst.msk [vmem:[#allocation9 + $0x4e] sm:$0x3] %vm45_vm0, %v3262_v58 }
0x158c   :  { %5178 = vrot.lane.b32.xlu0 %v8144_v55, %s6512_s10  ;;  %5184 = vrot.lane.b32.xlu1 %v8161_v31, %s6512_s10 }
0x1590   :  { %5182 = vrot.lane.b32.xlu0 %v8155_v1, %s6512_s10 }
0x15ba   :  { %v5086_v11 = vpop.permute.xlu1 %5085 }
0x15bb   :  { %v5109_v0 = vmul.f32 %v8034_v44, %v5086_v11 }
0x15bd   :  { %5125 = vrot.lane.b32.xlu0 %v5109_v0, %s6511_s9 }
0x15be   :  { %v5088_v50 = vpop.permute.xlu0 %5087 }
0x15bf   :  { %v5110_v5 = vmul.f32 %v8037_v54, %v5088_v50 }
0x15c1   :  { %5127 = vrot.lane.b32.xlu1 %v5110_v5, %s6511_s9 }
0x15c2   :  { %v5090_v20 = vpop.permute.xlu1 %5089 }
0x15c3   :  { %v5111_v62 = vmul.f32 %v8041_v29, %v5090_v20 }
0x15c5   :  { %5129 = vrot.lane.b32.xlu0 %v5111_v62, %s6511_s9 }
0x15c6   :  { %v5092_v55 = vpop.permute.xlu0 %5091 }
0x15c7   :  { %v5112_v2 = vmul.f32 %v8045_v35, %v5092_v55 }
0x15c9   :  { %5131 = vrot.lane.b32.xlu1 %v5112_v2, %s6511_s9 }
0x15ca   :  { %v5094_v1 = vpop.permute.xlu1 %5093 }
0x15cb   :  { %v5113_v44 = vmul.f32 %v8050_v17, %v5094_v1 }
0x15cd   :  { %5133 = vrot.lane.b32.xlu0 %v5113_v44, %s6511_s9 }
0x15ce   :  { %v5096_v31 = vpop.permute.xlu0 %5095 }
0x15cf   :  { %v5114_v54 = vmul.f32 %v8054_v30, %v5096_v31 }
0x15d1   :  { %5135 = vrot.lane.b32.xlu1 %v5114_v54, %s6511_s9 }
0x15d2   :  { %v5098_v59 = vpop.permute.xlu1 %5097 }
0x15d3   :  { %v5115_v29 = vmul.f32 %v8058_v39, %v5098_v59 }
0x15d5   :  { %5137 = vrot.lane.b32.xlu0 %v5115_v29, %s6511_s9 }
0x15d6   :  { %v5100_v56 = vpop.permute.xlu0 %5099  ;;  %v3876_v22 = vpop.permute.xlu1 %3875 }
0x15d7   :  { %v5116_v35 = vmul.f32 %v8062_v7, %v5100_v56  ;;  %3899 = vst.msk [vmem:[#allocation9 + $0x52] sm:$0x3] %vm45_vm0, %v3876_v22 }
0x15d9   :  { %5139 = vrot.lane.b32.xlu1 %v5116_v35, %s6511_s9  ;;  %5186 = vrot.lane.b32.xlu0 %v8167_v57, %s6512_s10 }
0x15da   :  { %v3874_v17 = vpop.permute.xlu0 %3873  ;;  %v3880_v30 = vpop.permute.xlu1 %3879 }
0x15db   :  { %3898 = vst.msk [vmem:[#allocation9 + $0x50] sm:$0x3] %vm45_vm0, %v3874_v17  ;;  %3901 = vst.msk [vmem:[#allocation9 + $0x56] sm:$0x3] %vm45_vm0, %v3880_v30 }
0x15dd   :  { %5188 = vrot.lane.b32.xlu1 %v8173_v10, %s6512_s10 }
0x15de   :  { %v3878_v39 = vpop.permute.xlu0 %3877  ;;  %v3884_v34 = vpop.permute.xlu1 %3883 }
0x15df   :  { %3900 = vst.msk [vmem:[#allocation9 + $0x54] sm:$0x3] %vm45_vm0, %v3878_v39  ;;  %3903 = vst.msk [vmem:[#allocation9 + $0x5a] sm:$0x3] %vm45_vm0, %v3884_v34 }
0x15e2   :  { %v3882_v7 = vpop.permute.xlu0 %3881  ;;  %v3888_v41 = vpop.permute.xlu1 %3887 }
0x15e3   :  { %3902 = vst.msk [vmem:[#allocation9 + $0x58] sm:$0x3] %vm45_vm0, %v3882_v7  ;;  %3905 = vst.msk [vmem:[#allocation9 + $0x5e] sm:$0x3] %vm45_vm0, %v3888_v41 }
0x15e6   :  { %v3886_v57 = vpop.permute.xlu0 %3885  ;;  %v4502_v61 = vpop.permute.xlu1 %4501 }
0x15e7   :  { %3904 = vst.msk [vmem:[#allocation9 + $0x5c] sm:$0x3] %vm45_vm0, %v3886_v57  ;;  %4525 = vst.msk [vmem:[#allocation9 + $0x62] sm:$0x3] %vm45_vm0, %v4502_v61 }
0x15ea   :  { %v4500_v38 = vpop.permute.xlu0 %4499  ;;  %v4506_v10 = vpop.permute.xlu1 %4505 }
0x15eb   :  { %4524 = vst.msk [vmem:[#allocation9 + $0x60] sm:$0x3] %vm45_vm0, %v4500_v38  ;;  %4527 = vst.msk [vmem:[#allocation9 + $0x66] sm:$0x3] %vm45_vm0, %v4506_v10 }
0x15ee   :  { %v4504_v45 = vpop.permute.xlu0 %4503  ;;  %v4510_v51 = vpop.permute.xlu1 %4509 }
0x15ef   :  { %4526 = vst.msk [vmem:[#allocation9 + $0x64] sm:$0x3] %vm45_vm0, %v4504_v45  ;;  %4529 = vst.msk [vmem:[#allocation9 + $0x6a] sm:$0x3] %vm45_vm0, %v4510_v51 }
0x15f2   :  { %v4508_v15 = vpop.permute.xlu0 %4507  ;;  %v4514_v14 = vpop.permute.xlu1 %4513 }
0x15f3   :  { %4528 = vst.msk [vmem:[#allocation9 + $0x68] sm:$0x3] %vm45_vm0, %v4508_v15  ;;  %4531 = vst.msk [vmem:[#allocation9 + $0x6e] sm:$0x3] %vm45_vm0, %v4514_v14 }
0x15f6   :  { %v4512_v53 = vpop.permute.xlu0 %4511  ;;  %v5177_v12 = vpop.permute.xlu1 %5176 }
0x15f7   :  { %4530 = vst.msk [vmem:[#allocation9 + $0x6c] sm:$0x3] %vm45_vm0, %v4512_v53  ;;  %5199 = vst.msk [vmem:[#allocation3 + $0x2] sm:$0x3] %vm45_vm0, %v5177_v12 }
0x15fa   :  { %v5175_v13 = vpop.permute.xlu0 %5174  ;;  %v5181_v26 = vpop.permute.xlu1 %5180 }
0x15fb   :  { %5198 = vst.msk [vmem:[#allocation3] sm:$0x3] %vm45_vm0, %v5175_v13  ;;  %5201 = vst.msk [vmem:[#allocation3 + $0x6] sm:$0x3] %vm45_vm0, %v5181_v26 }
0x15fe   :  { %v5179_v49 = vpop.permute.xlu0 %5178  ;;  %v5185_v46 = vpop.permute.xlu1 %5184 }
0x15ff   :  { %5200 = vst.msk [vmem:[#allocation3 + $0x4] sm:$0x3] %vm45_vm0, %v5179_v49  ;;  %5203 = vst.msk [vmem:[#allocation3 + $0xa] sm:$0x3] %vm45_vm0, %v5185_v46 }
0x1602   :  { %v5183_v6 = vpop.permute.xlu0 %5182 }
0x1603   :  { %5202 = vst.msk [vmem:[#allocation3 + $0x8] sm:$0x3] %vm45_vm0, %v5183_v6 }
0x162f   :  { %v5126_v21 = vpop.permute.xlu0 %5125 }
0x1630   :  { %5150 = vst.msk [vmem:[#allocation9 + $0x70] sm:$0x3] %vm45_vm0, %v5126_v21  ;;  %5158 = vst.msk [vmem:[#allocation2] sm:$0x3] %vm45_vm0, %v5126_v21 }
0x1633   :  { %v5128_v60 = vpop.permute.xlu1 %5127 }
0x1634   :  { %5151 = vst.msk [vmem:[#allocation9 + $0x72] sm:$0x3] %vm45_vm0, %v5128_v60  ;;  %5159 = vst.msk [vmem:[#allocation2 + $0x2] sm:$0x3] %vm45_vm0, %v5128_v60 }
0x1637   :  { %v5130_v33 = vpop.permute.xlu0 %5129 }
0x1638   :  { %5152 = vst.msk [vmem:[#allocation9 + $0x74] sm:$0x3] %vm45_vm0, %v5130_v33  ;;  %5160 = vst.msk [vmem:[#allocation2 + $0x4] sm:$0x3] %vm45_vm0, %v5130_v33 }
0x163b   :  { %v5132_v8 = vpop.permute.xlu1 %5131 }
0x163c   :  { %5153 = vst.msk [vmem:[#allocation9 + $0x76] sm:$0x3] %vm45_vm0, %v5132_v8  ;;  %5161 = vst.msk [vmem:[#allocation2 + $0x6] sm:$0x3] %vm45_vm0, %v5132_v8 }
0x163f   :  { %v5134_v4 = vpop.permute.xlu0 %5133 }
0x1640   :  { %5154 = vst.msk [vmem:[#allocation9 + $0x78] sm:$0x3] %vm45_vm0, %v5134_v4  ;;  %5162 = vst.msk [vmem:[#allocation2 + $0x8] sm:$0x3] %vm45_vm0, %v5134_v4 }
0x1643   :  { %v5136_v9 = vpop.permute.xlu1 %5135 }
0x1644   :  { %5155 = vst.msk [vmem:[#allocation9 + $0x7a] sm:$0x3] %vm45_vm0, %v5136_v9  ;;  %5163 = vst.msk [vmem:[#allocation2 + $0xa] sm:$0x3] %vm45_vm0, %v5136_v9 }
0x1647   :  { %v5138_v16 = vpop.permute.xlu0 %5137 }
0x1648   :  { %5156 = vst.msk [vmem:[#allocation9 + $0x7c] sm:$0x3] %vm45_vm0, %v5138_v16  ;;  %5164 = vst.msk [vmem:[#allocation2 + $0xc] sm:$0x3] %vm45_vm0, %v5138_v16 }
0x164b   :  { %v5187_v63 = vpop.permute.xlu0 %5186  ;;  %v5140_v43 = vpop.permute.xlu1 %5139 }
0x164c   :  { %5204 = vst.msk [vmem:[#allocation3 + $0xc] sm:$0x3] %vm45_vm0, %v5187_v63  ;;  %5157 = vst.msk [vmem:[#allocation9 + $0x7e] sm:$0x3] %vm45_vm0, %v5140_v43 }
0x164d   :  { %5165 = vst.msk [vmem:[#allocation2 + $0xe] sm:$0x3] %vm45_vm0, %v5140_v43 }
0x164e   :  { %6484 = shalt.err (!%p6481_p6)
}
0x164f   :  { %s6485_s16 = scalar_lea.hbm %s8327_s2, 2048 }
0x1650   :  { %p6486_p7 = scmp.ne.s32.totalorder %s8327_s2, %s6485_s16  ;;  %p6489_p8 = scmp.lt.u32.totalorder %s6485_s16, %s8327_s2 }
0x1652   :  { %p6491_p9 = pnand %p6489_p8, %p6486_p7 }
0x1654   :  { %6494 = shalt.err (!%p6491_p9)
}
0x1655   :  { %5217 = dma.vmem_to_hbm [thread:$0]  %s5212_s12, 2048, %s8327_s2, [#allocation6], %s6502_s19, %s6502_s19, %s6503_s20   ;;  %v5189_v32 = vpop.permute.xlu1 %5188 }
0x1656   :  { %5205 = vst.msk [vmem:[#allocation3 + $0xe] sm:$0x3] %vm45_vm0, %v5189_v32 }
0x1657   :  { %6499 = dma.done.wait [#allocation6], 2048  }
0x1658   :  { %6500 = vsyncadd [#allocation6], 4294965248 }
0x1659   :  { %5221 = vsyncpa [#allocation5], 1 }
0x165a   :  { %5222 = vsyncpa [#allocation8], 1 }
0x165b   :  { %5223 = vsyncpa [#allocation6], 1 }

</bundles_post_ra>
